<compile_context>
chip_gen: v5e
topology: v5e:2x2
jax: 0.10.0
libtpu: 0.0.40
codegen_flags: <defaults>
</compile_context>

<pallas_src>
import math
import functools

import jax
import jax.numpy as jnp
from jax.experimental import pallas as pl
from jax.experimental.pallas import tpu as pltpu


MATMUL_DTYPE = jnp.float32           # set to jnp.bfloat16 on v6e/v7x if desired
_VMEM_LIMIT = 48 * 1024 * 1024       # fits v5e/v6e (128 MiB) and v7x (64 MiB)
_LN_EPS = 1e-5                       # nn.LayerNorm default


def _compiler_params():
    return pltpu.CompilerParams(
        dimension_semantics=("parallel",),
        vmem_limit_bytes=_VMEM_LIMIT,
    )


def _row_tile(n, max_tile=512):
    """Largest row tile <= max_tile that divides n (multiple of 8 when tiling)."""
    if n <= max_tile:
        return n
    t = max_tile
    while t >= 8:
        if n % t == 0:
            return t
        t -= 8
    return n


# ----------------------------- Pallas kernels ------------------------------

def mha_ln_kernel(xq_ref, xkv_ref, wq_ref, bq_ref, wkv_ref, bkv_ref,
                  wo_ref, bo_ref, bias_ref, g_ref, b_ref, o_ref, *, num_heads):
    """One batch element: LayerNorm(xq + MHA(xq, xkv, xkv, bias)).

    xq_ref  : [1, Sq, D]   query-side activations (also the residual input)
    xkv_ref : [1, Sk, D]   key/value-side activations
    wq_ref  : [D, D]       query weight (pre-scaled by 1/sqrt(d_k))
    wkv_ref : [D, 2D]      fused key|value weight
    bias_ref: [1, Sq, Sk]  additive mask bias (0 where visible, -1e9 where masked)
    """
    xq = xq_ref[0]                      # [Sq, D]
    xkv = xkv_ref[0]                    # [Sk, D]
    D = xq.shape[-1]
    dk = D // num_heads

    # Fused projections (scale 1/sqrt(dk) already folded into wq/bq).
    q = jnp.dot(xq.astype(MATMUL_DTYPE), wq_ref[...].astype(MATMUL_DTYPE),
                preferred_element_type=jnp.float32) + bq_ref[...]
    kv = jnp.dot(xkv.astype(MATMUL_DTYPE), wkv_ref[...].astype(MATMUL_DTYPE),
                 preferred_element_type=jnp.float32) + bkv_ref[...]
    k = kv[:, :D]
    v = kv[:, D:]

    bias = bias_ref[0]                  # [Sq, Sk]

    # All heads in one kernel invocation (grid is only over batch).
    heads = []
    for h in range(num_heads):
        sl = slice(h * dk, (h + 1) * dk)
        qh, kh, vh = q[:, sl], k[:, sl], v[:, sl]
        # contract on d_k without materializing k.T
        s = jax.lax.dot_general(qh, kh, (((1,), (1,)), ((), ())),
                                preferred_element_type=jnp.float32)
        s = s + bias
        s = s - jnp.max(s, axis=-1, keepdims=True)
        p = jnp.exp(s)
        p = p * pl.reciprocal(jnp.sum(p, axis=-1, keepdims=True), approx=True)
        heads.append(jnp.dot(p.astype(MATMUL_DTYPE), vh.astype(MATMUL_DTYPE),
                             preferred_element_type=jnp.float32))
    ctx = jnp.concatenate(heads, axis=-1)            # [Sq, D]

    # Output projection + residual + LayerNorm, all fused.
    o = jnp.dot(ctx.astype(MATMUL_DTYPE), wo_ref[...].astype(MATMUL_DTYPE),
                preferred_element_type=jnp.float32) + bo_ref[...]
    y = xq + o
    mean = jnp.mean(y, axis=-1, keepdims=True)
    var = jnp.mean((y - mean) ** 2, axis=-1, keepdims=True)
    yhat = (y - mean) * jax.lax.rsqrt(var + _LN_EPS)
    o_ref[0] = (yhat * g_ref[...] + b_ref[...]).astype(o_ref.dtype)


def ffn_ln_kernel(x_ref, w1_ref, b1_ref, w2_ref, b2_ref, g_ref, b_ref, o_ref):
    """LayerNorm(x + Linear2(ReLU(Linear1(x)))) on a row tile [rows, D]."""
    x = x_ref[...]
    h = jnp.dot(x.astype(MATMUL_DTYPE), w1_ref[...].astype(MATMUL_DTYPE),
                preferred_element_type=jnp.float32) + b1_ref[...]
    h = jnp.maximum(h, 0.0)
    f = jnp.dot(h.astype(MATMUL_DTYPE), w2_ref[...].astype(MATMUL_DTYPE),
                preferred_element_type=jnp.float32) + b2_ref[...]
    y = x + f
    mean = jnp.mean(y, axis=-1, keepdims=True)
    var = jnp.mean((y - mean) ** 2, axis=-1, keepdims=True)
    yhat = (y - mean) * jax.lax.rsqrt(var + _LN_EPS)
    o_ref[...] = (yhat * g_ref[...] + b_ref[...]).astype(o_ref.dtype)


def layernorm_kernel(x_ref, g_ref, b_ref, o_ref):
    x = x_ref[...]
    mean = jnp.mean(x, axis=-1, keepdims=True)
    var = jnp.mean((x - mean) ** 2, axis=-1, keepdims=True)
    xhat = (x - mean) * jax.lax.rsqrt(var + _LN_EPS)
    o_ref[...] = (xhat * g_ref[...] + b_ref[...]).astype(o_ref.dtype)


# ----------------------------- wrappers -------------------------------------

def mha_add_ln(p, xq, xkv, bias, ln_g, ln_b, num_heads):
    """Fused multi-head attention + residual + LayerNorm. xq is the residual."""
    B, Sq, D = xq.shape
    Sk = xkv.shape[1]
    assert D % num_heads == 0
    kern = functools.partial(mha_ln_kernel, num_heads=num_heads)
    return pl.pallas_call(
        kern,
        out_shape=jax.ShapeDtypeStruct((B, Sq, D), xq.dtype),
        grid=(B,),
        in_specs=[
            pl.BlockSpec((1, Sq, D), lambda b: (b, 0, 0)),       # xq
            pl.BlockSpec((1, Sk, D), lambda b: (b, 0, 0)),       # xkv
            pl.BlockSpec((D, D), lambda b: (0, 0)),              # wq (scaled)
            pl.BlockSpec((1, D), lambda b: (0, 0)),              # bq (scaled)
            pl.BlockSpec((D, 2 * D), lambda b: (0, 0)),          # wkv
            pl.BlockSpec((1, 2 * D), lambda b: (0, 0)),          # bkv
            pl.BlockSpec((D, D), lambda b: (0, 0)),              # wo
            pl.BlockSpec((1, D), lambda b: (0, 0)),              # bo
            pl.BlockSpec((1, Sq, Sk), lambda b: (b, 0, 0)),      # additive bias
            pl.BlockSpec((1, D), lambda b: (0, 0)),              # ln gamma
            pl.BlockSpec((1, D), lambda b: (0, 0)),              # ln beta
        ],
        out_specs=pl.BlockSpec((1, Sq, D), lambda b: (b, 0, 0)),
        compiler_params=_compiler_params(),
    )(xq, xkv, p["wq"], p["bq"], p["wkv"], p["bkv"], p["wo"], p["bo"],
      bias, ln_g, ln_b)


def ffn_add_ln(x, p, ln_g, ln_b):
    """Fused FeedForward + residual + LayerNorm over row-tiled [B*S, D]."""
    B, S, D = x.shape
    N = B * S
    d_ff = p["w1"].shape[1]
    x2 = x.reshape(N, D)
    tr = _row_tile(N)
    out = pl.pallas_call(
        ffn_ln_kernel,
        out_shape=jax.ShapeDtypeStruct((N, D), x.dtype),
        grid=(N // tr,),
        in_specs=[
            pl.BlockSpec((tr, D), lambda i: (i, 0)),             # x tile
            pl.BlockSpec((D, d_ff), lambda i: (0, 0)),           # w1
            pl.BlockSpec((1, d_ff), lambda i: (0, 0)),           # b1
            pl.BlockSpec((d_ff, D), lambda i: (0, 0)),           # w2
            pl.BlockSpec((1, D), lambda i: (0, 0)),              # b2
            pl.BlockSpec((1, D), lambda i: (0, 0)),              # ln gamma
            pl.BlockSpec((1, D), lambda i: (0, 0)),              # ln beta
        ],
        out_specs=pl.BlockSpec((tr, D), lambda i: (i, 0)),
        compiler_params=_compiler_params(),
    )(x2, p["w1"], p["b1"], p["w2"], p["b2"], ln_g, ln_b)
    return out.reshape(B, S, D)


def layer_norm(x, g, b):
    """Plain LayerNorm (no residual) over row-tiled [B*S, D]."""
    B, S, D = x.shape
    N = B * S
    x2 = x.reshape(N, D)
    tr = _row_tile(N)
    out = pl.pallas_call(
        layernorm_kernel,
        out_shape=jax.ShapeDtypeStruct((N, D), x.dtype),
        grid=(N // tr,),
        in_specs=[
            pl.BlockSpec((tr, D), lambda i: (i, 0)),
            pl.BlockSpec((1, D), lambda i: (0, 0)),
            pl.BlockSpec((1, D), lambda i: (0, 0)),
        ],
        out_specs=pl.BlockSpec((tr, D), lambda i: (i, 0)),
        compiler_params=_compiler_params(),
    )(x2, g, b)
    return out.reshape(B, S, D)


def decoder_layer(p, tgt, memory, tgt_bias, src_bias, num_heads):
    # self attention + residual + norm1   (dropout == identity in eval mode)
    tgt = mha_add_ln(p["self_attn"], tgt, tgt, tgt_bias,
                     p["ln1_g"], p["ln1_b"], num_heads)
    # cross attention + residual + norm2
    tgt = mha_add_ln(p["src_attn"], tgt, memory, src_bias,
                     p["ln2_g"], p["ln2_b"], num_heads)
    # feed forward + residual + norm3
    tgt = ffn_add_ln(tgt, p["ffn"], p["ln3_g"], p["ln3_b"])
    return tgt


def decoder_forward(params, tgt, memory, tgt_mask, src_mask, num_heads):
    # Precompute additive mask biases once (0 where visible, -1e9 where masked).
    tgt_bias = jnp.where(tgt_mask == 0, jnp.float32(-1e9), jnp.float32(0.0))
    src_bias = jnp.where(src_mask == 0, jnp.float32(-1e9), jnp.float32(0.0))
    for layer_p in params["layers"]:
        tgt = decoder_layer(layer_p, tgt, memory, tgt_bias, src_bias, num_heads)
    return layer_norm(tgt, params["norm_g"], params["norm_b"])


# ----------------------------- parameter init -------------------------------

def _init_linear(key, d_in, d_out):
    # nn.Linear-style: U(-1/sqrt(fan_in), 1/sqrt(fan_in)); stored as [d_in, d_out]
    kw, kb = jax.random.split(key)
    bound = 1.0 / math.sqrt(d_in)
    w = jax.random.uniform(kw, (d_in, d_out), jnp.float32, -bound, bound)
    b = jax.random.uniform(kb, (d_out,), jnp.float32, -bound, bound)
    return w, b


def _init_mha(key, d_model, num_heads):
    ks = jax.random.split(key, 4)
    dk = d_model // num_heads
    scale = jnp.float32(1.0 / math.sqrt(dk))
    wq, bq = _init_linear(ks[0], d_model, d_model)
    wk, bk = _init_linear(ks[1], d_model, d_model)
    wv, bv = _init_linear(ks[2], d_model, d_model)
    wo, bo = _init_linear(ks[3], d_model, d_model)
    # fold 1/sqrt(d_k) into the query projection; fuse K|V into one matmul
    return dict(
        wq=wq * scale, bq=(bq * scale).reshape(1, d_model),
        wkv=jnp.concatenate([wk, wv], axis=1),
        bkv=jnp.concatenate([bk, bv]).reshape(1, 2 * d_model),
        wo=wo, bo=bo.reshape(1, d_model),
    )


def init_decoder_params(key, num_layers, d_model, num_heads, d_ff):
    layers = []
    keys = jax.random.split(key, num_layers + 1)
    ones = jnp.ones((1, d_model), jnp.float32)
    zeros = jnp.zeros((1, d_model), jnp.float32)
    for lk in keys[:num_layers]:
        k1, k2, k3, k4 = jax.random.split(lk, 4)
        w1, b1 = _init_linear(k3, d_model, d_ff)
        w2, b2 = _init_linear(k4, d_ff, d_model)
        layers.append(dict(
            self_attn=_init_mha(k1, d_model, num_heads),
            src_attn=_init_mha(k2, d_model, num_heads),
            ffn=dict(w1=w1, b1=b1.reshape(1, d_ff),
                     w2=w2, b2=b2.reshape(1, d_model)),
            ln1_g=ones, ln1_b=zeros,
            ln2_g=ones, ln2_b=zeros,
            ln3_g=ones, ln3_b=zeros,
        ))
    return dict(layers=layers, norm_g=ones, norm_b=zeros)


# ----------------------------- main ------------------------------------------

if __name__ == "__main__":
    num_layers, d_model, num_heads, d_ff = 2, 32, 4, 64
    B, S_tgt, S_src = 2, 8, 8

    root = jax.random.PRNGKey(0)
    k_p, k_tgt, k_mem = jax.random.split(root, 3)

    params = init_decoder_params(k_p, num_layers, d_model, num_heads, d_ff)
    tgt = jax.random.normal(k_tgt, (B, S_tgt, d_model), jnp.float32)
    memory = jax.random.normal(k_mem, (B, S_src, d_model), jnp.float32)

    # causal mask for self-attn, full-visibility mask for cross-attn
    tgt_mask = jnp.tril(jnp.ones((S_tgt, S_tgt), jnp.float32))
    tgt_mask = jnp.broadcast_to(tgt_mask, (B, S_tgt, S_tgt))
    src_mask = jnp.ones((B, S_tgt, S_src), jnp.float32)

    fwd = jax.jit(functools.partial(decoder_forward, num_heads=num_heads))
    out = fwd(params, tgt, memory, tgt_mask, src_mask)
    out = jax.block_until_ready(out)

    assert out.shape == (B, S_tgt, d_model)
    assert bool(jnp.all(jnp.isfinite(out)))
    print("KERNEL_OK")
</pallas_src>

<mosaic_0001>
module attributes {stable_mosaic.version = 11 : i64} {
  func.func @mha_ln_kernel(%arg0: i32, %arg1: memref<1x8x32xf32, #tpu.memory_space<vmem>>, %arg2: memref<1x8x32xf32, #tpu.memory_space<vmem>>, %arg3: memref<32x32xf32, #tpu.memory_space<vmem>>, %arg4: memref<1x32xf32, #tpu.memory_space<vmem>>, %arg5: memref<32x64xf32, #tpu.memory_space<vmem>>, %arg6: memref<1x64xf32, #tpu.memory_space<vmem>>, %arg7: memref<32x32xf32, #tpu.memory_space<vmem>>, %arg8: memref<1x32xf32, #tpu.memory_space<vmem>>, %arg9: memref<1x8x8xf32, #tpu.memory_space<vmem>>, %arg10: memref<1x32xf32, #tpu.memory_space<vmem>>, %arg11: memref<1x32xf32, #tpu.memory_space<vmem>>, %arg12: memref<1x8x32xf32, #tpu.memory_space<vmem>>) attributes {dimension_semantics = [#tpu.dimension_semantics<parallel>], iteration_bounds = array<i64: 2>, scalar_prefetch = 0 : i64, scratch_operands = 0 : i64, tpu.core_type = #tpu.core_type<tc>, window_params = [{transform_indices = @transform_0, window_bounds = array<i64: 1, 8, 32>}, {transform_indices = @transform_1, window_bounds = array<i64: 1, 8, 32>}, {pipeline_mode = #tpu.pipeline_mode<synchronous>, transform_indices = @transform_2, window_bounds = array<i64: 32, 32>}, {pipeline_mode = #tpu.pipeline_mode<synchronous>, transform_indices = @transform_3, window_bounds = array<i64: 1, 32>}, {pipeline_mode = #tpu.pipeline_mode<synchronous>, transform_indices = @transform_4, window_bounds = array<i64: 32, 64>}, {pipeline_mode = #tpu.pipeline_mode<synchronous>, transform_indices = @transform_5, window_bounds = array<i64: 1, 64>}, {pipeline_mode = #tpu.pipeline_mode<synchronous>, transform_indices = @transform_6, window_bounds = array<i64: 32, 32>}, {pipeline_mode = #tpu.pipeline_mode<synchronous>, transform_indices = @transform_7, window_bounds = array<i64: 1, 32>}, {transform_indices = @transform_8, window_bounds = array<i64: 1, 8, 8>}, {pipeline_mode = #tpu.pipeline_mode<synchronous>, transform_indices = @transform_9, window_bounds = array<i64: 1, 32>}, {pipeline_mode = #tpu.pipeline_mode<synchronous>, transform_indices = @transform_10, window_bounds = array<i64: 1, 32>}, {transform_indices = @transform_11, window_bounds = array<i64: 1, 8, 32>}]} {
    %c0 = arith.constant 0 : index
    %c0_0 = arith.constant 0 : index
    %c0_1 = arith.constant 0 : index
    %0 = vector.load %arg1[%c0, %c0_0, %c0_1] : memref<1x8x32xf32, #tpu.memory_space<vmem>>, vector<1x8x32xf32>
    %1 = vector.shape_cast %0 : vector<1x8x32xf32> to vector<8x32xf32>
    %c0_2 = arith.constant 0 : index
    %c0_3 = arith.constant 0 : index
    %c0_4 = arith.constant 0 : index
    %2 = vector.load %arg2[%c0_2, %c0_3, %c0_4] : memref<1x8x32xf32, #tpu.memory_space<vmem>>, vector<1x8x32xf32>
    %3 = vector.shape_cast %2 : vector<1x8x32xf32> to vector<8x32xf32>
    %c0_5 = arith.constant 0 : index
    %c0_6 = arith.constant 0 : index
    %4 = vector.load %arg3[%c0_5, %c0_6] : memref<32x32xf32, #tpu.memory_space<vmem>>, vector<32x32xf32>
    %cst = arith.constant dense<0.000000e+00> : vector<8x32xf32>
    %5 = tpu.matmul %1, %4, %cst {dimension_numbers = #tpu.dot_dimension_numbers<[1], [0], [0], [1], [0, 0, 1, 1], [], []>} : vector<8x32xf32>, vector<32x32xf32>, vector<8x32xf32> -> vector<8x32xf32>
    %c0_7 = arith.constant 0 : index
    %c0_8 = arith.constant 0 : index
    %6 = vector.load %arg4[%c0_7, %c0_8] : memref<1x32xf32, #tpu.memory_space<vmem>>, vector<1x32xf32>
    %7 = vector.broadcast %6 : vector<1x32xf32> to vector<8x32xf32>
    %8 = arith.addf %5, %7 : vector<8x32xf32>
    %c0_9 = arith.constant 0 : index
    %c0_10 = arith.constant 0 : index
    %9 = vector.load %arg5[%c0_9, %c0_10] : memref<32x64xf32, #tpu.memory_space<vmem>>, vector<32x64xf32>
    %cst_11 = arith.constant dense<0.000000e+00> : vector<8x64xf32>
    %10 = tpu.matmul %3, %9, %cst_11 {dimension_numbers = #tpu.dot_dimension_numbers<[1], [0], [0], [1], [0, 0, 1, 1], [], []>} : vector<8x32xf32>, vector<32x64xf32>, vector<8x64xf32> -> vector<8x64xf32>
    %c0_12 = arith.constant 0 : index
    %c0_13 = arith.constant 0 : index
    %11 = vector.load %arg6[%c0_12, %c0_13] : memref<1x64xf32, #tpu.memory_space<vmem>>, vector<1x64xf32>
    %12 = vector.broadcast %11 : vector<1x64xf32> to vector<8x64xf32>
    %13 = arith.addf %10, %12 : vector<8x64xf32>
    %14 = vector.extract_strided_slice %13 {offsets = [0, 0], sizes = [8, 32], strides = [1, 1]} : vector<8x64xf32> to vector<8x32xf32>
    %15 = vector.extract_strided_slice %13 {offsets = [0, 32], sizes = [8, 32], strides = [1, 1]} : vector<8x64xf32> to vector<8x32xf32>
    %c0_14 = arith.constant 0 : index
    %c0_15 = arith.constant 0 : index
    %c0_16 = arith.constant 0 : index
    %16 = vector.load %arg9[%c0_14, %c0_15, %c0_16] : memref<1x8x8xf32, #tpu.memory_space<vmem>>, vector<1x8x8xf32>
    %17 = vector.shape_cast %16 : vector<1x8x8xf32> to vector<8x8xf32>
    %18 = vector.extract_strided_slice %8 {offsets = [0, 0], sizes = [8, 8], strides = [1, 1]} : vector<8x32xf32> to vector<8x8xf32>
    %19 = vector.extract_strided_slice %14 {offsets = [0, 0], sizes = [8, 8], strides = [1, 1]} : vector<8x32xf32> to vector<8x8xf32>
    %20 = vector.extract_strided_slice %15 {offsets = [0, 0], sizes = [8, 8], strides = [1, 1]} : vector<8x32xf32> to vector<8x8xf32>
    %cst_17 = arith.constant dense<0.000000e+00> : vector<8x8xf32>
    %21 = tpu.matmul %18, %19, %cst_17 {dimension_numbers = #tpu.dot_dimension_numbers<[1], [1], [0], [0], [0, 0, 1, 0], [], []>} : vector<8x8xf32>, vector<8x8xf32>, vector<8x8xf32> -> vector<8x8xf32>
    %22 = arith.addf %21, %17 : vector<8x8xf32>
    %cst_18 = arith.constant dense<0xFF800000> : vector<8xf32>
    %23 = vector.multi_reduction <maximumf>, %22, %cst_18 [1] : vector<8x8xf32> to vector<8xf32>
    %24 = vector.shape_cast %23 : vector<8xf32> to vector<8x1xf32>
    %25 = vector.broadcast %24 : vector<8x1xf32> to vector<8x8xf32>
    %26 = arith.subf %22, %25 : vector<8x8xf32>
    %27 = math.exp %26 : vector<8x8xf32>
    %cst_19 = arith.constant dense<0.000000e+00> : vector<8xf32>
    %28 = vector.multi_reduction <add>, %27, %cst_19 [1] : vector<8x8xf32> to vector<8xf32>
    %29 = vector.shape_cast %28 : vector<8xf32> to vector<8x1xf32>
    %30 = tpu.reciprocal %29 {approx = true} : vector<8x1xf32> -> vector<8x1xf32>
    %31 = vector.broadcast %30 : vector<8x1xf32> to vector<8x8xf32>
    %32 = arith.mulf %27, %31 : vector<8x8xf32>
    %cst_20 = arith.constant dense<0.000000e+00> : vector<8x8xf32>
    %33 = tpu.matmul %32, %20, %cst_20 {dimension_numbers = #tpu.dot_dimension_numbers<[1], [0], [0], [1], [0, 0, 1, 1], [], []>} : vector<8x8xf32>, vector<8x8xf32>, vector<8x8xf32> -> vector<8x8xf32>
    %34 = vector.extract_strided_slice %8 {offsets = [0, 8], sizes = [8, 8], strides = [1, 1]} : vector<8x32xf32> to vector<8x8xf32>
    %35 = vector.extract_strided_slice %14 {offsets = [0, 8], sizes = [8, 8], strides = [1, 1]} : vector<8x32xf32> to vector<8x8xf32>
    %36 = vector.extract_strided_slice %15 {offsets = [0, 8], sizes = [8, 8], strides = [1, 1]} : vector<8x32xf32> to vector<8x8xf32>
    %cst_21 = arith.constant dense<0.000000e+00> : vector<8x8xf32>
    %37 = tpu.matmul %34, %35, %cst_21 {dimension_numbers = #tpu.dot_dimension_numbers<[1], [1], [0], [0], [0, 0, 1, 0], [], []>} : vector<8x8xf32>, vector<8x8xf32>, vector<8x8xf32> -> vector<8x8xf32>
    %38 = arith.addf %37, %17 : vector<8x8xf32>
    %cst_22 = arith.constant dense<0xFF800000> : vector<8xf32>
    %39 = vector.multi_reduction <maximumf>, %38, %cst_22 [1] : vector<8x8xf32> to vector<8xf32>
    %40 = vector.shape_cast %39 : vector<8xf32> to vector<8x1xf32>
    %41 = vector.broadcast %40 : vector<8x1xf32> to vector<8x8xf32>
    %42 = arith.subf %38, %41 : vector<8x8xf32>
    %43 = math.exp %42 : vector<8x8xf32>
    %cst_23 = arith.constant dense<0.000000e+00> : vector<8xf32>
    %44 = vector.multi_reduction <add>, %43, %cst_23 [1] : vector<8x8xf32> to vector<8xf32>
    %45 = vector.shape_cast %44 : vector<8xf32> to vector<8x1xf32>
    %46 = tpu.reciprocal %45 {approx = true} : vector<8x1xf32> -> vector<8x1xf32>
    %47 = vector.broadcast %46 : vector<8x1xf32> to vector<8x8xf32>
    %48 = arith.mulf %43, %47 : vector<8x8xf32>
    %cst_24 = arith.constant dense<0.000000e+00> : vector<8x8xf32>
    %49 = tpu.matmul %48, %36, %cst_24 {dimension_numbers = #tpu.dot_dimension_numbers<[1], [0], [0], [1], [0, 0, 1, 1], [], []>} : vector<8x8xf32>, vector<8x8xf32>, vector<8x8xf32> -> vector<8x8xf32>
    %50 = vector.extract_strided_slice %8 {offsets = [0, 16], sizes = [8, 8], strides = [1, 1]} : vector<8x32xf32> to vector<8x8xf32>
    %51 = vector.extract_strided_slice %14 {offsets = [0, 16], sizes = [8, 8], strides = [1, 1]} : vector<8x32xf32> to vector<8x8xf32>
    %52 = vector.extract_strided_slice %15 {offsets = [0, 16], sizes = [8, 8], strides = [1, 1]} : vector<8x32xf32> to vector<8x8xf32>
    %cst_25 = arith.constant dense<0.000000e+00> : vector<8x8xf32>
    %53 = tpu.matmul %50, %51, %cst_25 {dimension_numbers = #tpu.dot_dimension_numbers<[1], [1], [0], [0], [0, 0, 1, 0], [], []>} : vector<8x8xf32>, vector<8x8xf32>, vector<8x8xf32> -> vector<8x8xf32>
    %54 = arith.addf %53, %17 : vector<8x8xf32>
    %cst_26 = arith.constant dense<0xFF800000> : vector<8xf32>
    %55 = vector.multi_reduction <maximumf>, %54, %cst_26 [1] : vector<8x8xf32> to vector<8xf32>
    %56 = vector.shape_cast %55 : vector<8xf32> to vector<8x1xf32>
    %57 = vector.broadcast %56 : vector<8x1xf32> to vector<8x8xf32>
    %58 = arith.subf %54, %57 : vector<8x8xf32>
    %59 = math.exp %58 : vector<8x8xf32>
    %cst_27 = arith.constant dense<0.000000e+00> : vector<8xf32>
    %60 = vector.multi_reduction <add>, %59, %cst_27 [1] : vector<8x8xf32> to vector<8xf32>
    %61 = vector.shape_cast %60 : vector<8xf32> to vector<8x1xf32>
    %62 = tpu.reciprocal %61 {approx = true} : vector<8x1xf32> -> vector<8x1xf32>
    %63 = vector.broadcast %62 : vector<8x1xf32> to vector<8x8xf32>
    %64 = arith.mulf %59, %63 : vector<8x8xf32>
    %cst_28 = arith.constant dense<0.000000e+00> : vector<8x8xf32>
    %65 = tpu.matmul %64, %52, %cst_28 {dimension_numbers = #tpu.dot_dimension_numbers<[1], [0], [0], [1], [0, 0, 1, 1], [], []>} : vector<8x8xf32>, vector<8x8xf32>, vector<8x8xf32> -> vector<8x8xf32>
    %66 = vector.extract_strided_slice %8 {offsets = [0, 24], sizes = [8, 8], strides = [1, 1]} : vector<8x32xf32> to vector<8x8xf32>
    %67 = vector.extract_strided_slice %14 {offsets = [0, 24], sizes = [8, 8], strides = [1, 1]} : vector<8x32xf32> to vector<8x8xf32>
    %68 = vector.extract_strided_slice %15 {offsets = [0, 24], sizes = [8, 8], strides = [1, 1]} : vector<8x32xf32> to vector<8x8xf32>
    %cst_29 = arith.constant dense<0.000000e+00> : vector<8x8xf32>
    %69 = tpu.matmul %66, %67, %cst_29 {dimension_numbers = #tpu.dot_dimension_numbers<[1], [1], [0], [0], [0, 0, 1, 0], [], []>} : vector<8x8xf32>, vector<8x8xf32>, vector<8x8xf32> -> vector<8x8xf32>
    %70 = arith.addf %69, %17 : vector<8x8xf32>
    %cst_30 = arith.constant dense<0xFF800000> : vector<8xf32>
    %71 = vector.multi_reduction <maximumf>, %70, %cst_30 [1] : vector<8x8xf32> to vector<8xf32>
    %72 = vector.shape_cast %71 : vector<8xf32> to vector<8x1xf32>
    %73 = vector.broadcast %72 : vector<8x1xf32> to vector<8x8xf32>
    %74 = arith.subf %70, %73 : vector<8x8xf32>
    %75 = math.exp %74 : vector<8x8xf32>
    %cst_31 = arith.constant dense<0.000000e+00> : vector<8xf32>
    %76 = vector.multi_reduction <add>, %75, %cst_31 [1] : vector<8x8xf32> to vector<8xf32>
    %77 = vector.shape_cast %76 : vector<8xf32> to vector<8x1xf32>
    %78 = tpu.reciprocal %77 {approx = true} : vector<8x1xf32> -> vector<8x1xf32>
    %79 = vector.broadcast %78 : vector<8x1xf32> to vector<8x8xf32>
    %80 = arith.mulf %75, %79 : vector<8x8xf32>
    %cst_32 = arith.constant dense<0.000000e+00> : vector<8x8xf32>
    %81 = tpu.matmul %80, %68, %cst_32 {dimension_numbers = #tpu.dot_dimension_numbers<[1], [0], [0], [1], [0, 0, 1, 1], [], []>} : vector<8x8xf32>, vector<8x8xf32>, vector<8x8xf32> -> vector<8x8xf32>
    %82 = tpu.concatenate %33, %49, %65, %81 in 1 : vector<8x8xf32>, vector<8x8xf32>, vector<8x8xf32>, vector<8x8xf32> -> vector<8x32xf32>
    %c0_33 = arith.constant 0 : index
    %c0_34 = arith.constant 0 : index
    %83 = vector.load %arg7[%c0_33, %c0_34] : memref<32x32xf32, #tpu.memory_space<vmem>>, vector<32x32xf32>
    %cst_35 = arith.constant dense<0.000000e+00> : vector<8x32xf32>
    %84 = tpu.matmul %82, %83, %cst_35 {dimension_numbers = #tpu.dot_dimension_numbers<[1], [0], [0], [1], [0, 0, 1, 1], [], []>} : vector<8x32xf32>, vector<32x32xf32>, vector<8x32xf32> -> vector<8x32xf32>
    %c0_36 = arith.constant 0 : index
    %c0_37 = arith.constant 0 : index
    %85 = vector.load %arg8[%c0_36, %c0_37] : memref<1x32xf32, #tpu.memory_space<vmem>>, vector<1x32xf32>
    %86 = vector.broadcast %85 : vector<1x32xf32> to vector<8x32xf32>
    %87 = arith.addf %84, %86 : vector<8x32xf32>
    %88 = arith.addf %1, %87 : vector<8x32xf32>
    %cst_38 = arith.constant dense<0.000000e+00> : vector<8xf32>
    %89 = vector.multi_reduction <add>, %88, %cst_38 [1] : vector<8x32xf32> to vector<8xf32>
    %90 = vector.shape_cast %89 : vector<8xf32> to vector<8x1xf32>
    %cst_39 = arith.constant 3.200000e+01 : f32
    %91 = vector.broadcast %cst_39 : f32 to vector<8x1xf32>
    %92 = arith.divf %90, %91 : vector<8x1xf32>
    %93 = vector.broadcast %92 : vector<8x1xf32> to vector<8x32xf32>
    %94 = arith.subf %88, %93 : vector<8x32xf32>
    %95 = arith.mulf %94, %94 : vector<8x32xf32>
    %cst_40 = arith.constant dense<0.000000e+00> : vector<8xf32>
    %96 = vector.multi_reduction <add>, %95, %cst_40 [1] : vector<8x32xf32> to vector<8xf32>
    %97 = vector.shape_cast %96 : vector<8xf32> to vector<8x1xf32>
    %cst_41 = arith.constant 3.200000e+01 : f32
    %98 = vector.broadcast %cst_41 : f32 to vector<8x1xf32>
    %99 = arith.divf %97, %98 : vector<8x1xf32>
    %100 = vector.broadcast %92 : vector<8x1xf32> to vector<8x32xf32>
    %101 = arith.subf %88, %100 : vector<8x32xf32>
    %cst_42 = arith.constant 9.99999974E-6 : f32
    %102 = vector.broadcast %cst_42 : f32 to vector<8x1xf32>
    %103 = arith.addf %99, %102 : vector<8x1xf32>
    %104 = math.rsqrt %103 : vector<8x1xf32>
    %105 = vector.broadcast %104 : vector<8x1xf32> to vector<8x32xf32>
    %106 = arith.mulf %101, %105 : vector<8x32xf32>
    %c0_43 = arith.constant 0 : index
    %c0_44 = arith.constant 0 : index
    %107 = vector.load %arg10[%c0_43, %c0_44] : memref<1x32xf32, #tpu.memory_space<vmem>>, vector<1x32xf32>
    %108 = vector.broadcast %107 : vector<1x32xf32> to vector<8x32xf32>
    %109 = arith.mulf %106, %108 : vector<8x32xf32>
    %c0_45 = arith.constant 0 : index
    %c0_46 = arith.constant 0 : index
    %110 = vector.load %arg11[%c0_45, %c0_46] : memref<1x32xf32, #tpu.memory_space<vmem>>, vector<1x32xf32>
    %111 = vector.broadcast %110 : vector<1x32xf32> to vector<8x32xf32>
    %112 = arith.addf %109, %111 : vector<8x32xf32>
    %c0_47 = arith.constant 0 : index
    %c0_48 = arith.constant 0 : index
    %c0_49 = arith.constant 0 : index
    %113 = vector.load %arg12[%c0_47, %c0_48, %c0_49] : memref<1x8x32xf32, #tpu.memory_space<vmem>>, vector<1x8x32xf32>
    %114 = vector.shape_cast %113 : vector<1x8x32xf32> to vector<8x32xf32>
    %115 = vector.shape_cast %112 : vector<8x32xf32> to vector<1x8x32xf32>
    tpu.vector_store %arg12[%c0_47, %c0_48, %c0_49], %115 {strides = array<i32>} : memref<1x8x32xf32, #tpu.memory_space<vmem>>, vector<1x8x32xf32>,
    return
  }
  func.func @transform_0(%arg0: i32) -> (i32, i32, i32) {
    %c0_i32 = arith.constant 0 : i32
    %c0_i32_0 = arith.constant 0 : i32
    %c0_i32_1 = arith.constant 0 : i32
    return %arg0, %c0_i32, %c0_i32_0 : i32, i32, i32
  }
  func.func @transform_1(%arg0: i32) -> (i32, i32, i32) {
    %c0_i32 = arith.constant 0 : i32
    %c0_i32_0 = arith.constant 0 : i32
    %c0_i32_1 = arith.constant 0 : i32
    return %arg0, %c0_i32, %c0_i32_0 : i32, i32, i32
  }
  func.func @transform_2(%arg0: i32) -> (i32, i32) {
    %c0_i32 = arith.constant 0 : i32
    %c0_i32_0 = arith.constant 0 : i32
    %c0_i32_1 = arith.constant 0 : i32
    return %c0_i32, %c0_i32_0 : i32, i32
  }
  func.func @transform_3(%arg0: i32) -> (i32, i32) {
    %c0_i32 = arith.constant 0 : i32
    %c0_i32_0 = arith.constant 0 : i32
    %c0_i32_1 = arith.constant 0 : i32
    return %c0_i32, %c0_i32_0 : i32, i32
  }
  func.func @transform_4(%arg0: i32) -> (i32, i32) {
    %c0_i32 = arith.constant 0 : i32
    %c0_i32_0 = arith.constant 0 : i32
    %c0_i32_1 = arith.constant 0 : i32
    return %c0_i32, %c0_i32_0 : i32, i32
  }
  func.func @transform_5(%arg0: i32) -> (i32, i32) {
    %c0_i32 = arith.constant 0 : i32
    %c0_i32_0 = arith.constant 0 : i32
    %c0_i32_1 = arith.constant 0 : i32
    return %c0_i32, %c0_i32_0 : i32, i32
  }
  func.func @transform_6(%arg0: i32) -> (i32, i32) {
    %c0_i32 = arith.constant 0 : i32
    %c0_i32_0 = arith.constant 0 : i32
    %c0_i32_1 = arith.constant 0 : i32
    return %c0_i32, %c0_i32_0 : i32, i32
  }
  func.func @transform_7(%arg0: i32) -> (i32, i32) {
    %c0_i32 = arith.constant 0 : i32
    %c0_i32_0 = arith.constant 0 : i32
    %c0_i32_1 = arith.constant 0 : i32
    return %c0_i32, %c0_i32_0 : i32, i32
  }
  func.func @transform_8(%arg0: i32) -> (i32, i32, i32) {
    %c0_i32 = arith.constant 0 : i32
    %c0_i32_0 = arith.constant 0 : i32
    %c0_i32_1 = arith.constant 0 : i32
    return %arg0, %c0_i32, %c0_i32_0 : i32, i32, i32
  }
  func.func @transform_9(%arg0: i32) -> (i32, i32) {
    %c0_i32 = arith.constant 0 : i32
    %c0_i32_0 = arith.constant 0 : i32
    %c0_i32_1 = arith.constant 0 : i32
    return %c0_i32, %c0_i32_0 : i32, i32
  }
  func.func @transform_10(%arg0: i32) -> (i32, i32) {
    %c0_i32 = arith.constant 0 : i32
    %c0_i32_0 = arith.constant 0 : i32
    %c0_i32_1 = arith.constant 0 : i32
    return %c0_i32, %c0_i32_0 : i32, i32
  }
  func.func @transform_11(%arg0: i32) -> (i32, i32, i32) {
    %c0_i32 = arith.constant 0 : i32
    %c0_i32_0 = arith.constant 0 : i32
    %c0_i32_1 = arith.constant 0 : i32
    return %arg0, %c0_i32, %c0_i32_0 : i32, i32, i32
  }
}

module attributes {stable_mosaic.version = 11 : i64} {
  func.func @mha_ln_kernel(%arg0: i32, %arg1: memref<1x8x32xf32, #tpu.memory_space<vmem>>, %arg2: memref<1x8x32xf32, #tpu.memory_space<vmem>>, %arg3: memref<32x32xf32, #tpu.memory_space<vmem>>, %arg4: memref<1x32xf32, #tpu.memory_space<vmem>>, %arg5: memref<32x64xf32, #tpu.memory_space<vmem>>, %arg6: memref<1x64xf32, #tpu.memory_space<vmem>>, %arg7: memref<32x32xf32, #tpu.memory_space<vmem>>, %arg8: memref<1x32xf32, #tpu.memory_space<vmem>>, %arg9: memref<1x8x8xf32, #tpu.memory_space<vmem>>, %arg10: memref<1x32xf32, #tpu.memory_space<vmem>>, %arg11: memref<1x32xf32, #tpu.memory_space<vmem>>, %arg12: memref<1x8x32xf32, #tpu.memory_space<vmem>>) attributes {dimension_semantics = [#tpu.dimension_semantics<parallel>], iteration_bounds = array<i64: 2>, scalar_prefetch = 0 : i64, scratch_operands = 0 : i64, tpu.core_type = #tpu.core_type<tc>, window_params = [{transform_indices = @transform_0, window_bounds = array<i64: 1, 8, 32>}, {transform_indices = @transform_1, window_bounds = array<i64: 1, 8, 32>}, {pipeline_mode = #tpu.pipeline_mode<synchronous>, transform_indices = @transform_2, window_bounds = array<i64: 32, 32>}, {pipeline_mode = #tpu.pipeline_mode<synchronous>, transform_indices = @transform_3, window_bounds = array<i64: 1, 32>}, {pipeline_mode = #tpu.pipeline_mode<synchronous>, transform_indices = @transform_4, window_bounds = array<i64: 32, 64>}, {pipeline_mode = #tpu.pipeline_mode<synchronous>, transform_indices = @transform_5, window_bounds = array<i64: 1, 64>}, {pipeline_mode = #tpu.pipeline_mode<synchronous>, transform_indices = @transform_6, window_bounds = array<i64: 32, 32>}, {pipeline_mode = #tpu.pipeline_mode<synchronous>, transform_indices = @transform_7, window_bounds = array<i64: 1, 32>}, {transform_indices = @transform_8, window_bounds = array<i64: 1, 8, 8>}, {pipeline_mode = #tpu.pipeline_mode<synchronous>, transform_indices = @transform_9, window_bounds = array<i64: 1, 32>}, {pipeline_mode = #tpu.pipeline_mode<synchronous>, transform_indices = @transform_10, window_bounds = array<i64: 1, 32>}, {transform_indices = @transform_11, window_bounds = array<i64: 1, 8, 32>}]} {
    %c0 = arith.constant 0 : index
    %c0_0 = arith.constant 0 : index
    %c0_1 = arith.constant 0 : index
    %0 = vector.load %arg1[%c0, %c0_0, %c0_1] : memref<1x8x32xf32, #tpu.memory_space<vmem>>, vector<1x8x32xf32>
    %1 = vector.shape_cast %0 : vector<1x8x32xf32> to vector<8x32xf32>
    %c0_2 = arith.constant 0 : index
    %c0_3 = arith.constant 0 : index
    %c0_4 = arith.constant 0 : index
    %2 = vector.load %arg2[%c0_2, %c0_3, %c0_4] : memref<1x8x32xf32, #tpu.memory_space<vmem>>, vector<1x8x32xf32>
    %3 = vector.shape_cast %2 : vector<1x8x32xf32> to vector<8x32xf32>
    %c0_5 = arith.constant 0 : index
    %c0_6 = arith.constant 0 : index
    %4 = vector.load %arg3[%c0_5, %c0_6] : memref<32x32xf32, #tpu.memory_space<vmem>>, vector<32x32xf32>
    %cst = arith.constant dense<0.000000e+00> : vector<8x32xf32>
    %5 = tpu.matmul %1, %4, %cst {dimension_numbers = #tpu.dot_dimension_numbers<[1], [0], [0], [1], [0, 0, 1, 1], [], []>} : vector<8x32xf32>, vector<32x32xf32>, vector<8x32xf32> -> vector<8x32xf32>
    %c0_7 = arith.constant 0 : index
    %c0_8 = arith.constant 0 : index
    %6 = vector.load %arg4[%c0_7, %c0_8] : memref<1x32xf32, #tpu.memory_space<vmem>>, vector<1x32xf32>
    %7 = vector.broadcast %6 : vector<1x32xf32> to vector<8x32xf32>
    %8 = arith.addf %5, %7 : vector<8x32xf32>
    %c0_9 = arith.constant 0 : index
    %c0_10 = arith.constant 0 : index
    %9 = vector.load %arg5[%c0_9, %c0_10] : memref<32x64xf32, #tpu.memory_space<vmem>>, vector<32x64xf32>
    %cst_11 = arith.constant dense<0.000000e+00> : vector<8x64xf32>
    %10 = tpu.matmul %3, %9, %cst_11 {dimension_numbers = #tpu.dot_dimension_numbers<[1], [0], [0], [1], [0, 0, 1, 1], [], []>} : vector<8x32xf32>, vector<32x64xf32>, vector<8x64xf32> -> vector<8x64xf32>
    %c0_12 = arith.constant 0 : index
    %c0_13 = arith.constant 0 : index
    %11 = vector.load %arg6[%c0_12, %c0_13] : memref<1x64xf32, #tpu.memory_space<vmem>>, vector<1x64xf32>
    %12 = vector.broadcast %11 : vector<1x64xf32> to vector<8x64xf32>
    %13 = arith.addf %10, %12 : vector<8x64xf32>
    %14 = vector.extract_strided_slice %13 {offsets = [0, 0], sizes = [8, 32], strides = [1, 1]} : vector<8x64xf32> to vector<8x32xf32>
    %15 = vector.extract_strided_slice %13 {offsets = [0, 32], sizes = [8, 32], strides = [1, 1]} : vector<8x64xf32> to vector<8x32xf32>
    %c0_14 = arith.constant 0 : index
    %c0_15 = arith.constant 0 : index
    %c0_16 = arith.constant 0 : index
    %16 = vector.load %arg9[%c0_14, %c0_15, %c0_16] : memref<1x8x8xf32, #tpu.memory_space<vmem>>, vector<1x8x8xf32>
    %17 = vector.shape_cast %16 : vector<1x8x8xf32> to vector<8x8xf32>
    %18 = vector.extract_strided_slice %8 {offsets = [0, 0], sizes = [8, 8], strides = [1, 1]} : vector<8x32xf32> to vector<8x8xf32>
    %19 = vector.extract_strided_slice %14 {offsets = [0, 0], sizes = [8, 8], strides = [1, 1]} : vector<8x32xf32> to vector<8x8xf32>
    %20 = vector.extract_strided_slice %15 {offsets = [0, 0], sizes = [8, 8], strides = [1, 1]} : vector<8x32xf32> to vector<8x8xf32>
    %cst_17 = arith.constant dense<0.000000e+00> : vector<8x8xf32>
    %21 = tpu.matmul %18, %19, %cst_17 {dimension_numbers = #tpu.dot_dimension_numbers<[1], [1], [0], [0], [0, 0, 1, 0], [], []>} : vector<8x8xf32>, vector<8x8xf32>, vector<8x8xf32> -> vector<8x8xf32>
    %22 = arith.addf %21, %17 : vector<8x8xf32>
    %cst_18 = arith.constant dense<0xFF800000> : vector<8xf32>
    %23 = vector.multi_reduction <maximumf>, %22, %cst_18 [1] : vector<8x8xf32> to vector<8xf32>
    %24 = vector.shape_cast %23 : vector<8xf32> to vector<8x1xf32>
    %25 = vector.broadcast %24 : vector<8x1xf32> to vector<8x8xf32>
    %26 = arith.subf %22, %25 : vector<8x8xf32>
    %27 = math.exp %26 : vector<8x8xf32>
    %cst_19 = arith.constant dense<0.000000e+00> : vector<8xf32>
    %28 = vector.multi_reduction <add>, %27, %cst_19 [1] : vector<8x8xf32> to vector<8xf32>
    %29 = vector.shape_cast %28 : vector<8xf32> to vector<8x1xf32>
    %30 = tpu.reciprocal %29 {approx = true} : vector<8x1xf32> -> vector<8x1xf32>
    %31 = vector.broadcast %30 : vector<8x1xf32> to vector<8x8xf32>
    %32 = arith.mulf %27, %31 : vector<8x8xf32>
    %cst_20 = arith.constant dense<0.000000e+00> : vector<8x8xf32>
    %33 = tpu.matmul %32, %20, %cst_20 {dimension_numbers = #tpu.dot_dimension_numbers<[1], [0], [0], [1], [0, 0, 1, 1], [], []>} : vector<8x8xf32>, vector<8x8xf32>, vector<8x8xf32> -> vector<8x8xf32>
    %34 = vector.extract_strided_slice %8 {offsets = [0, 8], sizes = [8, 8], strides = [1, 1]} : vector<8x32xf32> to vector<8x8xf32>
    %35 = vector.extract_strided_slice %14 {offsets = [0, 8], sizes = [8, 8], strides = [1, 1]} : vector<8x32xf32> to vector<8x8xf32>
    %36 = vector.extract_strided_slice %15 {offsets = [0, 8], sizes = [8, 8], strides = [1, 1]} : vector<8x32xf32> to vector<8x8xf32>
    %cst_21 = arith.constant dense<0.000000e+00> : vector<8x8xf32>
    %37 = tpu.matmul %34, %35, %cst_21 {dimension_numbers = #tpu.dot_dimension_numbers<[1], [1], [0], [0], [0, 0, 1, 0], [], []>} : vector<8x8xf32>, vector<8x8xf32>, vector<8x8xf32> -> vector<8x8xf32>
    %38 = arith.addf %37, %17 : vector<8x8xf32>
    %cst_22 = arith.constant dense<0xFF800000> : vector<8xf32>
    %39 = vector.multi_reduction <maximumf>, %38, %cst_22 [1] : vector<8x8xf32> to vector<8xf32>
    %40 = vector.shape_cast %39 : vector<8xf32> to vector<8x1xf32>
    %41 = vector.broadcast %40 : vector<8x1xf32> to vector<8x8xf32>
    %42 = arith.subf %38, %41 : vector<8x8xf32>
    %43 = math.exp %42 : vector<8x8xf32>
    %cst_23 = arith.constant dense<0.000000e+00> : vector<8xf32>
    %44 = vector.multi_reduction <add>, %43, %cst_23 [1] : vector<8x8xf32> to vector<8xf32>
    %45 = vector.shape_cast %44 : vector<8xf32> to vector<8x1xf32>
    %46 = tpu.reciprocal %45 {approx = true} : vector<8x1xf32> -> vector<8x1xf32>
    %47 = vector.broadcast %46 : vector<8x1xf32> to vector<8x8xf32>
    %48 = arith.mulf %43, %47 : vector<8x8xf32>
    %cst_24 = arith.constant dense<0.000000e+00> : vector<8x8xf32>
    %49 = tpu.matmul %48, %36, %cst_24 {dimension_numbers = #tpu.dot_dimension_numbers<[1], [0], [0], [1], [0, 0, 1, 1], [], []>} : vector<8x8xf32>, vector<8x8xf32>, vector<8x8xf32> -> vector<8x8xf32>
    %50 = vector.extract_strided_slice %8 {offsets = [0, 16], sizes = [8, 8], strides = [1, 1]} : vector<8x32xf32> to vector<8x8xf32>
    %51 = vector.extract_strided_slice %14 {offsets = [0, 16], sizes = [8, 8], strides = [1, 1]} : vector<8x32xf32> to vector<8x8xf32>
    %52 = vector.extract_strided_slice %15 {offsets = [0, 16], sizes = [8, 8], strides = [1, 1]} : vector<8x32xf32> to vector<8x8xf32>
    %cst_25 = arith.constant dense<0.000000e+00> : vector<8x8xf32>
    %53 = tpu.matmul %50, %51, %cst_25 {dimension_numbers = #tpu.dot_dimension_numbers<[1], [1], [0], [0], [0, 0, 1, 0], [], []>} : vector<8x8xf32>, vector<8x8xf32>, vector<8x8xf32> -> vector<8x8xf32>
    %54 = arith.addf %53, %17 : vector<8x8xf32>
    %cst_26 = arith.constant dense<0xFF800000> : vector<8xf32>
    %55 = vector.multi_reduction <maximumf>, %54, %cst_26 [1] : vector<8x8xf32> to vector<8xf32>
    %56 = vector.shape_cast %55 : vector<8xf32> to vector<8x1xf32>
    %57 = vector.broadcast %56 : vector<8x1xf32> to vector<8x8xf32>
    %58 = arith.subf %54, %57 : vector<8x8xf32>
    %59 = math.exp %58 : vector<8x8xf32>
    %cst_27 = arith.constant dense<0.000000e+00> : vector<8xf32>
    %60 = vector.multi_reduction <add>, %59, %cst_27 [1] : vector<8x8xf32> to vector<8xf32>
    %61 = vector.shape_cast %60 : vector<8xf32> to vector<8x1xf32>
    %62 = tpu.reciprocal %61 {approx = true} : vector<8x1xf32> -> vector<8x1xf32>
    %63 = vector.broadcast %62 : vector<8x1xf32> to vector<8x8xf32>
    %64 = arith.mulf %59, %63 : vector<8x8xf32>
    %cst_28 = arith.constant dense<0.000000e+00> : vector<8x8xf32>
    %65 = tpu.matmul %64, %52, %cst_28 {dimension_numbers = #tpu.dot_dimension_numbers<[1], [0], [0], [1], [0, 0, 1, 1], [], []>} : vector<8x8xf32>, vector<8x8xf32>, vector<8x8xf32> -> vector<8x8xf32>
    %66 = vector.extract_strided_slice %8 {offsets = [0, 24], sizes = [8, 8], strides = [1, 1]} : vector<8x32xf32> to vector<8x8xf32>
    %67 = vector.extract_strided_slice %14 {offsets = [0, 24], sizes = [8, 8], strides = [1, 1]} : vector<8x32xf32> to vector<8x8xf32>
    %68 = vector.extract_strided_slice %15 {offsets = [0, 24], sizes = [8, 8], strides = [1, 1]} : vector<8x32xf32> to vector<8x8xf32>
    %cst_29 = arith.constant dense<0.000000e+00> : vector<8x8xf32>
    %69 = tpu.matmul %66, %67, %cst_29 {dimension_numbers = #tpu.dot_dimension_numbers<[1], [1], [0], [0], [0, 0, 1, 0], [], []>} : vector<8x8xf32>, vector<8x8xf32>, vector<8x8xf32> -> vector<8x8xf32>
    %70 = arith.addf %69, %17 : vector<8x8xf32>
    %cst_30 = arith.constant dense<0xFF800000> : vector<8xf32>
    %71 = vector.multi_reduction <maximumf>, %70, %cst_30 [1] : vector<8x8xf32> to vector<8xf32>
    %72 = vector.shape_cast %71 : vector<8xf32> to vector<8x1xf32>
    %73 = vector.broadcast %72 : vector<8x1xf32> to vector<8x8xf32>
    %74 = arith.subf %70, %73 : vector<8x8xf32>
    %75 = math.exp %74 : vector<8x8xf32>
    %cst_31 = arith.constant dense<0.000000e+00> : vector<8xf32>
    %76 = vector.multi_reduction <add>, %75, %cst_31 [1] : vector<8x8xf32> to vector<8xf32>
    %77 = vector.shape_cast %76 : vector<8xf32> to vector<8x1xf32>
    %78 = tpu.reciprocal %77 {approx = true} : vector<8x1xf32> -> vector<8x1xf32>
    %79 = vector.broadcast %78 : vector<8x1xf32> to vector<8x8xf32>
    %80 = arith.mulf %75, %79 : vector<8x8xf32>
    %cst_32 = arith.constant dense<0.000000e+00> : vector<8x8xf32>
    %81 = tpu.matmul %80, %68, %cst_32 {dimension_numbers = #tpu.dot_dimension_numbers<[1], [0], [0], [1], [0, 0, 1, 1], [], []>} : vector<8x8xf32>, vector<8x8xf32>, vector<8x8xf32> -> vector<8x8xf32>
    %82 = tpu.concatenate %33, %49, %65, %81 in 1 : vector<8x8xf32>, vector<8x8xf32>, vector<8x8xf32>, vector<8x8xf32> -> vector<8x32xf32>
    %c0_33 = arith.constant 0 : index
    %c0_34 = arith.constant 0 : index
    %83 = vector.load %arg7[%c0_33, %c0_34] : memref<32x32xf32, #tpu.memory_space<vmem>>, vector<32x32xf32>
    %cst_35 = arith.constant dense<0.000000e+00> : vector<8x32xf32>
    %84 = tpu.matmul %82, %83, %cst_35 {dimension_numbers = #tpu.dot_dimension_numbers<[1], [0], [0], [1], [0, 0, 1, 1], [], []>} : vector<8x32xf32>, vector<32x32xf32>, vector<8x32xf32> -> vector<8x32xf32>
    %c0_36 = arith.constant 0 : index
    %c0_37 = arith.constant 0 : index
    %85 = vector.load %arg8[%c0_36, %c0_37] : memref<1x32xf32, #tpu.memory_space<vmem>>, vector<1x32xf32>
    %86 = vector.broadcast %85 : vector<1x32xf32> to vector<8x32xf32>
    %87 = arith.addf %84, %86 : vector<8x32xf32>
    %88 = arith.addf %1, %87 : vector<8x32xf32>
    %cst_38 = arith.constant dense<0.000000e+00> : vector<8xf32>
    %89 = vector.multi_reduction <add>, %88, %cst_38 [1] : vector<8x32xf32> to vector<8xf32>
    %90 = vector.shape_cast %89 : vector<8xf32> to vector<8x1xf32>
    %cst_39 = arith.constant 3.200000e+01 : f32
    %91 = vector.broadcast %cst_39 : f32 to vector<8x1xf32>
    %92 = arith.divf %90, %91 : vector<8x1xf32>
    %93 = vector.broadcast %92 : vector<8x1xf32> to vector<8x32xf32>
    %94 = arith.subf %88, %93 : vector<8x32xf32>
    %95 = arith.mulf %94, %94 : vector<8x32xf32>
    %cst_40 = arith.constant dense<0.000000e+00> : vector<8xf32>
    %96 = vector.multi_reduction <add>, %95, %cst_40 [1] : vector<8x32xf32> to vector<8xf32>
    %97 = vector.shape_cast %96 : vector<8xf32> to vector<8x1xf32>
    %cst_41 = arith.constant 3.200000e+01 : f32
    %98 = vector.broadcast %cst_41 : f32 to vector<8x1xf32>
    %99 = arith.divf %97, %98 : vector<8x1xf32>
    %100 = vector.broadcast %92 : vector<8x1xf32> to vector<8x32xf32>
    %101 = arith.subf %88, %100 : vector<8x32xf32>
    %cst_42 = arith.constant 9.99999974E-6 : f32
    %102 = vector.broadcast %cst_42 : f32 to vector<8x1xf32>
    %103 = arith.addf %99, %102 : vector<8x1xf32>
    %104 = math.rsqrt %103 : vector<8x1xf32>
    %105 = vector.broadcast %104 : vector<8x1xf32> to vector<8x32xf32>
    %106 = arith.mulf %101, %105 : vector<8x32xf32>
    %c0_43 = arith.constant 0 : index
    %c0_44 = arith.constant 0 : index
    %107 = vector.load %arg10[%c0_43, %c0_44] : memref<1x32xf32, #tpu.memory_space<vmem>>, vector<1x32xf32>
    %108 = vector.broadcast %107 : vector<1x32xf32> to vector<8x32xf32>
    %109 = arith.mulf %106, %108 : vector<8x32xf32>
    %c0_45 = arith.constant 0 : index
    %c0_46 = arith.constant 0 : index
    %110 = vector.load %arg11[%c0_45, %c0_46] : memref<1x32xf32, #tpu.memory_space<vmem>>, vector<1x32xf32>
    %111 = vector.broadcast %110 : vector<1x32xf32> to vector<8x32xf32>
    %112 = arith.addf %109, %111 : vector<8x32xf32>
    %c0_47 = arith.constant 0 : index
    %c0_48 = arith.constant 0 : index
    %c0_49 = arith.constant 0 : index
    %113 = vector.load %arg12[%c0_47, %c0_48, %c0_49] : memref<1x8x32xf32, #tpu.memory_space<vmem>>, vector<1x8x32xf32>
    %114 = vector.shape_cast %113 : vector<1x8x32xf32> to vector<8x32xf32>
    %115 = vector.shape_cast %112 : vector<8x32xf32> to vector<1x8x32xf32>
    tpu.vector_store %arg12[%c0_47, %c0_48, %c0_49], %115 {strides = array<i32>} : memref<1x8x32xf32, #tpu.memory_space<vmem>>, vector<1x8x32xf32>,
    return
  }
  func.func @transform_0(%arg0: i32) -> (i32, i32, i32) {
    %c0_i32 = arith.constant 0 : i32
    %c0_i32_0 = arith.constant 0 : i32
    %c0_i32_1 = arith.constant 0 : i32
    return %arg0, %c0_i32, %c0_i32_0 : i32, i32, i32
  }
  func.func @transform_1(%arg0: i32) -> (i32, i32, i32) {
    %c0_i32 = arith.constant 0 : i32
    %c0_i32_0 = arith.constant 0 : i32
    %c0_i32_1 = arith.constant 0 : i32
    return %arg0, %c0_i32, %c0_i32_0 : i32, i32, i32
  }
  func.func @transform_2(%arg0: i32) -> (i32, i32) {
    %c0_i32 = arith.constant 0 : i32
    %c0_i32_0 = arith.constant 0 : i32
    %c0_i32_1 = arith.constant 0 : i32
    return %c0_i32, %c0_i32_0 : i32, i32
  }
  func.func @transform_3(%arg0: i32) -> (i32, i32) {
    %c0_i32 = arith.constant 0 : i32
    %c0_i32_0 = arith.constant 0 : i32
    %c0_i32_1 = arith.constant 0 : i32
    return %c0_i32, %c0_i32_0 : i32, i32
  }
  func.func @transform_4(%arg0: i32) -> (i32, i32) {
    %c0_i32 = arith.constant 0 : i32
    %c0_i32_0 = arith.constant 0 : i32
    %c0_i32_1 = arith.constant 0 : i32
    return %c0_i32, %c0_i32_0 : i32, i32
  }
  func.func @transform_5(%arg0: i32) -> (i32, i32) {
    %c0_i32 = arith.constant 0 : i32
    %c0_i32_0 = arith.constant 0 : i32
    %c0_i32_1 = arith.constant 0 : i32
    return %c0_i32, %c0_i32_0 : i32, i32
  }
  func.func @transform_6(%arg0: i32) -> (i32, i32) {
    %c0_i32 = arith.constant 0 : i32
    %c0_i32_0 = arith.constant 0 : i32
    %c0_i32_1 = arith.constant 0 : i32
    return %c0_i32, %c0_i32_0 : i32, i32
  }
  func.func @transform_7(%arg0: i32) -> (i32, i32) {
    %c0_i32 = arith.constant 0 : i32
    %c0_i32_0 = arith.constant 0 : i32
    %c0_i32_1 = arith.constant 0 : i32
    return %c0_i32, %c0_i32_0 : i32, i32
  }
  func.func @transform_8(%arg0: i32) -> (i32, i32, i32) {
    %c0_i32 = arith.constant 0 : i32
    %c0_i32_0 = arith.constant 0 : i32
    %c0_i32_1 = arith.constant 0 : i32
    return %arg0, %c0_i32, %c0_i32_0 : i32, i32, i32
  }
  func.func @transform_9(%arg0: i32) -> (i32, i32) {
    %c0_i32 = arith.constant 0 : i32
    %c0_i32_0 = arith.constant 0 : i32
    %c0_i32_1 = arith.constant 0 : i32
    return %c0_i32, %c0_i32_0 : i32, i32
  }
  func.func @transform_10(%arg0: i32) -> (i32, i32) {
    %c0_i32 = arith.constant 0 : i32
    %c0_i32_0 = arith.constant 0 : i32
    %c0_i32_1 = arith.constant 0 : i32
    return %c0_i32, %c0_i32_0 : i32, i32
  }
  func.func @transform_11(%arg0: i32) -> (i32, i32, i32) {
    %c0_i32 = arith.constant 0 : i32
    %c0_i32_0 = arith.constant 0 : i32
    %c0_i32_1 = arith.constant 0 : i32
    return %arg0, %c0_i32, %c0_i32_0 : i32, i32, i32
  }
}

module attributes {stable_mosaic.version = 11 : i64} {
  func.func @ffn_ln_kernel(%arg0: i32, %arg1: memref<16x32xf32, #tpu.memory_space<vmem>>, %arg2: memref<32x64xf32, #tpu.memory_space<vmem>>, %arg3: memref<1x64xf32, #tpu.memory_space<vmem>>, %arg4: memref<64x32xf32, #tpu.memory_space<vmem>>, %arg5: memref<1x32xf32, #tpu.memory_space<vmem>>, %arg6: memref<1x32xf32, #tpu.memory_space<vmem>>, %arg7: memref<1x32xf32, #tpu.memory_space<vmem>>, %arg8: memref<16x32xf32, #tpu.memory_space<vmem>>) attributes {dimension_semantics = [#tpu.dimension_semantics<parallel>], iteration_bounds = array<i64: 1>, scalar_prefetch = 0 : i64, scratch_operands = 0 : i64, tpu.core_type = #tpu.core_type<tc>, window_params = [{transform_indices = @transform_0, window_bounds = array<i64: 16, 32>}, {pipeline_mode = #tpu.pipeline_mode<synchronous>, transform_indices = @transform_1, window_bounds = array<i64: 32, 64>}, {pipeline_mode = #tpu.pipeline_mode<synchronous>, transform_indices = @transform_2, window_bounds = array<i64: 1, 64>}, {pipeline_mode = #tpu.pipeline_mode<synchronous>, transform_indices = @transform_3, window_bounds = array<i64: 64, 32>}, {pipeline_mode = #tpu.pipeline_mode<synchronous>, transform_indices = @transform_4, window_bounds = array<i64: 1, 32>}, {pipeline_mode = #tpu.pipeline_mode<synchronous>, transform_indices = @transform_5, window_bounds = array<i64: 1, 32>}, {pipeline_mode = #tpu.pipeline_mode<synchronous>, transform_indices = @transform_6, window_bounds = array<i64: 1, 32>}, {transform_indices = @transform_7, window_bounds = array<i64: 16, 32>}]} {
    %c0 = arith.constant 0 : index
    %c0_0 = arith.constant 0 : index
    %0 = vector.load %arg1[%c0, %c0_0] : memref<16x32xf32, #tpu.memory_space<vmem>>, vector<16x32xf32>
    %c0_1 = arith.constant 0 : index
    %c0_2 = arith.constant 0 : index
    %1 = vector.load %arg2[%c0_1, %c0_2] : memref<32x64xf32, #tpu.memory_space<vmem>>, vector<32x64xf32>
    %cst = arith.constant dense<0.000000e+00> : vector<16x64xf32>
    %2 = tpu.matmul %0, %1, %cst {dimension_numbers = #tpu.dot_dimension_numbers<[1], [0], [0], [1], [0, 0, 1, 1], [], []>} : vector<16x32xf32>, vector<32x64xf32>, vector<16x64xf32> -> vector<16x64xf32>
    %c0_3 = arith.constant 0 : index
    %c0_4 = arith.constant 0 : index
    %3 = vector.load %arg3[%c0_3, %c0_4] : memref<1x64xf32, #tpu.memory_space<vmem>>, vector<1x64xf32>
    %4 = vector.broadcast %3 : vector<1x64xf32> to vector<16x64xf32>
    %5 = arith.addf %2, %4 : vector<16x64xf32>
    %cst_5 = arith.constant 0.000000e+00 : f32
    %6 = vector.broadcast %cst_5 : f32 to vector<16x64xf32>
    %7 = arith.maximumf %5, %6 : vector<16x64xf32>
    %c0_6 = arith.constant 0 : index
    %c0_7 = arith.constant 0 : index
    %8 = vector.load %arg4[%c0_6, %c0_7] : memref<64x32xf32, #tpu.memory_space<vmem>>, vector<64x32xf32>
    %cst_8 = arith.constant dense<0.000000e+00> : vector<16x32xf32>
    %9 = tpu.matmul %7, %8, %cst_8 {dimension_numbers = #tpu.dot_dimension_numbers<[1], [0], [0], [1], [0, 0, 1, 1], [], []>} : vector<16x64xf32>, vector<64x32xf32>, vector<16x32xf32> -> vector<16x32xf32>
    %c0_9 = arith.constant 0 : index
    %c0_10 = arith.constant 0 : index
    %10 = vector.load %arg5[%c0_9, %c0_10] : memref<1x32xf32, #tpu.memory_space<vmem>>, vector<1x32xf32>
    %11 = vector.broadcast %10 : vector<1x32xf32> to vector<16x32xf32>
    %12 = arith.addf %9, %11 : vector<16x32xf32>
    %13 = arith.addf %0, %12 : vector<16x32xf32>
    %cst_11 = arith.constant dense<0.000000e+00> : vector<16xf32>
    %14 = vector.multi_reduction <add>, %13, %cst_11 [1] : vector<16x32xf32> to vector<16xf32>
    %15 = vector.shape_cast %14 : vector<16xf32> to vector<16x1xf32>
    %cst_12 = arith.constant 3.200000e+01 : f32
    %16 = vector.broadcast %cst_12 : f32 to vector<16x1xf32>
    %17 = arith.divf %15, %16 : vector<16x1xf32>
    %18 = vector.broadcast %17 : vector<16x1xf32> to vector<16x32xf32>
    %19 = arith.subf %13, %18 : vector<16x32xf32>
    %20 = arith.mulf %19, %19 : vector<16x32xf32>
    %cst_13 = arith.constant dense<0.000000e+00> : vector<16xf32>
    %21 = vector.multi_reduction <add>, %20, %cst_13 [1] : vector<16x32xf32> to vector<16xf32>
    %22 = vector.shape_cast %21 : vector<16xf32> to vector<16x1xf32>
    %cst_14 = arith.constant 3.200000e+01 : f32
    %23 = vector.broadcast %cst_14 : f32 to vector<16x1xf32>
    %24 = arith.divf %22, %23 : vector<16x1xf32>
    %25 = vector.broadcast %17 : vector<16x1xf32> to vector<16x32xf32>
    %26 = arith.subf %13, %25 : vector<16x32xf32>
    %cst_15 = arith.constant 9.99999974E-6 : f32
    %27 = vector.broadcast %cst_15 : f32 to vector<16x1xf32>
    %28 = arith.addf %24, %27 : vector<16x1xf32>
    %29 = math.rsqrt %28 : vector<16x1xf32>
    %30 = vector.broadcast %29 : vector<16x1xf32> to vector<16x32xf32>
    %31 = arith.mulf %26, %30 : vector<16x32xf32>
    %c0_16 = arith.constant 0 : index
    %c0_17 = arith.constant 0 : index
    %32 = vector.load %arg6[%c0_16, %c0_17] : memref<1x32xf32, #tpu.memory_space<vmem>>, vector<1x32xf32>
    %33 = vector.broadcast %32 : vector<1x32xf32> to vector<16x32xf32>
    %34 = arith.mulf %31, %33 : vector<16x32xf32>
    %c0_18 = arith.constant 0 : index
    %c0_19 = arith.constant 0 : index
    %35 = vector.load %arg7[%c0_18, %c0_19] : memref<1x32xf32, #tpu.memory_space<vmem>>, vector<1x32xf32>
    %36 = vector.broadcast %35 : vector<1x32xf32> to vector<16x32xf32>
    %37 = arith.addf %34, %36 : vector<16x32xf32>
    %c0_20 = arith.constant 0 : index
    %c0_21 = arith.constant 0 : index
    %38 = vector.load %arg8[%c0_20, %c0_21] : memref<16x32xf32, #tpu.memory_space<vmem>>, vector<16x32xf32>
    tpu.vector_store %arg8[%c0_20, %c0_21], %37 {strides = array<i32>} : memref<16x32xf32, #tpu.memory_space<vmem>>, vector<16x32xf32>,
    return
  }
  func.func @transform_0(%arg0: i32) -> (i32, i32) {
    %c0_i32 = arith.constant 0 : i32
    %c0_i32_0 = arith.constant 0 : i32
    return %arg0, %c0_i32 : i32, i32
  }
  func.func @transform_1(%arg0: i32) -> (i32, i32) {
    %c0_i32 = arith.constant 0 : i32
    %c0_i32_0 = arith.constant 0 : i32
    %c0_i32_1 = arith.constant 0 : i32
    return %c0_i32, %c0_i32_0 : i32, i32
  }
  func.func @transform_2(%arg0: i32) -> (i32, i32) {
    %c0_i32 = arith.constant 0 : i32
    %c0_i32_0 = arith.constant 0 : i32
    %c0_i32_1 = arith.constant 0 : i32
    return %c0_i32, %c0_i32_0 : i32, i32
  }
  func.func @transform_3(%arg0: i32) -> (i32, i32) {
    %c0_i32 = arith.constant 0 : i32
    %c0_i32_0 = arith.constant 0 : i32
    %c0_i32_1 = arith.constant 0 : i32
    return %c0_i32, %c0_i32_0 : i32, i32
  }
  func.func @transform_4(%arg0: i32) -> (i32, i32) {
    %c0_i32 = arith.constant 0 : i32
    %c0_i32_0 = arith.constant 0 : i32
    %c0_i32_1 = arith.constant 0 : i32
    return %c0_i32, %c0_i32_0 : i32, i32
  }
  func.func @transform_5(%arg0: i32) -> (i32, i32) {
    %c0_i32 = arith.constant 0 : i32
    %c0_i32_0 = arith.constant 0 : i32
    %c0_i32_1 = arith.constant 0 : i32
    return %c0_i32, %c0_i32_0 : i32, i32
  }
  func.func @transform_6(%arg0: i32) -> (i32, i32) {
    %c0_i32 = arith.constant 0 : i32
    %c0_i32_0 = arith.constant 0 : i32
    %c0_i32_1 = arith.constant 0 : i32
    return %c0_i32, %c0_i32_0 : i32, i32
  }
  func.func @transform_7(%arg0: i32) -> (i32, i32) {
    %c0_i32 = arith.constant 0 : i32
    %c0_i32_0 = arith.constant 0 : i32
    return %arg0, %c0_i32 : i32, i32
  }
}

module attributes {stable_mosaic.version = 11 : i64} {
  func.func @mha_ln_kernel(%arg0: i32, %arg1: memref<1x8x32xf32, #tpu.memory_space<vmem>>, %arg2: memref<1x8x32xf32, #tpu.memory_space<vmem>>, %arg3: memref<32x32xf32, #tpu.memory_space<vmem>>, %arg4: memref<1x32xf32, #tpu.memory_space<vmem>>, %arg5: memref<32x64xf32, #tpu.memory_space<vmem>>, %arg6: memref<1x64xf32, #tpu.memory_space<vmem>>, %arg7: memref<32x32xf32, #tpu.memory_space<vmem>>, %arg8: memref<1x32xf32, #tpu.memory_space<vmem>>, %arg9: memref<1x8x8xf32, #tpu.memory_space<vmem>>, %arg10: memref<1x32xf32, #tpu.memory_space<vmem>>, %arg11: memref<1x32xf32, #tpu.memory_space<vmem>>, %arg12: memref<1x8x32xf32, #tpu.memory_space<vmem>>) attributes {dimension_semantics = [#tpu.dimension_semantics<parallel>], iteration_bounds = array<i64: 2>, scalar_prefetch = 0 : i64, scratch_operands = 0 : i64, tpu.core_type = #tpu.core_type<tc>, window_params = [{transform_indices = @transform_0, window_bounds = array<i64: 1, 8, 32>}, {transform_indices = @transform_1, window_bounds = array<i64: 1, 8, 32>}, {pipeline_mode = #tpu.pipeline_mode<synchronous>, transform_indices = @transform_2, window_bounds = array<i64: 32, 32>}, {pipeline_mode = #tpu.pipeline_mode<synchronous>, transform_indices = @transform_3, window_bounds = array<i64: 1, 32>}, {pipeline_mode = #tpu.pipeline_mode<synchronous>, transform_indices = @transform_4, window_bounds = array<i64: 32, 64>}, {pipeline_mode = #tpu.pipeline_mode<synchronous>, transform_indices = @transform_5, window_bounds = array<i64: 1, 64>}, {pipeline_mode = #tpu.pipeline_mode<synchronous>, transform_indices = @transform_6, window_bounds = array<i64: 32, 32>}, {pipeline_mode = #tpu.pipeline_mode<synchronous>, transform_indices = @transform_7, window_bounds = array<i64: 1, 32>}, {transform_indices = @transform_8, window_bounds = array<i64: 1, 8, 8>}, {pipeline_mode = #tpu.pipeline_mode<synchronous>, transform_indices = @transform_9, window_bounds = array<i64: 1, 32>}, {pipeline_mode = #tpu.pipeline_mode<synchronous>, transform_indices = @transform_10, window_bounds = array<i64: 1, 32>}, {transform_indices = @transform_11, window_bounds = array<i64: 1, 8, 32>}]} {
    %c0 = arith.constant 0 : index
    %c0_0 = arith.constant 0 : index
    %c0_1 = arith.constant 0 : index
    %0 = vector.load %arg1[%c0, %c0_0, %c0_1] : memref<1x8x32xf32, #tpu.memory_space<vmem>>, vector<1x8x32xf32>
    %1 = vector.shape_cast %0 : vector<1x8x32xf32> to vector<8x32xf32>
    %c0_2 = arith.constant 0 : index
    %c0_3 = arith.constant 0 : index
    %c0_4 = arith.constant 0 : index
    %2 = vector.load %arg2[%c0_2, %c0_3, %c0_4] : memref<1x8x32xf32, #tpu.memory_space<vmem>>, vector<1x8x32xf32>
    %3 = vector.shape_cast %2 : vector<1x8x32xf32> to vector<8x32xf32>
    %c0_5 = arith.constant 0 : index
    %c0_6 = arith.constant 0 : index
    %4 = vector.load %arg3[%c0_5, %c0_6] : memref<32x32xf32, #tpu.memory_space<vmem>>, vector<32x32xf32>
    %cst = arith.constant dense<0.000000e+00> : vector<8x32xf32>
    %5 = tpu.matmul %1, %4, %cst {dimension_numbers = #tpu.dot_dimension_numbers<[1], [0], [0], [1], [0, 0, 1, 1], [], []>} : vector<8x32xf32>, vector<32x32xf32>, vector<8x32xf32> -> vector<8x32xf32>
    %c0_7 = arith.constant 0 : index
    %c0_8 = arith.constant 0 : index
    %6 = vector.load %arg4[%c0_7, %c0_8] : memref<1x32xf32, #tpu.memory_space<vmem>>, vector<1x32xf32>
    %7 = vector.broadcast %6 : vector<1x32xf32> to vector<8x32xf32>
    %8 = arith.addf %5, %7 : vector<8x32xf32>
    %c0_9 = arith.constant 0 : index
    %c0_10 = arith.constant 0 : index
    %9 = vector.load %arg5[%c0_9, %c0_10] : memref<32x64xf32, #tpu.memory_space<vmem>>, vector<32x64xf32>
    %cst_11 = arith.constant dense<0.000000e+00> : vector<8x64xf32>
    %10 = tpu.matmul %3, %9, %cst_11 {dimension_numbers = #tpu.dot_dimension_numbers<[1], [0], [0], [1], [0, 0, 1, 1], [], []>} : vector<8x32xf32>, vector<32x64xf32>, vector<8x64xf32> -> vector<8x64xf32>
    %c0_12 = arith.constant 0 : index
    %c0_13 = arith.constant 0 : index
    %11 = vector.load %arg6[%c0_12, %c0_13] : memref<1x64xf32, #tpu.memory_space<vmem>>, vector<1x64xf32>
    %12 = vector.broadcast %11 : vector<1x64xf32> to vector<8x64xf32>
    %13 = arith.addf %10, %12 : vector<8x64xf32>
    %14 = vector.extract_strided_slice %13 {offsets = [0, 0], sizes = [8, 32], strides = [1, 1]} : vector<8x64xf32> to vector<8x32xf32>
    %15 = vector.extract_strided_slice %13 {offsets = [0, 32], sizes = [8, 32], strides = [1, 1]} : vector<8x64xf32> to vector<8x32xf32>
    %c0_14 = arith.constant 0 : index
    %c0_15 = arith.constant 0 : index
    %c0_16 = arith.constant 0 : index
    %16 = vector.load %arg9[%c0_14, %c0_15, %c0_16] : memref<1x8x8xf32, #tpu.memory_space<vmem>>, vector<1x8x8xf32>
    %17 = vector.shape_cast %16 : vector<1x8x8xf32> to vector<8x8xf32>
    %18 = vector.extract_strided_slice %8 {offsets = [0, 0], sizes = [8, 8], strides = [1, 1]} : vector<8x32xf32> to vector<8x8xf32>
    %19 = vector.extract_strided_slice %14 {offsets = [0, 0], sizes = [8, 8], strides = [1, 1]} : vector<8x32xf32> to vector<8x8xf32>
    %20 = vector.extract_strided_slice %15 {offsets = [0, 0], sizes = [8, 8], strides = [1, 1]} : vector<8x32xf32> to vector<8x8xf32>
    %cst_17 = arith.constant dense<0.000000e+00> : vector<8x8xf32>
    %21 = tpu.matmul %18, %19, %cst_17 {dimension_numbers = #tpu.dot_dimension_numbers<[1], [1], [0], [0], [0, 0, 1, 0], [], []>} : vector<8x8xf32>, vector<8x8xf32>, vector<8x8xf32> -> vector<8x8xf32>
    %22 = arith.addf %21, %17 : vector<8x8xf32>
    %cst_18 = arith.constant dense<0xFF800000> : vector<8xf32>
    %23 = vector.multi_reduction <maximumf>, %22, %cst_18 [1] : vector<8x8xf32> to vector<8xf32>
    %24 = vector.shape_cast %23 : vector<8xf32> to vector<8x1xf32>
    %25 = vector.broadcast %24 : vector<8x1xf32> to vector<8x8xf32>
    %26 = arith.subf %22, %25 : vector<8x8xf32>
    %27 = math.exp %26 : vector<8x8xf32>
    %cst_19 = arith.constant dense<0.000000e+00> : vector<8xf32>
    %28 = vector.multi_reduction <add>, %27, %cst_19 [1] : vector<8x8xf32> to vector<8xf32>
    %29 = vector.shape_cast %28 : vector<8xf32> to vector<8x1xf32>
    %30 = tpu.reciprocal %29 {approx = true} : vector<8x1xf32> -> vector<8x1xf32>
    %31 = vector.broadcast %30 : vector<8x1xf32> to vector<8x8xf32>
    %32 = arith.mulf %27, %31 : vector<8x8xf32>
    %cst_20 = arith.constant dense<0.000000e+00> : vector<8x8xf32>
    %33 = tpu.matmul %32, %20, %cst_20 {dimension_numbers = #tpu.dot_dimension_numbers<[1], [0], [0], [1], [0, 0, 1, 1], [], []>} : vector<8x8xf32>, vector<8x8xf32>, vector<8x8xf32> -> vector<8x8xf32>
    %34 = vector.extract_strided_slice %8 {offsets = [0, 8], sizes = [8, 8], strides = [1, 1]} : vector<8x32xf32> to vector<8x8xf32>
    %35 = vector.extract_strided_slice %14 {offsets = [0, 8], sizes = [8, 8], strides = [1, 1]} : vector<8x32xf32> to vector<8x8xf32>
    %36 = vector.extract_strided_slice %15 {offsets = [0, 8], sizes = [8, 8], strides = [1, 1]} : vector<8x32xf32> to vector<8x8xf32>
    %cst_21 = arith.constant dense<0.000000e+00> : vector<8x8xf32>
    %37 = tpu.matmul %34, %35, %cst_21 {dimension_numbers = #tpu.dot_dimension_numbers<[1], [1], [0], [0], [0, 0, 1, 0], [], []>} : vector<8x8xf32>, vector<8x8xf32>, vector<8x8xf32> -> vector<8x8xf32>
    %38 = arith.addf %37, %17 : vector<8x8xf32>
    %cst_22 = arith.constant dense<0xFF800000> : vector<8xf32>
    %39 = vector.multi_reduction <maximumf>, %38, %cst_22 [1] : vector<8x8xf32> to vector<8xf32>
    %40 = vector.shape_cast %39 : vector<8xf32> to vector<8x1xf32>
    %41 = vector.broadcast %40 : vector<8x1xf32> to vector<8x8xf32>
    %42 = arith.subf %38, %41 : vector<8x8xf32>
    %43 = math.exp %42 : vector<8x8xf32>
    %cst_23 = arith.constant dense<0.000000e+00> : vector<8xf32>
    %44 = vector.multi_reduction <add>, %43, %cst_23 [1] : vector<8x8xf32> to vector<8xf32>
    %45 = vector.shape_cast %44 : vector<8xf32> to vector<8x1xf32>
    %46 = tpu.reciprocal %45 {approx = true} : vector<8x1xf32> -> vector<8x1xf32>
    %47 = vector.broadcast %46 : vector<8x1xf32> to vector<8x8xf32>
    %48 = arith.mulf %43, %47 : vector<8x8xf32>
    %cst_24 = arith.constant dense<0.000000e+00> : vector<8x8xf32>
    %49 = tpu.matmul %48, %36, %cst_24 {dimension_numbers = #tpu.dot_dimension_numbers<[1], [0], [0], [1], [0, 0, 1, 1], [], []>} : vector<8x8xf32>, vector<8x8xf32>, vector<8x8xf32> -> vector<8x8xf32>
    %50 = vector.extract_strided_slice %8 {offsets = [0, 16], sizes = [8, 8], strides = [1, 1]} : vector<8x32xf32> to vector<8x8xf32>
    %51 = vector.extract_strided_slice %14 {offsets = [0, 16], sizes = [8, 8], strides = [1, 1]} : vector<8x32xf32> to vector<8x8xf32>
    %52 = vector.extract_strided_slice %15 {offsets = [0, 16], sizes = [8, 8], strides = [1, 1]} : vector<8x32xf32> to vector<8x8xf32>
    %cst_25 = arith.constant dense<0.000000e+00> : vector<8x8xf32>
    %53 = tpu.matmul %50, %51, %cst_25 {dimension_numbers = #tpu.dot_dimension_numbers<[1], [1], [0], [0], [0, 0, 1, 0], [], []>} : vector<8x8xf32>, vector<8x8xf32>, vector<8x8xf32> -> vector<8x8xf32>
    %54 = arith.addf %53, %17 : vector<8x8xf32>
    %cst_26 = arith.constant dense<0xFF800000> : vector<8xf32>
    %55 = vector.multi_reduction <maximumf>, %54, %cst_26 [1] : vector<8x8xf32> to vector<8xf32>
    %56 = vector.shape_cast %55 : vector<8xf32> to vector<8x1xf32>
    %57 = vector.broadcast %56 : vector<8x1xf32> to vector<8x8xf32>
    %58 = arith.subf %54, %57 : vector<8x8xf32>
    %59 = math.exp %58 : vector<8x8xf32>
    %cst_27 = arith.constant dense<0.000000e+00> : vector<8xf32>
    %60 = vector.multi_reduction <add>, %59, %cst_27 [1] : vector<8x8xf32> to vector<8xf32>
    %61 = vector.shape_cast %60 : vector<8xf32> to vector<8x1xf32>
    %62 = tpu.reciprocal %61 {approx = true} : vector<8x1xf32> -> vector<8x1xf32>
    %63 = vector.broadcast %62 : vector<8x1xf32> to vector<8x8xf32>
    %64 = arith.mulf %59, %63 : vector<8x8xf32>
    %cst_28 = arith.constant dense<0.000000e+00> : vector<8x8xf32>
    %65 = tpu.matmul %64, %52, %cst_28 {dimension_numbers = #tpu.dot_dimension_numbers<[1], [0], [0], [1], [0, 0, 1, 1], [], []>} : vector<8x8xf32>, vector<8x8xf32>, vector<8x8xf32> -> vector<8x8xf32>
    %66 = vector.extract_strided_slice %8 {offsets = [0, 24], sizes = [8, 8], strides = [1, 1]} : vector<8x32xf32> to vector<8x8xf32>
    %67 = vector.extract_strided_slice %14 {offsets = [0, 24], sizes = [8, 8], strides = [1, 1]} : vector<8x32xf32> to vector<8x8xf32>
    %68 = vector.extract_strided_slice %15 {offsets = [0, 24], sizes = [8, 8], strides = [1, 1]} : vector<8x32xf32> to vector<8x8xf32>
    %cst_29 = arith.constant dense<0.000000e+00> : vector<8x8xf32>
    %69 = tpu.matmul %66, %67, %cst_29 {dimension_numbers = #tpu.dot_dimension_numbers<[1], [1], [0], [0], [0, 0, 1, 0], [], []>} : vector<8x8xf32>, vector<8x8xf32>, vector<8x8xf32> -> vector<8x8xf32>
    %70 = arith.addf %69, %17 : vector<8x8xf32>
    %cst_30 = arith.constant dense<0xFF800000> : vector<8xf32>
    %71 = vector.multi_reduction <maximumf>, %70, %cst_30 [1] : vector<8x8xf32> to vector<8xf32>
    %72 = vector.shape_cast %71 : vector<8xf32> to vector<8x1xf32>
    %73 = vector.broadcast %72 : vector<8x1xf32> to vector<8x8xf32>
    %74 = arith.subf %70, %73 : vector<8x8xf32>
    %75 = math.exp %74 : vector<8x8xf32>
    %cst_31 = arith.constant dense<0.000000e+00> : vector<8xf32>
    %76 = vector.multi_reduction <add>, %75, %cst_31 [1] : vector<8x8xf32> to vector<8xf32>
    %77 = vector.shape_cast %76 : vector<8xf32> to vector<8x1xf32>
    %78 = tpu.reciprocal %77 {approx = true} : vector<8x1xf32> -> vector<8x1xf32>
    %79 = vector.broadcast %78 : vector<8x1xf32> to vector<8x8xf32>
    %80 = arith.mulf %75, %79 : vector<8x8xf32>
    %cst_32 = arith.constant dense<0.000000e+00> : vector<8x8xf32>
    %81 = tpu.matmul %80, %68, %cst_32 {dimension_numbers = #tpu.dot_dimension_numbers<[1], [0], [0], [1], [0, 0, 1, 1], [], []>} : vector<8x8xf32>, vector<8x8xf32>, vector<8x8xf32> -> vector<8x8xf32>
    %82 = tpu.concatenate %33, %49, %65, %81 in 1 : vector<8x8xf32>, vector<8x8xf32>, vector<8x8xf32>, vector<8x8xf32> -> vector<8x32xf32>
    %c0_33 = arith.constant 0 : index
    %c0_34 = arith.constant 0 : index
    %83 = vector.load %arg7[%c0_33, %c0_34] : memref<32x32xf32, #tpu.memory_space<vmem>>, vector<32x32xf32>
    %cst_35 = arith.constant dense<0.000000e+00> : vector<8x32xf32>
    %84 = tpu.matmul %82, %83, %cst_35 {dimension_numbers = #tpu.dot_dimension_numbers<[1], [0], [0], [1], [0, 0, 1, 1], [], []>} : vector<8x32xf32>, vector<32x32xf32>, vector<8x32xf32> -> vector<8x32xf32>
    %c0_36 = arith.constant 0 : index
    %c0_37 = arith.constant 0 : index
    %85 = vector.load %arg8[%c0_36, %c0_37] : memref<1x32xf32, #tpu.memory_space<vmem>>, vector<1x32xf32>
    %86 = vector.broadcast %85 : vector<1x32xf32> to vector<8x32xf32>
    %87 = arith.addf %84, %86 : vector<8x32xf32>
    %88 = arith.addf %1, %87 : vector<8x32xf32>
    %cst_38 = arith.constant dense<0.000000e+00> : vector<8xf32>
    %89 = vector.multi_reduction <add>, %88, %cst_38 [1] : vector<8x32xf32> to vector<8xf32>
    %90 = vector.shape_cast %89 : vector<8xf32> to vector<8x1xf32>
    %cst_39 = arith.constant 3.200000e+01 : f32
    %91 = vector.broadcast %cst_39 : f32 to vector<8x1xf32>
    %92 = arith.divf %90, %91 : vector<8x1xf32>
    %93 = vector.broadcast %92 : vector<8x1xf32> to vector<8x32xf32>
    %94 = arith.subf %88, %93 : vector<8x32xf32>
    %95 = arith.mulf %94, %94 : vector<8x32xf32>
    %cst_40 = arith.constant dense<0.000000e+00> : vector<8xf32>
    %96 = vector.multi_reduction <add>, %95, %cst_40 [1] : vector<8x32xf32> to vector<8xf32>
    %97 = vector.shape_cast %96 : vector<8xf32> to vector<8x1xf32>
    %cst_41 = arith.constant 3.200000e+01 : f32
    %98 = vector.broadcast %cst_41 : f32 to vector<8x1xf32>
    %99 = arith.divf %97, %98 : vector<8x1xf32>
    %100 = vector.broadcast %92 : vector<8x1xf32> to vector<8x32xf32>
    %101 = arith.subf %88, %100 : vector<8x32xf32>
    %cst_42 = arith.constant 9.99999974E-6 : f32
    %102 = vector.broadcast %cst_42 : f32 to vector<8x1xf32>
    %103 = arith.addf %99, %102 : vector<8x1xf32>
    %104 = math.rsqrt %103 : vector<8x1xf32>
    %105 = vector.broadcast %104 : vector<8x1xf32> to vector<8x32xf32>
    %106 = arith.mulf %101, %105 : vector<8x32xf32>
    %c0_43 = arith.constant 0 : index
    %c0_44 = arith.constant 0 : index
    %107 = vector.load %arg10[%c0_43, %c0_44] : memref<1x32xf32, #tpu.memory_space<vmem>>, vector<1x32xf32>
    %108 = vector.broadcast %107 : vector<1x32xf32> to vector<8x32xf32>
    %109 = arith.mulf %106, %108 : vector<8x32xf32>
    %c0_45 = arith.constant 0 : index
    %c0_46 = arith.constant 0 : index
    %110 = vector.load %arg11[%c0_45, %c0_46] : memref<1x32xf32, #tpu.memory_space<vmem>>, vector<1x32xf32>
    %111 = vector.broadcast %110 : vector<1x32xf32> to vector<8x32xf32>
    %112 = arith.addf %109, %111 : vector<8x32xf32>
    %c0_47 = arith.constant 0 : index
    %c0_48 = arith.constant 0 : index
    %c0_49 = arith.constant 0 : index
    %113 = vector.load %arg12[%c0_47, %c0_48, %c0_49] : memref<1x8x32xf32, #tpu.memory_space<vmem>>, vector<1x8x32xf32>
    %114 = vector.shape_cast %113 : vector<1x8x32xf32> to vector<8x32xf32>
    %115 = vector.shape_cast %112 : vector<8x32xf32> to vector<1x8x32xf32>
    tpu.vector_store %arg12[%c0_47, %c0_48, %c0_49], %115 {strides = array<i32>} : memref<1x8x32xf32, #tpu.memory_space<vmem>>, vector<1x8x32xf32>,
    return
  }
  func.func @transform_0(%arg0: i32) -> (i32, i32, i32) {
    %c0_i32 = arith.constant 0 : i32
    %c0_i32_0 = arith.constant 0 : i32
    %c0_i32_1 = arith.constant 0 : i32
    return %arg0, %c0_i32, %c0_i32_0 : i32, i32, i32
  }
  func.func @transform_1(%arg0: i32) -> (i32, i32, i32) {
    %c0_i32 = arith.constant 0 : i32
    %c0_i32_0 = arith.constant 0 : i32
    %c0_i32_1 = arith.constant 0 : i32
    return %arg0, %c0_i32, %c0_i32_0 : i32, i32, i32
  }
  func.func @transform_2(%arg0: i32) -> (i32, i32) {
    %c0_i32 = arith.constant 0 : i32
    %c0_i32_0 = arith.constant 0 : i32
    %c0_i32_1 = arith.constant 0 : i32
    return %c0_i32, %c0_i32_0 : i32, i32
  }
  func.func @transform_3(%arg0: i32) -> (i32, i32) {
    %c0_i32 = arith.constant 0 : i32
    %c0_i32_0 = arith.constant 0 : i32
    %c0_i32_1 = arith.constant 0 : i32
    return %c0_i32, %c0_i32_0 : i32, i32
  }
  func.func @transform_4(%arg0: i32) -> (i32, i32) {
    %c0_i32 = arith.constant 0 : i32
    %c0_i32_0 = arith.constant 0 : i32
    %c0_i32_1 = arith.constant 0 : i32
    return %c0_i32, %c0_i32_0 : i32, i32
  }
  func.func @transform_5(%arg0: i32) -> (i32, i32) {
    %c0_i32 = arith.constant 0 : i32
    %c0_i32_0 = arith.constant 0 : i32
    %c0_i32_1 = arith.constant 0 : i32
    return %c0_i32, %c0_i32_0 : i32, i32
  }
  func.func @transform_6(%arg0: i32) -> (i32, i32) {
    %c0_i32 = arith.constant 0 : i32
    %c0_i32_0 = arith.constant 0 : i32
    %c0_i32_1 = arith.constant 0 : i32
    return %c0_i32, %c0_i32_0 : i32, i32
  }
  func.func @transform_7(%arg0: i32) -> (i32, i32) {
    %c0_i32 = arith.constant 0 : i32
    %c0_i32_0 = arith.constant 0 : i32
    %c0_i32_1 = arith.constant 0 : i32
    return %c0_i32, %c0_i32_0 : i32, i32
  }
  func.func @transform_8(%arg0: i32) -> (i32, i32, i32) {
    %c0_i32 = arith.constant 0 : i32
    %c0_i32_0 = arith.constant 0 : i32
    %c0_i32_1 = arith.constant 0 : i32
    return %arg0, %c0_i32, %c0_i32_0 : i32, i32, i32
  }
  func.func @transform_9(%arg0: i32) -> (i32, i32) {
    %c0_i32 = arith.constant 0 : i32
    %c0_i32_0 = arith.constant 0 : i32
    %c0_i32_1 = arith.constant 0 : i32
    return %c0_i32, %c0_i32_0 : i32, i32
  }
  func.func @transform_10(%arg0: i32) -> (i32, i32) {
    %c0_i32 = arith.constant 0 : i32
    %c0_i32_0 = arith.constant 0 : i32
    %c0_i32_1 = arith.constant 0 : i32
    return %c0_i32, %c0_i32_0 : i32, i32
  }
  func.func @transform_11(%arg0: i32) -> (i32, i32, i32) {
    %c0_i32 = arith.constant 0 : i32
    %c0_i32_0 = arith.constant 0 : i32
    %c0_i32_1 = arith.constant 0 : i32
    return %arg0, %c0_i32, %c0_i32_0 : i32, i32, i32
  }
}

module attributes {stable_mosaic.version = 11 : i64} {
  func.func @mha_ln_kernel(%arg0: i32, %arg1: memref<1x8x32xf32, #tpu.memory_space<vmem>>, %arg2: memref<1x8x32xf32, #tpu.memory_space<vmem>>, %arg3: memref<32x32xf32, #tpu.memory_space<vmem>>, %arg4: memref<1x32xf32, #tpu.memory_space<vmem>>, %arg5: memref<32x64xf32, #tpu.memory_space<vmem>>, %arg6: memref<1x64xf32, #tpu.memory_space<vmem>>, %arg7: memref<32x32xf32, #tpu.memory_space<vmem>>, %arg8: memref<1x32xf32, #tpu.memory_space<vmem>>, %arg9: memref<1x8x8xf32, #tpu.memory_space<vmem>>, %arg10: memref<1x32xf32, #tpu.memory_space<vmem>>, %arg11: memref<1x32xf32, #tpu.memory_space<vmem>>, %arg12: memref<1x8x32xf32, #tpu.memory_space<vmem>>) attributes {dimension_semantics = [#tpu.dimension_semantics<parallel>], iteration_bounds = array<i64: 2>, scalar_prefetch = 0 : i64, scratch_operands = 0 : i64, tpu.core_type = #tpu.core_type<tc>, window_params = [{transform_indices = @transform_0, window_bounds = array<i64: 1, 8, 32>}, {transform_indices = @transform_1, window_bounds = array<i64: 1, 8, 32>}, {pipeline_mode = #tpu.pipeline_mode<synchronous>, transform_indices = @transform_2, window_bounds = array<i64: 32, 32>}, {pipeline_mode = #tpu.pipeline_mode<synchronous>, transform_indices = @transform_3, window_bounds = array<i64: 1, 32>}, {pipeline_mode = #tpu.pipeline_mode<synchronous>, transform_indices = @transform_4, window_bounds = array<i64: 32, 64>}, {pipeline_mode = #tpu.pipeline_mode<synchronous>, transform_indices = @transform_5, window_bounds = array<i64: 1, 64>}, {pipeline_mode = #tpu.pipeline_mode<synchronous>, transform_indices = @transform_6, window_bounds = array<i64: 32, 32>}, {pipeline_mode = #tpu.pipeline_mode<synchronous>, transform_indices = @transform_7, window_bounds = array<i64: 1, 32>}, {transform_indices = @transform_8, window_bounds = array<i64: 1, 8, 8>}, {pipeline_mode = #tpu.pipeline_mode<synchronous>, transform_indices = @transform_9, window_bounds = array<i64: 1, 32>}, {pipeline_mode = #tpu.pipeline_mode<synchronous>, transform_indices = @transform_10, window_bounds = array<i64: 1, 32>}, {transform_indices = @transform_11, window_bounds = array<i64: 1, 8, 32>}]} {
    %c0 = arith.constant 0 : index
    %c0_0 = arith.constant 0 : index
    %c0_1 = arith.constant 0 : index
    %0 = vector.load %arg1[%c0, %c0_0, %c0_1] : memref<1x8x32xf32, #tpu.memory_space<vmem>>, vector<1x8x32xf32>
    %1 = vector.shape_cast %0 : vector<1x8x32xf32> to vector<8x32xf32>
    %c0_2 = arith.constant 0 : index
    %c0_3 = arith.constant 0 : index
    %c0_4 = arith.constant 0 : index
    %2 = vector.load %arg2[%c0_2, %c0_3, %c0_4] : memref<1x8x32xf32, #tpu.memory_space<vmem>>, vector<1x8x32xf32>
    %3 = vector.shape_cast %2 : vector<1x8x32xf32> to vector<8x32xf32>
    %c0_5 = arith.constant 0 : index
    %c0_6 = arith.constant 0 : index
    %4 = vector.load %arg3[%c0_5, %c0_6] : memref<32x32xf32, #tpu.memory_space<vmem>>, vector<32x32xf32>
    %cst = arith.constant dense<0.000000e+00> : vector<8x32xf32>
    %5 = tpu.matmul %1, %4, %cst {dimension_numbers = #tpu.dot_dimension_numbers<[1], [0], [0], [1], [0, 0, 1, 1], [], []>} : vector<8x32xf32>, vector<32x32xf32>, vector<8x32xf32> -> vector<8x32xf32>
    %c0_7 = arith.constant 0 : index
    %c0_8 = arith.constant 0 : index
    %6 = vector.load %arg4[%c0_7, %c0_8] : memref<1x32xf32, #tpu.memory_space<vmem>>, vector<1x32xf32>
    %7 = vector.broadcast %6 : vector<1x32xf32> to vector<8x32xf32>
    %8 = arith.addf %5, %7 : vector<8x32xf32>
    %c0_9 = arith.constant 0 : index
    %c0_10 = arith.constant 0 : index
    %9 = vector.load %arg5[%c0_9, %c0_10] : memref<32x64xf32, #tpu.memory_space<vmem>>, vector<32x64xf32>
    %cst_11 = arith.constant dense<0.000000e+00> : vector<8x64xf32>
    %10 = tpu.matmul %3, %9, %cst_11 {dimension_numbers = #tpu.dot_dimension_numbers<[1], [0], [0], [1], [0, 0, 1, 1], [], []>} : vector<8x32xf32>, vector<32x64xf32>, vector<8x64xf32> -> vector<8x64xf32>
    %c0_12 = arith.constant 0 : index
    %c0_13 = arith.constant 0 : index
    %11 = vector.load %arg6[%c0_12, %c0_13] : memref<1x64xf32, #tpu.memory_space<vmem>>, vector<1x64xf32>
    %12 = vector.broadcast %11 : vector<1x64xf32> to vector<8x64xf32>
    %13 = arith.addf %10, %12 : vector<8x64xf32>
    %14 = vector.extract_strided_slice %13 {offsets = [0, 0], sizes = [8, 32], strides = [1, 1]} : vector<8x64xf32> to vector<8x32xf32>
    %15 = vector.extract_strided_slice %13 {offsets = [0, 32], sizes = [8, 32], strides = [1, 1]} : vector<8x64xf32> to vector<8x32xf32>
    %c0_14 = arith.constant 0 : index
    %c0_15 = arith.constant 0 : index
    %c0_16 = arith.constant 0 : index
    %16 = vector.load %arg9[%c0_14, %c0_15, %c0_16] : memref<1x8x8xf32, #tpu.memory_space<vmem>>, vector<1x8x8xf32>
    %17 = vector.shape_cast %16 : vector<1x8x8xf32> to vector<8x8xf32>
    %18 = vector.extract_strided_slice %8 {offsets = [0, 0], sizes = [8, 8], strides = [1, 1]} : vector<8x32xf32> to vector<8x8xf32>
    %19 = vector.extract_strided_slice %14 {offsets = [0, 0], sizes = [8, 8], strides = [1, 1]} : vector<8x32xf32> to vector<8x8xf32>
    %20 = vector.extract_strided_slice %15 {offsets = [0, 0], sizes = [8, 8], strides = [1, 1]} : vector<8x32xf32> to vector<8x8xf32>
    %cst_17 = arith.constant dense<0.000000e+00> : vector<8x8xf32>
    %21 = tpu.matmul %18, %19, %cst_17 {dimension_numbers = #tpu.dot_dimension_numbers<[1], [1], [0], [0], [0, 0, 1, 0], [], []>} : vector<8x8xf32>, vector<8x8xf32>, vector<8x8xf32> -> vector<8x8xf32>
    %22 = arith.addf %21, %17 : vector<8x8xf32>
    %cst_18 = arith.constant dense<0xFF800000> : vector<8xf32>
    %23 = vector.multi_reduction <maximumf>, %22, %cst_18 [1] : vector<8x8xf32> to vector<8xf32>
    %24 = vector.shape_cast %23 : vector<8xf32> to vector<8x1xf32>
    %25 = vector.broadcast %24 : vector<8x1xf32> to vector<8x8xf32>
    %26 = arith.subf %22, %25 : vector<8x8xf32>
    %27 = math.exp %26 : vector<8x8xf32>
    %cst_19 = arith.constant dense<0.000000e+00> : vector<8xf32>
    %28 = vector.multi_reduction <add>, %27, %cst_19 [1] : vector<8x8xf32> to vector<8xf32>
    %29 = vector.shape_cast %28 : vector<8xf32> to vector<8x1xf32>
    %30 = tpu.reciprocal %29 {approx = true} : vector<8x1xf32> -> vector<8x1xf32>
    %31 = vector.broadcast %30 : vector<8x1xf32> to vector<8x8xf32>
    %32 = arith.mulf %27, %31 : vector<8x8xf32>
    %cst_20 = arith.constant dense<0.000000e+00> : vector<8x8xf32>
    %33 = tpu.matmul %32, %20, %cst_20 {dimension_numbers = #tpu.dot_dimension_numbers<[1], [0], [0], [1], [0, 0, 1, 1], [], []>} : vector<8x8xf32>, vector<8x8xf32>, vector<8x8xf32> -> vector<8x8xf32>
    %34 = vector.extract_strided_slice %8 {offsets = [0, 8], sizes = [8, 8], strides = [1, 1]} : vector<8x32xf32> to vector<8x8xf32>
    %35 = vector.extract_strided_slice %14 {offsets = [0, 8], sizes = [8, 8], strides = [1, 1]} : vector<8x32xf32> to vector<8x8xf32>
    %36 = vector.extract_strided_slice %15 {offsets = [0, 8], sizes = [8, 8], strides = [1, 1]} : vector<8x32xf32> to vector<8x8xf32>
    %cst_21 = arith.constant dense<0.000000e+00> : vector<8x8xf32>
    %37 = tpu.matmul %34, %35, %cst_21 {dimension_numbers = #tpu.dot_dimension_numbers<[1], [1], [0], [0], [0, 0, 1, 0], [], []>} : vector<8x8xf32>, vector<8x8xf32>, vector<8x8xf32> -> vector<8x8xf32>
    %38 = arith.addf %37, %17 : vector<8x8xf32>
    %cst_22 = arith.constant dense<0xFF800000> : vector<8xf32>
    %39 = vector.multi_reduction <maximumf>, %38, %cst_22 [1] : vector<8x8xf32> to vector<8xf32>
    %40 = vector.shape_cast %39 : vector<8xf32> to vector<8x1xf32>
    %41 = vector.broadcast %40 : vector<8x1xf32> to vector<8x8xf32>
    %42 = arith.subf %38, %41 : vector<8x8xf32>
    %43 = math.exp %42 : vector<8x8xf32>
    %cst_23 = arith.constant dense<0.000000e+00> : vector<8xf32>
    %44 = vector.multi_reduction <add>, %43, %cst_23 [1] : vector<8x8xf32> to vector<8xf32>
    %45 = vector.shape_cast %44 : vector<8xf32> to vector<8x1xf32>
    %46 = tpu.reciprocal %45 {approx = true} : vector<8x1xf32> -> vector<8x1xf32>
    %47 = vector.broadcast %46 : vector<8x1xf32> to vector<8x8xf32>
    %48 = arith.mulf %43, %47 : vector<8x8xf32>
    %cst_24 = arith.constant dense<0.000000e+00> : vector<8x8xf32>
    %49 = tpu.matmul %48, %36, %cst_24 {dimension_numbers = #tpu.dot_dimension_numbers<[1], [0], [0], [1], [0, 0, 1, 1], [], []>} : vector<8x8xf32>, vector<8x8xf32>, vector<8x8xf32> -> vector<8x8xf32>
    %50 = vector.extract_strided_slice %8 {offsets = [0, 16], sizes = [8, 8], strides = [1, 1]} : vector<8x32xf32> to vector<8x8xf32>
    %51 = vector.extract_strided_slice %14 {offsets = [0, 16], sizes = [8, 8], strides = [1, 1]} : vector<8x32xf32> to vector<8x8xf32>
    %52 = vector.extract_strided_slice %15 {offsets = [0, 16], sizes = [8, 8], strides = [1, 1]} : vector<8x32xf32> to vector<8x8xf32>
    %cst_25 = arith.constant dense<0.000000e+00> : vector<8x8xf32>
    %53 = tpu.matmul %50, %51, %cst_25 {dimension_numbers = #tpu.dot_dimension_numbers<[1], [1], [0], [0], [0, 0, 1, 0], [], []>} : vector<8x8xf32>, vector<8x8xf32>, vector<8x8xf32> -> vector<8x8xf32>
    %54 = arith.addf %53, %17 : vector<8x8xf32>
    %cst_26 = arith.constant dense<0xFF800000> : vector<8xf32>
    %55 = vector.multi_reduction <maximumf>, %54, %cst_26 [1] : vector<8x8xf32> to vector<8xf32>
    %56 = vector.shape_cast %55 : vector<8xf32> to vector<8x1xf32>
    %57 = vector.broadcast %56 : vector<8x1xf32> to vector<8x8xf32>
    %58 = arith.subf %54, %57 : vector<8x8xf32>
    %59 = math.exp %58 : vector<8x8xf32>
    %cst_27 = arith.constant dense<0.000000e+00> : vector<8xf32>
    %60 = vector.multi_reduction <add>, %59, %cst_27 [1] : vector<8x8xf32> to vector<8xf32>
    %61 = vector.shape_cast %60 : vector<8xf32> to vector<8x1xf32>
    %62 = tpu.reciprocal %61 {approx = true} : vector<8x1xf32> -> vector<8x1xf32>
    %63 = vector.broadcast %62 : vector<8x1xf32> to vector<8x8xf32>
    %64 = arith.mulf %59, %63 : vector<8x8xf32>
    %cst_28 = arith.constant dense<0.000000e+00> : vector<8x8xf32>
    %65 = tpu.matmul %64, %52, %cst_28 {dimension_numbers = #tpu.dot_dimension_numbers<[1], [0], [0], [1], [0, 0, 1, 1], [], []>} : vector<8x8xf32>, vector<8x8xf32>, vector<8x8xf32> -> vector<8x8xf32>
    %66 = vector.extract_strided_slice %8 {offsets = [0, 24], sizes = [8, 8], strides = [1, 1]} : vector<8x32xf32> to vector<8x8xf32>
    %67 = vector.extract_strided_slice %14 {offsets = [0, 24], sizes = [8, 8], strides = [1, 1]} : vector<8x32xf32> to vector<8x8xf32>
    %68 = vector.extract_strided_slice %15 {offsets = [0, 24], sizes = [8, 8], strides = [1, 1]} : vector<8x32xf32> to vector<8x8xf32>
    %cst_29 = arith.constant dense<0.000000e+00> : vector<8x8xf32>
    %69 = tpu.matmul %66, %67, %cst_29 {dimension_numbers = #tpu.dot_dimension_numbers<[1], [1], [0], [0], [0, 0, 1, 0], [], []>} : vector<8x8xf32>, vector<8x8xf32>, vector<8x8xf32> -> vector<8x8xf32>
    %70 = arith.addf %69, %17 : vector<8x8xf32>
    %cst_30 = arith.constant dense<0xFF800000> : vector<8xf32>
    %71 = vector.multi_reduction <maximumf>, %70, %cst_30 [1] : vector<8x8xf32> to vector<8xf32>
    %72 = vector.shape_cast %71 : vector<8xf32> to vector<8x1xf32>
    %73 = vector.broadcast %72 : vector<8x1xf32> to vector<8x8xf32>
    %74 = arith.subf %70, %73 : vector<8x8xf32>
    %75 = math.exp %74 : vector<8x8xf32>
    %cst_31 = arith.constant dense<0.000000e+00> : vector<8xf32>
    %76 = vector.multi_reduction <add>, %75, %cst_31 [1] : vector<8x8xf32> to vector<8xf32>
    %77 = vector.shape_cast %76 : vector<8xf32> to vector<8x1xf32>
    %78 = tpu.reciprocal %77 {approx = true} : vector<8x1xf32> -> vector<8x1xf32>
    %79 = vector.broadcast %78 : vector<8x1xf32> to vector<8x8xf32>
    %80 = arith.mulf %75, %79 : vector<8x8xf32>
    %cst_32 = arith.constant dense<0.000000e+00> : vector<8x8xf32>
    %81 = tpu.matmul %80, %68, %cst_32 {dimension_numbers = #tpu.dot_dimension_numbers<[1], [0], [0], [1], [0, 0, 1, 1], [], []>} : vector<8x8xf32>, vector<8x8xf32>, vector<8x8xf32> -> vector<8x8xf32>
    %82 = tpu.concatenate %33, %49, %65, %81 in 1 : vector<8x8xf32>, vector<8x8xf32>, vector<8x8xf32>, vector<8x8xf32> -> vector<8x32xf32>
    %c0_33 = arith.constant 0 : index
    %c0_34 = arith.constant 0 : index
    %83 = vector.load %arg7[%c0_33, %c0_34] : memref<32x32xf32, #tpu.memory_space<vmem>>, vector<32x32xf32>
    %cst_35 = arith.constant dense<0.000000e+00> : vector<8x32xf32>
    %84 = tpu.matmul %82, %83, %cst_35 {dimension_numbers = #tpu.dot_dimension_numbers<[1], [0], [0], [1], [0, 0, 1, 1], [], []>} : vector<8x32xf32>, vector<32x32xf32>, vector<8x32xf32> -> vector<8x32xf32>
    %c0_36 = arith.constant 0 : index
    %c0_37 = arith.constant 0 : index
    %85 = vector.load %arg8[%c0_36, %c0_37] : memref<1x32xf32, #tpu.memory_space<vmem>>, vector<1x32xf32>
    %86 = vector.broadcast %85 : vector<1x32xf32> to vector<8x32xf32>
    %87 = arith.addf %84, %86 : vector<8x32xf32>
    %88 = arith.addf %1, %87 : vector<8x32xf32>
    %cst_38 = arith.constant dense<0.000000e+00> : vector<8xf32>
    %89 = vector.multi_reduction <add>, %88, %cst_38 [1] : vector<8x32xf32> to vector<8xf32>
    %90 = vector.shape_cast %89 : vector<8xf32> to vector<8x1xf32>
    %cst_39 = arith.constant 3.200000e+01 : f32
    %91 = vector.broadcast %cst_39 : f32 to vector<8x1xf32>
    %92 = arith.divf %90, %91 : vector<8x1xf32>
    %93 = vector.broadcast %92 : vector<8x1xf32> to vector<8x32xf32>
    %94 = arith.subf %88, %93 : vector<8x32xf32>
    %95 = arith.mulf %94, %94 : vector<8x32xf32>
    %cst_40 = arith.constant dense<0.000000e+00> : vector<8xf32>
    %96 = vector.multi_reduction <add>, %95, %cst_40 [1] : vector<8x32xf32> to vector<8xf32>
    %97 = vector.shape_cast %96 : vector<8xf32> to vector<8x1xf32>
    %cst_41 = arith.constant 3.200000e+01 : f32
    %98 = vector.broadcast %cst_41 : f32 to vector<8x1xf32>
    %99 = arith.divf %97, %98 : vector<8x1xf32>
    %100 = vector.broadcast %92 : vector<8x1xf32> to vector<8x32xf32>
    %101 = arith.subf %88, %100 : vector<8x32xf32>
    %cst_42 = arith.constant 9.99999974E-6 : f32
    %102 = vector.broadcast %cst_42 : f32 to vector<8x1xf32>
    %103 = arith.addf %99, %102 : vector<8x1xf32>
    %104 = math.rsqrt %103 : vector<8x1xf32>
    %105 = vector.broadcast %104 : vector<8x1xf32> to vector<8x32xf32>
    %106 = arith.mulf %101, %105 : vector<8x32xf32>
    %c0_43 = arith.constant 0 : index
    %c0_44 = arith.constant 0 : index
    %107 = vector.load %arg10[%c0_43, %c0_44] : memref<1x32xf32, #tpu.memory_space<vmem>>, vector<1x32xf32>
    %108 = vector.broadcast %107 : vector<1x32xf32> to vector<8x32xf32>
    %109 = arith.mulf %106, %108 : vector<8x32xf32>
    %c0_45 = arith.constant 0 : index
    %c0_46 = arith.constant 0 : index
    %110 = vector.load %arg11[%c0_45, %c0_46] : memref<1x32xf32, #tpu.memory_space<vmem>>, vector<1x32xf32>
    %111 = vector.broadcast %110 : vector<1x32xf32> to vector<8x32xf32>
    %112 = arith.addf %109, %111 : vector<8x32xf32>
    %c0_47 = arith.constant 0 : index
    %c0_48 = arith.constant 0 : index
    %c0_49 = arith.constant 0 : index
    %113 = vector.load %arg12[%c0_47, %c0_48, %c0_49] : memref<1x8x32xf32, #tpu.memory_space<vmem>>, vector<1x8x32xf32>
    %114 = vector.shape_cast %113 : vector<1x8x32xf32> to vector<8x32xf32>
    %115 = vector.shape_cast %112 : vector<8x32xf32> to vector<1x8x32xf32>
    tpu.vector_store %arg12[%c0_47, %c0_48, %c0_49], %115 {strides = array<i32>} : memref<1x8x32xf32, #tpu.memory_space<vmem>>, vector<1x8x32xf32>,
    return
  }
  func.func @transform_0(%arg0: i32) -> (i32, i32, i32) {
    %c0_i32 = arith.constant 0 : i32
    %c0_i32_0 = arith.constant 0 : i32
    %c0_i32_1 = arith.constant 0 : i32
    return %arg0, %c0_i32, %c0_i32_0 : i32, i32, i32
  }
  func.func @transform_1(%arg0: i32) -> (i32, i32, i32) {
    %c0_i32 = arith.constant 0 : i32
    %c0_i32_0 = arith.constant 0 : i32
    %c0_i32_1 = arith.constant 0 : i32
    return %arg0, %c0_i32, %c0_i32_0 : i32, i32, i32
  }
  func.func @transform_2(%arg0: i32) -> (i32, i32) {
    %c0_i32 = arith.constant 0 : i32
    %c0_i32_0 = arith.constant 0 : i32
    %c0_i32_1 = arith.constant 0 : i32
    return %c0_i32, %c0_i32_0 : i32, i32
  }
  func.func @transform_3(%arg0: i32) -> (i32, i32) {
    %c0_i32 = arith.constant 0 : i32
    %c0_i32_0 = arith.constant 0 : i32
    %c0_i32_1 = arith.constant 0 : i32
    return %c0_i32, %c0_i32_0 : i32, i32
  }
  func.func @transform_4(%arg0: i32) -> (i32, i32) {
    %c0_i32 = arith.constant 0 : i32
    %c0_i32_0 = arith.constant 0 : i32
    %c0_i32_1 = arith.constant 0 : i32
    return %c0_i32, %c0_i32_0 : i32, i32
  }
  func.func @transform_5(%arg0: i32) -> (i32, i32) {
    %c0_i32 = arith.constant 0 : i32
    %c0_i32_0 = arith.constant 0 : i32
    %c0_i32_1 = arith.constant 0 : i32
    return %c0_i32, %c0_i32_0 : i32, i32
  }
  func.func @transform_6(%arg0: i32) -> (i32, i32) {
    %c0_i32 = arith.constant 0 : i32
    %c0_i32_0 = arith.constant 0 : i32
    %c0_i32_1 = arith.constant 0 : i32
    return %c0_i32, %c0_i32_0 : i32, i32
  }
  func.func @transform_7(%arg0: i32) -> (i32, i32) {
    %c0_i32 = arith.constant 0 : i32
    %c0_i32_0 = arith.constant 0 : i32
    %c0_i32_1 = arith.constant 0 : i32
    return %c0_i32, %c0_i32_0 : i32, i32
  }
  func.func @transform_8(%arg0: i32) -> (i32, i32, i32) {
    %c0_i32 = arith.constant 0 : i32
    %c0_i32_0 = arith.constant 0 : i32
    %c0_i32_1 = arith.constant 0 : i32
    return %arg0, %c0_i32, %c0_i32_0 : i32, i32, i32
  }
  func.func @transform_9(%arg0: i32) -> (i32, i32) {
    %c0_i32 = arith.constant 0 : i32
    %c0_i32_0 = arith.constant 0 : i32
    %c0_i32_1 = arith.constant 0 : i32
    return %c0_i32, %c0_i32_0 : i32, i32
  }
  func.func @transform_10(%arg0: i32) -> (i32, i32) {
    %c0_i32 = arith.constant 0 : i32
    %c0_i32_0 = arith.constant 0 : i32
    %c0_i32_1 = arith.constant 0 : i32
    return %c0_i32, %c0_i32_0 : i32, i32
  }
  func.func @transform_11(%arg0: i32) -> (i32, i32, i32) {
    %c0_i32 = arith.constant 0 : i32
    %c0_i32_0 = arith.constant 0 : i32
    %c0_i32_1 = arith.constant 0 : i32
    return %arg0, %c0_i32, %c0_i32_0 : i32, i32, i32
  }
}

module attributes {stable_mosaic.version = 11 : i64} {
  func.func @layernorm_kernel(%arg0: i32, %arg1: memref<16x32xf32, #tpu.memory_space<vmem>>, %arg2: memref<1x32xf32, #tpu.memory_space<vmem>>, %arg3: memref<1x32xf32, #tpu.memory_space<vmem>>, %arg4: memref<16x32xf32, #tpu.memory_space<vmem>>) attributes {dimension_semantics = [#tpu.dimension_semantics<parallel>], iteration_bounds = array<i64: 1>, scalar_prefetch = 0 : i64, scratch_operands = 0 : i64, tpu.core_type = #tpu.core_type<tc>, window_params = [{transform_indices = @transform_0, window_bounds = array<i64: 16, 32>}, {pipeline_mode = #tpu.pipeline_mode<synchronous>, transform_indices = @transform_1, window_bounds = array<i64: 1, 32>}, {pipeline_mode = #tpu.pipeline_mode<synchronous>, transform_indices = @transform_2, window_bounds = array<i64: 1, 32>}, {transform_indices = @transform_3, window_bounds = array<i64: 16, 32>}]} {
    %c0 = arith.constant 0 : index
    %c0_0 = arith.constant 0 : index
    %0 = vector.load %arg1[%c0, %c0_0] : memref<16x32xf32, #tpu.memory_space<vmem>>, vector<16x32xf32>
    %cst = arith.constant dense<0.000000e+00> : vector<16xf32>
    %1 = vector.multi_reduction <add>, %0, %cst [1] : vector<16x32xf32> to vector<16xf32>
    %2 = vector.shape_cast %1 : vector<16xf32> to vector<16x1xf32>
    %cst_1 = arith.constant 3.200000e+01 : f32
    %3 = vector.broadcast %cst_1 : f32 to vector<16x1xf32>
    %4 = arith.divf %2, %3 : vector<16x1xf32>
    %5 = vector.broadcast %4 : vector<16x1xf32> to vector<16x32xf32>
    %6 = arith.subf %0, %5 : vector<16x32xf32>
    %7 = arith.mulf %6, %6 : vector<16x32xf32>
    %cst_2 = arith.constant dense<0.000000e+00> : vector<16xf32>
    %8 = vector.multi_reduction <add>, %7, %cst_2 [1] : vector<16x32xf32> to vector<16xf32>
    %9 = vector.shape_cast %8 : vector<16xf32> to vector<16x1xf32>
    %cst_3 = arith.constant 3.200000e+01 : f32
    %10 = vector.broadcast %cst_3 : f32 to vector<16x1xf32>
    %11 = arith.divf %9, %10 : vector<16x1xf32>
    %12 = vector.broadcast %4 : vector<16x1xf32> to vector<16x32xf32>
    %13 = arith.subf %0, %12 : vector<16x32xf32>
    %cst_4 = arith.constant 9.99999974E-6 : f32
    %14 = vector.broadcast %cst_4 : f32 to vector<16x1xf32>
    %15 = arith.addf %11, %14 : vector<16x1xf32>
    %16 = math.rsqrt %15 : vector<16x1xf32>
    %17 = vector.broadcast %16 : vector<16x1xf32> to vector<16x32xf32>
    %18 = arith.mulf %13, %17 : vector<16x32xf32>
    %c0_5 = arith.constant 0 : index
    %c0_6 = arith.constant 0 : index
    %19 = vector.load %arg2[%c0_5, %c0_6] : memref<1x32xf32, #tpu.memory_space<vmem>>, vector<1x32xf32>
    %20 = vector.broadcast %19 : vector<1x32xf32> to vector<16x32xf32>
    %21 = arith.mulf %18, %20 : vector<16x32xf32>
    %c0_7 = arith.constant 0 : index
    %c0_8 = arith.constant 0 : index
    %22 = vector.load %arg3[%c0_7, %c0_8] : memref<1x32xf32, #tpu.memory_space<vmem>>, vector<1x32xf32>
    %23 = vector.broadcast %22 : vector<1x32xf32> to vector<16x32xf32>
    %24 = arith.addf %21, %23 : vector<16x32xf32>
    %c0_9 = arith.constant 0 : index
    %c0_10 = arith.constant 0 : index
    %25 = vector.load %arg4[%c0_9, %c0_10] : memref<16x32xf32, #tpu.memory_space<vmem>>, vector<16x32xf32>
    tpu.vector_store %arg4[%c0_9, %c0_10], %24 {strides = array<i32>} : memref<16x32xf32, #tpu.memory_space<vmem>>, vector<16x32xf32>,
    return
  }
  func.func @transform_0(%arg0: i32) -> (i32, i32) {
    %c0_i32 = arith.constant 0 : i32
    %c0_i32_0 = arith.constant 0 : i32
    return %arg0, %c0_i32 : i32, i32
  }
  func.func @transform_1(%arg0: i32) -> (i32, i32) {
    %c0_i32 = arith.constant 0 : i32
    %c0_i32_0 = arith.constant 0 : i32
    %c0_i32_1 = arith.constant 0 : i32
    return %c0_i32, %c0_i32_0 : i32, i32
  }
  func.func @transform_2(%arg0: i32) -> (i32, i32) {
    %c0_i32 = arith.constant 0 : i32
    %c0_i32_0 = arith.constant 0 : i32
    %c0_i32_1 = arith.constant 0 : i32
    return %c0_i32, %c0_i32_0 : i32, i32
  }
  func.func @transform_3(%arg0: i32) -> (i32, i32) {
    %c0_i32 = arith.constant 0 : i32
    %c0_i32_0 = arith.constant 0 : i32
    return %arg0, %c0_i32 : i32, i32
  }
}

</mosaic_0001>

<bundles_post_ra>
// kernel: decoder_forward.9
= control target key start
LH: loop header
LB: loop body
LE: loop exit
PB: predicated region body
PF: predicated region fallthrough
CT: control target
= control target key end

     0   :  { %vm36_vm0 = vcmask 261120   ;;  %vm80_vm1 = vcmask 523264   ;;  %v208_v30 = vmov 32.0   ;;  %s317_s1 = inlined_call_operand.vmem [shape: f32[32,64], index: 1, kind: input, shape index: {}]   ;;  %s318_s3 = inlined_call_operand.vmem [shape: f32[64,32], index: 3, kind: input, shape index: {}]   ;;  %s319_s0 = inlined_call_operand.vmem [shape: f32[16,32], index: 0, kind: input, shape index: {}]   ;;  %s320_s2 = inlined_call_operand.vmem [shape: f32[1,64], index: 2, kind: input, shape index: {}]   ;;  %s321_s4 = inlined_call_operand.vmem [shape: f32[1,32], index: 4, kind: input, shape index: {}]   ;;  %s322_s5 = inlined_call_operand.vmem [shape: f32[1,32], index: 5, kind: input, shape index: {}]   ;;  %s323_s6 = inlined_call_operand.vmem [shape: f32[1,32], index: 6, kind: input, shape index: {}]   ;;  %s324_s7 = inlined_call_operand.vmem [shape: f32[16,32], index: 7, kind: output, shape index: {}]  }
   0x1   :  { %v31_v0 = vld [vmem:[%s317_s1 + $0x18] sm:$0xff]  ;;  %v30_v1 = vld [vmem:[%s317_s1 + $0x10] sm:$0xff]  ;;  %v29_v2 = vld [vmem:[%s317_s1 + $0x8] sm:$0xff]  ;;  %202 = vrcp.f32 %v208_v30 }
   0x2   :  { %55 = vmatpush.msra.mxu0 %v31_v0  ;;  %185 = vmatpush.msra.mxu3 %v31_v0  ;;  %v75_v3 = vld [vmem:[%s318_s3 + $0x38] sm:$0xff]  ;;  %v74_v4 = vld [vmem:[%s318_s3 + $0x30] sm:$0xff]  ;;  %v28_v5 = vld [vmem:[%s317_s1] sm:$0xff] }
   0x3   :  { %95 = vmatpush.msra.mxu1 %v75_v3  ;;  %189 = vmatpush.msra.mxu2 %v75_v3  ;;  %v26_v6 = vld [vmem:[%s319_s0] sm:$0xff]  ;;  %v27_v7 = vld [vmem:[%s319_s0 + $0x8] sm:$0xff]  ;;  %v71_v10 = vld [vmem:[%s318_s3 + $0x18] sm:$0xff] }
   0x4   :  { %56 = vmatpush.msra.mxu0 %v30_v1  ;;  %186 = vmatpush.msra.mxu3 %v30_v1  ;;  %v73_v8 = vld [vmem:[%s318_s3 + $0x28] sm:$0xff]  ;;  %v72_v9 = vld [vmem:[%s318_s3 + $0x20] sm:$0xff]  ;;  %v70_v11 = vld [vmem:[%s318_s3 + $0x10] sm:$0xff] }
   0x5   :  { %96 = vmatpush.msra.mxu1 %v74_v4  ;;  %190 = vmatpush.msra.mxu2 %v74_v4  ;;  %v69_v12 = vld [vmem:[%s318_s3 + $0x8] sm:$0xff]  ;;  %v68_v13 = vld [vmem:[%s318_s3] sm:$0xff] }
   0x6   :  { %57 = vmatpush.msra.mxu0 %v29_v2  ;;  %187 = vmatpush.msra.mxu3 %v29_v2  ;;  %v198_v14 = vld [vmem:[%s320_s2] ss:$0 sm:$0xff] }
   0x7   :  { %97 = vmatpush.msra.mxu1 %v73_v8  ;;  %191 = vmatpush.msra.mxu2 %v73_v8  ;;  %v199_v21 = vld [vmem:[%s321_s4] ss:$0 sm:$0xff]  ;;  %v203_v31 = vpop.eup %202 }
   0x8   :  { %58 = vmatpush.msra.mxu0 %v28_v5  ;;  %188 = vmatpush.msra.mxu3 %v28_v5  ;;  %v119_v32 = vmul.f32 32.0, %v203_v31  ;;  %vm123_vm2 = vweird.f32 %v203_v31  ;;  %v200_v59 = vld [vmem:[%s322_s5] ss:$0 sm:$0xff] }
   0x9   :  { %181 = vmatmul.msk.f32.vlgmr.msra.gmra.mxu0 %vm36_vm0, %v26_v6  ;;  %182 = vmatmul.msk.f32.vlgmr.msra.gmra.mxu3 %vm36_vm0, %v27_v7  ;;  %v201_v62 = vld [vmem:[%s323_s6] ss:$0 sm:$0xff] }
   0xa   :  { %98 = vmatpush.msra.mxu1 %v72_v9  ;;  %192 = vmatpush.msra.mxu2 %v72_v9  ;;  %v120_v33 = vsub.f32 1.0, %v119_v32 }
   0xc   :  { %99 = vmatpush.msra.mxu1 %v71_v10  ;;  %193 = vmatpush.msra.mxu2 %v71_v10  ;;  %v121_v34 = vmul.f32 %v203_v31, %v120_v33 }
   0xe   :  { %100 = vmatpush.msra.mxu1 %v70_v11  ;;  %194 = vmatpush.msra.mxu2 %v70_v11  ;;  %v122_v35 = vadd.f32 %v203_v31, %v121_v34 }
  0x10   :  { %101 = vmatpush.msra.mxu1 %v69_v12  ;;  %195 = vmatpush.msra.mxu2 %v69_v12  ;;  %v124_v36 = vsel %vm123_vm2, %v203_v31, %v122_v35 }
  0x12   :  { %102 = vmatpush.msra.mxu1 %v68_v13  ;;  %196 = vmatpush.msra.mxu2 %v68_v13 }
  0x86   :  { %v60_v15 = vpop.f32.mrf.mxu0 }
  0x87   :  { %v61_v16 = vadd.f32 %v198_v14, %v60_v15 }
  0x89   :  { %v66_v17 = vmax.f32 %v61_v16, 0.0 }
  0x8b   :  { %183 = vmatmul.msk.f32.vlgmr.msra.gmra.mxu1 %vm80_vm1, %v66_v17 }
  0x8c   :  { %v63_v18 = vpop.f32.mrf.mxu3 }
  0x8d   :  { %v64_v19 = vadd.f32 %v198_v14, %v63_v18 }
  0x8f   :  { %v67_v20 = vmax.f32 %v64_v19, 0.0 }
  0x91   :  { %184 = vmatmul.msk.f32.vlgmr.msra.gmra.mxu2 %vm80_vm1, %v67_v20 }
 0x108   :  { %v104_v22 = vpop.f32.mrf.mxu1 }
 0x109   :  { %v105_v23 = vadd.f32 %v199_v21, %v104_v22 }
 0x10b   :  { %v110_v24 = vadd.f32 %v105_v23, %v26_v6 }
 0x10d   :  { %v112_v25 = vsel %vm36_vm0, %v110_v24, 0.0 }
 0x10e   :  { %113 = vadd.xlane.f32.xlu0 %v112_v25 }
 0x114   :  { %v107_v26 = vpop.f32.mrf.mxu2 }
 0x115   :  { %v108_v27 = vadd.f32 %v199_v21, %v107_v26 }
 0x117   :  { %v111_v28 = vadd.f32 %v108_v27, %v27_v7 }
 0x119   :  { %v115_v29 = vsel %vm36_vm0, %v111_v28, 0.0 }
 0x11a   :  { %116 = vadd.xlane.f32.xlu0 %v115_v29 }
 0x181   :  { %v114_v37 = vpop.xlane.xlu0 %113 }
 0x182   :  { %v125_v38 = vmul.f32 %v124_v36, %v114_v37 }
 0x184   :  { %v127_v39 = vsub.f32 %v110_v24, %v125_v38 }
 0x186   :  { %v129_v40 = vmul.f32 %v127_v39, %v127_v39 }
 0x188   :  { %v131_v41 = vsel %vm36_vm0, %v129_v40, 0.0 }
 0x189   :  { %132 = vadd.xlane.f32.xlu1 %v131_v41 }
 0x18d   :  { %v117_v42 = vpop.xlane.xlu0 %116 }
 0x18e   :  { %v126_v43 = vmul.f32 %v124_v36, %v117_v42 }
 0x190   :  { %v128_v44 = vsub.f32 %v111_v28, %v126_v43 }
 0x192   :  { %v130_v45 = vmul.f32 %v128_v44, %v128_v44 }
 0x194   :  { %v134_v46 = vsel %vm36_vm0, %v130_v45, 0.0 }
 0x195   :  { %135 = vadd.xlane.f32.xlu1 %v134_v46 }
 0x1fc   :  { %v133_v47 = vpop.xlane.xlu1 %132 }
 0x1fd   :  { %v137_v48 = vmul.f32 %v133_v47, %v124_v36 }
 0x1ff   :  { %v139_v49 = vadd.f32 1e-05, %v137_v48 }
 0x201   :  { %204 = vrsqrt.f32 %v139_v49  ;;  %vm147_vm4 = vweird.f32 %v139_v49 }
 0x207   :  { %v205_v50 = vpop.eup %204 }
 0x208   :  { %v142_v51 = vmul.f32 %v205_v50, %v139_v49  ;;  %v136_v52 = vpop.xlane.xlu1 %135  ;;  %vm148_vm3 = vweird.f32 %v205_v50 }
 0x209   :  { %v138_v53 = vmul.f32 %v136_v52, %v124_v36  ;;  %vm149_vm5 = vmor %vm147_vm4, %vm148_vm3 }
 0x20a   :  { %v143_v54 = vmul.f32 %v205_v50, %v142_v51 }
 0x20b   :  { %v140_v55 = vadd.f32 1e-05, %v138_v53 }
 0x20c   :  { %v144_v56 = vmul.f32 0.5, %v143_v54 }
 0x20d   :  { %206 = vrsqrt.f32 %v140_v55  ;;  %vm157_vm7 = vweird.f32 %v140_v55 }
 0x20e   :  { %v145_v57 = vsub.f32 1.5, %v144_v56 }
 0x210   :  { %v146_v58 = vmul.f32 %v205_v50, %v145_v57 }
 0x212   :  { %v150_v60 = vsel %vm149_vm5, %v205_v50, %v146_v58 }
 0x213   :  { %v207_v61 = vpop.eup %206  ;;  %v161_v63 = vmul.f32 %v150_v60, %v127_v39 }
 0x214   :  { %v152_v0 = vmul.f32 %v207_v61, %v140_v55  ;;  %vm158_vm6 = vweird.f32 %v207_v61 }
 0x215   :  { %v167_v1 = vmul.f32 %v200_v59, %v161_v63  ;;  %vm159_vm8 = vmor %vm157_vm7, %vm158_vm6 }
 0x216   :  { %v153_v2 = vmul.f32 %v207_v61, %v152_v0 }
 0x217   :  { %v173_v3 = vadd.f32 %v201_v62, %v167_v1 }
 0x218   :  { %v154_v4 = vmul.f32 0.5, %v153_v2 }
 0x219   :  { %175 = vst.msk [vmem:[%s324_s7] sm:$0xff] %vm36_vm0, %v173_v3 }
 0x21a   :  { %v155_v5 = vsub.f32 1.5, %v154_v4 }
 0x21c   :  { %v156_v6 = vmul.f32 %v207_v61, %v155_v5 }
 0x21e   :  { %v160_v7 = vsel %vm159_vm8, %v207_v61, %v156_v6 }
 0x21f   :  { %v162_v8 = vmul.f32 %v160_v7, %v128_v44 }
 0x221   :  { %v168_v9 = vmul.f32 %v200_v59, %v162_v8 }
 0x223   :  { %v174_v10 = vadd.f32 %v201_v62, %v168_v9 }
 0x225   :  { %176 = vst.msk [vmem:[%s324_s7 + $0x8] sm:$0xff] %vm36_vm0, %v174_v10 }

// kernel: decoder_forward.8
= control target key start
LH: loop header
LB: loop body
LE: loop exit
PB: predicated region body
PF: predicated region fallthrough
CT: control target
= control target key end

     0   :  { %s1701_s0 = inlined_call_operand.vmem [shape: f32[2,8,32], index: 0, kind: input, shape index: {}]   ;;  %s1702_s1 = inlined_call_operand.vmem [shape: f32[2,8,32], index: 1, kind: input, shape index: {}]   ;;  %s1703_s2 = inlined_call_operand.hbm [shape: f32[32,32], index: 2, kind: input, shape index: {}]   ;;  %s1704_s3 = inlined_call_operand.vmem [shape: f32[1,32], index: 3, kind: input, shape index: {}]   ;;  %s1705_s4 = inlined_call_operand.hbm [shape: f32[32,64], index: 4, kind: input, shape index: {}]   ;;  %s1706_s5 = inlined_call_operand.hbm [shape: f32[1,64], index: 5, kind: input, shape index: {}]   ;;  %s1707_s6 = inlined_call_operand.hbm [shape: f32[32,32], index: 6, kind: input, shape index: {}]   ;;  %s1708_s7 = inlined_call_operand.hbm [shape: f32[1,32], index: 7, kind: input, shape index: {}]   ;;  %s1709_s8 = inlined_call_operand.vmem [shape: f32[2,8,8], index: 8, kind: input, shape index: {}]   ;;  %s1710_s9 = inlined_call_operand.hbm [shape: f32[1,32], index: 9, kind: input, shape index: {}]   ;;  %s1711_s10 = inlined_call_operand.hbm [shape: f32[1,32], index: 10, kind: input, shape index: {}]   ;;  %s1712_s11 = inlined_call_operand.vmem [shape: f32[2,8,32], index: 11, kind: output, shape index: {}]  }
   0x1   :  { %1713 = sst [smem:[#allocation17_spill]] %s1705_s4 }
   0x2   :  { %16 = vsyncpa [#allocation3], 0 }
   0x3   :  { %17 = vsyncpa [#allocation5], 0 }
   0x4   :  { %18 = vsyncpa [#allocation8], 0 }
   0x5   :  { %19 = vsyncpa [#allocation11], 0  ;;  %s1555_s17 = smov 0  }
   0x6 LB: > { %s1561_s18 = sadd.s32 4294967295, %s1473_s17   ;;  %p1086_p0 = scmp.ge.s32.totalorder %s1473_s17, 1  ;;  %s1473_s17 = sphi %s1555_s17, %s25_s17  }
   0x7   : > { %p302_p1 = scmp.lt.s32.totalorder %s1473_s17, 3  ;;  %p1174_p2 = scmp.eq.s32.totalorder %s1561_s18, 0 }
   0x8   : > { %s1714_s4 = sld [smem:[#allocation17_spill]]  ;;  %s356_s25 = sshll.u32 %s1707_s6, 4  ;;  %s357_s25 = int_to_ptr.hbm [resolvable:$true] %s356_s25 }
   0x9   : > { %p1569_p3 = pnand %p1086_p0, %p302_p1  ;;  %s1475_s26 = smov [#allocation4]  }
   0xa   : > { %s332_s27 = sshll.u32 %s1475_s26, 4  ;;  %s1476_s29 = smov [#allocation7]   ;;  %s333_s27 = int_to_ptr.vmem [resolvable:$true] %s332_s27 }
   0xb   : > { %p1152_p4 = pneg %p1569_p3  ;;  %s358_s30 = sshll.u32 %s1476_s29, 4  ;;  %s359_s30 = int_to_ptr.vmem [resolvable:$true] %s358_s30 }
   0xc   : > { %s383_s14 = sshll.u32 %s1710_s9, 4  ;;  %s1477_s15 = smov 128   ;;  %s384_s14 = int_to_ptr.hbm [resolvable:$true] %s383_s14 }
   0xd   : > { %p1580_p5 = pnand %p1174_p2, %p1152_p4  ;;  %s1478_s16 = smov 8  }
   0xe   : > { %s330_s21 = sshll.u32 %s1714_s4, 4  ;;  %s1479_s19 = smov [#allocation10]   ;;  %s331_s21 = int_to_ptr.hbm [resolvable:$true] %s330_s21 }
   0xf   : > { %1158 = dma.hbm_to_vmem [thread:$0]  (!%p1580_p5), %s331_s21, 512, %s333_s27, [#allocation5], %s1477_s15, %s1477_s15, %s1478_s16  }
  0x10   : > { %1164 = dma.hbm_to_vmem [thread:$0]  (!%p1580_p5), %s357_s25, 512, %s359_s30, [#allocation8], %s1477_s15, %s1477_s15, %s1478_s16  }
  0x11   : > { %s385_s20 = sshll.u32 %s1479_s19, 4  ;;  %s313_s26 = sshll.u32 %s1703_s2, 4  ;;  %s386_s20 = int_to_ptr.vmem [resolvable:$true] %s385_s20  ;;  %s314_s26 = int_to_ptr.hbm [resolvable:$true] %s313_s26 }
  0x12   : > { %1170 = dma.hbm_to_vmem [thread:$0]  (!%p1580_p5), %s384_s14, 16, %s386_s20, [#allocation11]  }
  0x13   : > { %s345_s13 = sshll.u32 %s1706_s5, 4  ;;  %s1480_s4 = smov [#allocation2]   ;;  %s346_s13 = int_to_ptr.hbm [resolvable:$true] %s345_s13 }
  0x14   : > { %s315_s21 = sshll.u32 %s1480_s4, 4  ;;  %s1481_s25 = smov [#allocation6]   ;;  %s316_s21 = int_to_ptr.vmem [resolvable:$true] %s315_s21 }
  0x15   : > { %1155 = dma.hbm_to_vmem [thread:$0]  (!%p1580_p5), %s314_s26, 512, %s316_s21, [#allocation3], %s1477_s15, %s1477_s15, %s1478_s16  }
  0x16   : > { %s347_s27 = sshll.u32 %s1481_s25, 4  ;;  %s371_s23 = sshll.u32 %s1708_s7, 4  ;;  %s348_s27 = int_to_ptr.vmem [resolvable:$true] %s347_s27  ;;  %s372_s23 = int_to_ptr.hbm [resolvable:$true] %s371_s23 }
  0x17   : > { %1161 = dma.hbm_to_vmem [thread:$0]  (!%p1580_p5), %s346_s13, 16, %s348_s27, [#allocation5]  }
  0x18   : > { %s395_s24 = sshll.u32 %s1711_s10, 4  ;;  %s1482_s4 = smov [#allocation9]   ;;  %s396_s24 = int_to_ptr.hbm [resolvable:$true] %s395_s24 }
  0x19   : > { %s373_s29 = sshll.u32 %s1482_s4, 4  ;;  %s1483_s15 = smov [#allocation12]   ;;  %s374_s29 = int_to_ptr.vmem [resolvable:$true] %s373_s29 }
  0x1a   : > { %1167 = dma.hbm_to_vmem [thread:$0]  (!%p1580_p5), %s372_s23, 16, %s374_s29, [#allocation8]  }
  0x1b   : > { %s397_s16 = sshll.u32 %s1483_s15, 4  ;;  %431 = sbr.rel (%p1569_p3) target bundleno = 1629 (0x65d), region = 64  ;;  %s398_s16 = int_to_ptr.vmem [resolvable:$true] %s397_s16 }
  0x1c   : > { %1173 = dma.hbm_to_vmem [thread:$0]  (!%p1580_p5), %s396_s24, 16, %s398_s16, [#allocation11]  }
  0x20   : > { %1456 = dma.done.wait (%p1174_p2), [#allocation3], 512  }
  0x21   : > { %1458 = vsyncadd (%p1174_p2), [#allocation3], 4294966784 }
  0x22   : > { %1460 = dma.done.wait (%p1174_p2), [#allocation5], 528  }
  0x23   : > { %1462 = vsyncadd (%p1174_p2), [#allocation5], 4294966768 }
  0x24   : > { %1464 = dma.done.wait (%p1174_p2), [#allocation8], 528  }
  0x25   : > { %1466 = vsyncadd (%p1174_p2), [#allocation8], 4294966768 }
  0x26   : > { %1468 = dma.done.wait (%p1174_p2), [#allocation11], 32  }
  0x27   : > { %1470 = vsyncadd (%p1174_p2), [#allocation11], 4294967264  ;;  %p508_p6 = scmp.lt.s32.totalorder %s1561_s18, 1  ;;  %v529_v0 = vld [vmem:[#allocation2 + $0x18] sm:$0xff]  ;;  %v528_v2 = vld [vmem:[#allocation2 + $0x10] sm:$0xff]  ;;  %vm534_vm0 = vcmask 261120  }
  0x28   : > { %v561_v1 = vld [vmem:[#allocation4 + $0x18] sm:$0xff]  ;;  %550 = vmatpush.msra.mxu0 %v529_v0  ;;  %v560_v3 = vld [vmem:[#allocation4 + $0x10] sm:$0xff]  ;;  %v527_v4 = vld [vmem:[#allocation2 + $0x8] sm:$0xff]  ;;  %vm590_vm1 = vcmask 64512   ;;  %s1484_s30 = smov 96   ;;  %s1485_s19 = smov 120  }
  0x29   : > { %s1718_s18 = smov (!%p508_p6, %s1561_s18), 1  ;;  %581 = vmatpush.msra.mxu1 %v561_v1  ;;  %v559_v5 = vld [vmem:[#allocation4 + $0x8] sm:$0xff]  ;;  %v526_v6 = vld [vmem:[#allocation2] sm:$0xff]  ;;  %s1486_s23 = smov 104   ;;  %vm862_vm2 = vcmask 130048   ;;  %vm864_vm3 = vcmask 195584  }
  0x2a   : > { %s1633_s22 = sshll.u32 %s1718_s18, 3  ;;  %551 = vmatpush.msra.mxu0 %v528_v2  ;;  %v558_v7 = vld [vmem:[#allocation4] sm:$0xff]  ;;  %s1487_s14 = smov 112  }
  0x2b   : > { %s511_s12 = scalar_lea.vmem %s1701_s0, %s1633_s22  ;;  %s515_s25 = scalar_lea.vmem %s1702_s1, %s1633_s22  ;;  %582 = vmatpush.msra.mxu1 %v560_v3  ;;  %v1216_v10 = vld [vmem:[%s1704_s3] ss:$0 sm:$0xff] }
  0x2c   : > { %552 = vmatpush.msra.mxu0 %v527_v4  ;;  %v1643_v8 = vld [vmem:[%s511_s12] sm:$0xff]  ;;  %s519_s4 = scalar_lea.vmem %s1709_s8, %s1633_s22  ;;  %s1488_s29 = smov 72  }
  0x2d   : > { %583 = vmatpush.msra.mxu1 %v559_v5  ;;  %v525_v9 = vld [vmem:[%s515_s25] sm:$0xff]  ;;  %s1489_s15 = smov 88   ;;  %s1490_s16 = smov 80  }
  0x2e   : > { %553 = vmatpush.msra.mxu0 %v526_v6  ;;  %v1217_v11 = vld [vmem:[#allocation6] ss:$0 sm:$0xff]  ;;  %s1491_s28 = smov 8   ;;  %s1492_s26 = smov 24  }
  0x2f   : > { %584 = vmatpush.msra.mxu1 %v558_v7  ;;  %1107 = vmatmul.msk.f32.vlgmr.msra.gmra.mxu0 %vm534_vm0, %v1643_v8  ;;  %v589_v21 = vld [vmem:[%s519_s4] sm:$0xff]  ;;  %s1493_s12 = smov 16   ;;  %s523_s25 = scalar_lea.vmem %s1712_s11, %s1633_s22 }
  0x30   : > { %1108 = vmatmul.msk.f32.vlgmr.msra.gmra.mxu1 %vm534_vm0, %v525_v9 }
  0xac   : > { %v555_v12 = vpop.f32.mrf.mxu0 }
  0xad   : > { %v586_v13 = vpop.f32.mrf.mxu1  ;;  %v556_v14 = vadd.f32 %v1216_v10, %v555_v12  ;;  %v869_v12 = vld [vmem:[#allocation7 + $0x18] sm:$0xff] }
  0xae   : > { %v1651_v15 = vadd.f32 %v1217_v11, %v586_v13  ;;  %v868_v13 = vld [vmem:[#allocation7 + $0x10] sm:$0xff] }
  0xaf   : > { %654 = vrot.lane.b32.xlu2 %v556_v14, %s1485_s19 }
  0xb0   : > { %628 = vrot.lane.b32.xlu1 %v1651_v15, %s1484_s30  ;;  %1109 = vmatpush.xpose.msk.msra.mxu2 %vm590_vm1, %v1651_v15 }
  0xb3   : > { %1110 = vmatmul.msk.f32.vlgmr.msra.gmra.mxu2 %vm590_vm1, %v556_v14 }
  0xb7   : > { %786 = vrot.lane.b32.xlu2 %v1651_v15, %s1486_s23 }
  0xb8   : > { %656 = vrot.lane.b32.xlu1 %v1651_v15, %s1485_s19 }
  0xbf   : > { %719 = vrot.lane.b32.xlu2 %v556_v14, %s1487_s14 }
  0xc0   : > { %721 = vrot.lane.b32.xlu1 %v1651_v15, %s1487_s14 }
 0x109   : > { %v655_v16 = vpop.permute.xlu2 %654 }
 0x111   : > { %v787_v19 = vpop.permute.xlu2 %786 }
 0x119   : > { %v720_v22 = vpop.permute.xlu2 %719 }
 0x122   : > { %v629_v17 = vpop.permute.xlu1 %628 }
 0x123   : > { %649 = vmatpush.msra.mxu3 %v629_v17 }
 0x12a   : > { %v657_v18 = vpop.permute.xlu1 %656 }
 0x12b   : > { %1112 = vmatpush.xpose.msk.msrb.mxu3 %vm590_vm1, %v657_v18 }
 0x132   : > { %v722_v20 = vpop.permute.xlu1 %721 }
 0x133   : > { %1115 = vmatpush.xpose.msk.msrb.mxu0 %vm590_vm1, %v722_v20 }
 0x136   : > { %v614_v23 = vpop.f32.mrf.mxu2  ;;  %1116 = vmatmul.msk.f32.vlgmr.msrb.gmra.mxu0 %vm590_vm1, %v720_v22  ;;  %v1218_v22 = vld [vmem:[#allocation9] ss:$0 sm:$0xff] }
 0x137   : > { %v615_v24 = vadd.f32 %v614_v23, %v589_v21  ;;  %889 = vmatpush.msra.mxu0 %v869_v12 }
 0x139   : > { %v617_v25 = vsel %vm590_vm1, %v615_v24, -inf  ;;  %890 = vmatpush.msra.mxu0 %v868_v13 }
 0x13a   : > { %618 = vmax.xlane.f32.xlu0 %v617_v25 }
 0x1ad   : > { %v619_v26 = vpop.xlane.xlu0 %618 }
 0x1ae   : > { %v620_v27 = vsub.f32 %v615_v24, %v619_v26 }
 0x1b0   : > { %v621_v28 = vmul.f32 1.442695, %v620_v27  ;;  %v1494_v27 = vmov 32.0  }
 0x1b2   : > { %1221 = vpow2.f32 %v621_v28 }
 0x1b3   : > { %v744_v31 = vpop.f32.mrf.mxu0 }
 0x1b4   : > { %v745_v32 = vadd.f32 %v744_v31, %v589_v21 }
 0x1b6   : > { %v747_v33 = vsel %vm590_vm1, %v745_v32, -inf }
 0x1b8   : > { %v1222_v29 = vpop.eup %1221 }
 0x1b9   : > { %v623_v30 = vsel %vm590_vm1, %v1222_v29, 0.0 }
 0x1ba   : > { %624 = vadd.xlane.f32.xlu0 %v623_v30 }
 0x1ce   : > { %784 = vrot.lane.b32.xlu0 %v556_v14, %s1486_s23  ;;  %v867_v14 = vld [vmem:[#allocation7 + $0x8] sm:$0xff] }
 0x1cf   : > { %891 = vmatpush.msra.mxu0 %v867_v14 }
 0x1f8   : > { %748 = vmax.xlane.f32.xlu0 %v747_v33 }
 0x20c   : > { %823 = vrot.lane.b32.xlu0 %v1651_v15, %s1488_s29 }
 0x22d   : > { %v625_v34 = vpop.xlane.xlu0 %624 }
 0x22e   : > { %1223 = vrcp.f32 %v625_v34 }
 0x234   : > { %v1224_v35 = vpop.eup %1223 }
 0x235   : > { %v627_v36 = vmul.f32 %v1224_v35, %v1222_v29 }
 0x237   : > { %1111 = vmatmul.msk.f32.vlgmr.msra.gmra.mxu3 %vm590_vm1, %v627_v36 }
 0x238   : > { %1118 = vmatpush.xpose.msk.msra.mxu3 %vm590_vm1, %v787_v19 }
 0x23f   : > { %1113 = vmatmul.msk.f32.vlgmr.msrb.gmra.mxu3 %vm590_vm1, %v655_v16 }
 0x240   : > { %v785_v37 = vpop.permute.xlu0 %784 }
 0x247   : > { %1119 = vmatmul.msk.f32.vlgmr.msra.gmra.mxu3 %vm590_vm1, %v785_v37 }
 0x26b   : > { %v749_v38 = vpop.xlane.xlu0 %748 }
 0x26c   : > { %v750_v40 = vsub.f32 %v745_v32, %v749_v38 }
 0x26e   : > { %v751_v41 = vmul.f32 1.442695, %v750_v40 }
 0x270   : > { %1225 = vpow2.f32 %v751_v41 }
 0x276   : > { %v1226_v45 = vpop.eup %1225 }
 0x277   : > { %v753_v49 = vsel %vm590_vm1, %v1226_v45, 0.0 }
 0x27e   : > { %v824_v2 = vpop.permute.xlu0 %823 }
 0x2ba   : > { %v1675_v39 = vpop.f32.mrf.mxu3 }
 0x2c2   : > { %v679_v42 = vpop.f32.mrf.mxu3 }
 0x2c3   : > { %v680_v43 = vadd.f32 %v679_v42, %v589_v21 }
 0x2c5   : > { %v682_v44 = vsel %vm590_vm1, %v680_v43, -inf }
 0x2c6   : > { %683 = vmax.xlane.f32.xlu1 %v682_v44 }
 0x2ca   : > { %v809_v46 = vpop.f32.mrf.mxu3 }
 0x2cb   : > { %v810_v47 = vadd.f32 %v809_v46, %v589_v21 }
 0x2cd   : > { %v812_v48 = vsel %vm590_vm1, %v810_v47, -inf }
 0x2ce   : > { %813 = vmax.xlane.f32.xlu2 %v812_v48  ;;  %754 = vadd.xlane.f32.xlu1 %v753_v49  ;;  %v1220_v49 = vld [vmem:[#allocation12] ss:$0 sm:$0xff] }
 0x339   : > { %v684_v50 = vpop.xlane.xlu1 %683 }
 0x33a   : > { %v685_v51 = vsub.f32 %v680_v43, %v684_v50 }
 0x33c   : > { %v686_v52 = vmul.f32 1.442695, %v685_v51 }
 0x33e   : > { %1227 = vpow2.f32 %v686_v52 }
 0x341   : > { %v814_v53 = vpop.xlane.xlu2 %813  ;;  %v755_v60 = vpop.xlane.xlu1 %754 }
 0x342   : > { %v815_v54 = vsub.f32 %v810_v47, %v814_v53  ;;  %v1219_v47 = vld [vmem:[#allocation10] ss:$0 sm:$0xff] }
 0x344   : > { %v1228_v55 = vpop.eup %1227  ;;  %v816_v56 = vmul.f32 1.442695, %v815_v54 }
 0x345   : > { %v688_v57 = vsel %vm590_vm1, %v1228_v55, 0.0 }
 0x346   : > { %1229 = vpow2.f32 %v816_v56  ;;  %689 = vadd.xlane.f32.xlu2 %v688_v57 }
 0x34c   : > { %v1230_v58 = vpop.eup %1229 }
 0x34d   : > { %v818_v59 = vsel %vm590_vm1, %v1230_v58, 0.0 }
 0x34e   : > { %819 = vadd.xlane.f32.xlu1 %v818_v59 }
 0x35e   : > { %693 = vrot.lane.b32.xlu2 %v1651_v15, %s1489_s15 }
 0x367   : > { %758 = vrot.lane.b32.xlu1 %v1651_v15, %s1490_s16  ;;  %v866_v15 = vld [vmem:[#allocation7] sm:$0xff] }
 0x368   : > { %892 = vmatpush.msra.mxu0 %v866_v15 }
 0x3b9   : > { %v690_v61 = vpop.xlane.xlu2 %689 }
 0x3ba   : > { %1231 = vrcp.f32 %v690_v61 }
 0x3c0   : > { %v1232_v62 = vpop.eup %1231 }
 0x3c1   : > { %v694_v63 = vpop.permute.xlu2 %693  ;;  %v820_v0 = vpop.xlane.xlu1 %819  ;;  %v692_v1 = vmul.f32 %v1232_v62, %v1228_v55 }
 0x3c2   : > { %1233 = vrcp.f32 %v820_v0  ;;  %714 = vmatpush.msrb.mxu2 %v694_v63 }
 0x3c3   : > { %1114 = vmatmul.msk.f32.vlgmr.msrb.gmra.mxu2 %vm590_vm1, %v692_v1  ;;  %1235 = vrcp.f32 %v755_v60 }
 0x3c4   : > { %844 = vmatpush.msra.mxu2 %v824_v2  ;;  %1237 = vrcp.f32 %v1494_v27 }
 0x3c8   : > { %v1234_v3 = vpop.eup %1233 }
 0x3c9   : > { %v822_v4 = vmul.f32 %v1234_v3, %v1230_v58  ;;  %v1236_v5 = vpop.eup %1235 }
 0x3ca   : > { %v757_v7 = vmul.f32 %v1236_v5, %v1226_v45  ;;  %v1238_v28 = vpop.eup %1237 }
 0x3cb   : > { %1120 = vmatmul.msk.f32.vlgmr.msra.gmra.mxu2 %vm590_vm1, %v822_v4  ;;  %v902_v29 = vmul.f32 32.0, %v1238_v28  ;;  %vm906_vm4 = vweird.f32 %v1238_v28 }
 0x3cd   : > { %v903_v30 = vsub.f32 1.0, %v902_v29 }
 0x3cf   : > { %v904_v31 = vmul.f32 %v1238_v28, %v903_v30 }
 0x3d1   : > { %v905_v32 = vadd.f32 %v1238_v28, %v904_v31 }
 0x3d3   : > { %v907_v33 = vsel %vm906_vm4, %v1238_v28, %v905_v32 }
 0x3d9   : > { %v759_v6 = vpop.permute.xlu1 %758 }
 0x3da   : > { %779 = vmatpush.msrb.mxu1 %v759_v6 }
 0x3db   : > { %1117 = vmatmul.msk.f32.vlgmr.msrb.gmra.mxu1 %vm590_vm1, %v757_v7 }
 0x446   : > { %v716_v9 = vpop.f32.mrf.mxu2 }
 0x447   : > { %850 = vrot.lane.b32.xlu2 %v716_v9, %s1491_s28 }
 0x44e   : > { %v846_v10 = vpop.f32.mrf.mxu2 }
 0x44f   : > { %858 = vrot.lane.b32.xlu2 %v846_v10, %s1492_s26 }
 0x458   : > { %v781_v11 = vpop.f32.mrf.mxu1 }
 0x459   : > { %854 = vrot.lane.b32.xlu0 %v781_v11, %s1493_s12 }
 0x4a1   : > { %v851_v16 = vpop.permute.xlu2 %850 }
 0x4a2   : > { %v861_v17 = vsel %vm590_vm1, %v1675_v39, %v851_v16 }
 0x4a9   : > { %v859_v19 = vpop.permute.xlu2 %858 }
 0x4cb   : > { %v855_v18 = vpop.permute.xlu0 %854 }
 0x4cc   : > { %v863_v20 = vsel %vm862_vm2, %v861_v17, %v855_v18 }
 0x4cd   : > { %v865_v21 = vsel %vm864_vm3, %v863_v20, %v859_v19 }
 0x4ce   : > { %1121 = vmatmul.msk.f32.vlgmr.msra.gmra.mxu0 %vm534_vm0, %v865_v21 }
 0x54b   : > { %v894_v23 = vpop.f32.mrf.mxu0 }
 0x54c   : > { %v895_v24 = vadd.f32 %v1218_v22, %v894_v23 }
 0x54e   : > { %v897_v25 = vadd.f32 %v895_v24, %v1643_v8 }
 0x550   : > { %v898_v26 = vsel %vm534_vm0, %v897_v25, 0.0 }
 0x551   : > { %899 = vadd.xlane.f32.xlu0 %v898_v26 }
 0x5c4   : > { %v900_v34 = vpop.xlane.xlu0 %899 }
 0x5c5   : > { %v908_v35 = vmul.f32 %v907_v33, %v900_v34 }
 0x5c7   : > { %v909_v36 = vsub.f32 %v897_v25, %v908_v35 }
 0x5c9   : > { %v910_v37 = vmul.f32 %v909_v36, %v909_v36 }
 0x5cb   : > { %v911_v38 = vsel %vm534_vm0, %v910_v37, 0.0 }
 0x5cc   : > { %912 = vadd.xlane.f32.xlu1 %v911_v38 }
 0x63f   : > { %v913_v8 = vpop.xlane.xlu1 %912 }
 0x640   : > { %v914_v39 = vmul.f32 %v913_v8, %v907_v33 }
 0x642   : > { %v915_v40 = vadd.f32 1e-05, %v914_v39 }
 0x644   : > { %1239 = vrsqrt.f32 %v915_v40  ;;  %vm922_vm6 = vweird.f32 %v915_v40 }
 0x64a   : > { %v1240_v41 = vpop.eup %1239 }
 0x64b   : > { %v917_v42 = vmul.f32 %v1240_v41, %v915_v40  ;;  %vm923_vm5 = vweird.f32 %v1240_v41 }
 0x64c   : > { %vm924_vm7 = vmor %vm922_vm6, %vm923_vm5 }
 0x64d   : > { %v918_v43 = vmul.f32 %v1240_v41, %v917_v42 }
 0x64f   : > { %v919_v44 = vmul.f32 0.5, %v918_v43 }
 0x651   : > { %v920_v45 = vsub.f32 1.5, %v919_v44 }
 0x653   : > { %v921_v46 = vmul.f32 %v1240_v41, %v920_v45 }
 0x655   : > { %v925_v48 = vsel %vm924_vm7, %v1240_v41, %v921_v46 }
 0x656   : > { %v926_v50 = vmul.f32 %v925_v48, %v909_v36 }
 0x658   : > { %v931_v51 = vmul.f32 %v1219_v47, %v926_v50 }
 0x65a   : > { %v936_v52 = vadd.f32 %v1220_v49, %v931_v51 }
 0x65c   : > { %937 = vst.msk [vmem:[%s523_s25] sm:$0xff] %vm534_vm0, %v936_v52 }
 0x65d PF: > { %s25_s17 = sadd.s32 1, %s1473_s17  }
 0x65e   : > { %p22_p7 = scmp.ge.s32.totalorder %s25_s17, 4  }
 0x660   :  { %24 = sbr.rel (!%p22_p7) target bundleno = 6 (0x6), region = 129 }
 0x665   :  { %957 = vsyncpa [#allocation3], 1 }
 0x666   :  { %959 = vsyncpa [#allocation3 + $0x1], 1 }
 0x667   :  { %960 = vsyncpa [#allocation5], 1 }
 0x668   :  { %961 = vsyncpa [#allocation8], 1 }
 0x669   :  { %962 = vsyncpa [#allocation11], 1 }

// kernel: decoder_forward.7
= control target key start
LH: loop header
LB: loop body
LE: loop exit
PB: predicated region body
PF: predicated region fallthrough
CT: control target
= control target key end

     0   :  { %16 = vsyncpa [#allocation3], 0  ;;  %s1779_s0 = inlined_call_operand.vmem [shape: f32[2,8,32], index: 0, kind: input, shape index: {}, may-alias: {0,1}]   ;;  %s1780_s1 = inlined_call_operand.vmem [shape: f32[2,8,32], index: 1, kind: input, shape index: {}, may-alias: {0,1}]   ;;  %s1781_s2 = inlined_call_operand.hbm [shape: f32[32,32], index: 2, kind: input, shape index: {}]   ;;  %s1782_s3 = inlined_call_operand.hbm [shape: f32[1,32], index: 3, kind: input, shape index: {}]   ;;  %s1783_s4 = inlined_call_operand.hbm [shape: f32[32,64], index: 4, kind: input, shape index: {}]   ;;  %s1784_s5 = inlined_call_operand.hbm [shape: f32[1,64], index: 5, kind: input, shape index: {}]   ;;  %s1785_s6 = inlined_call_operand.hbm [shape: f32[32,32], index: 6, kind: input, shape index: {}]   ;;  %s1786_s7 = inlined_call_operand.hbm [shape: f32[1,32], index: 7, kind: input, shape index: {}]   ;;  %s1787_s8 = inlined_call_operand.vmem [shape: f32[2,8,8], index: 8, kind: input, shape index: {}]   ;;  %s1788_s9 = inlined_call_operand.hbm [shape: f32[1,32], index: 9, kind: input, shape index: {}]   ;;  %s1789_s10 = inlined_call_operand.hbm [shape: f32[1,32], index: 10, kind: input, shape index: {}]   ;;  %s1790_s11 = inlined_call_operand.vmem [shape: f32[2,8,32], index: 11, kind: output, shape index: {}]  }
   0x1   :  { %17 = vsyncpa [#allocation5], 0 }
   0x2   :  { %18 = vsyncpa [#allocation8], 0 }
   0x3   :  { %19 = vsyncpa [#allocation11], 0 }
   0x4   :  { %20 = vsyncpa [#allocation14], 0  ;;  %s1627_s17 = smov 0  }
   0x5 LB: > { %s329_s20 = sshll.u32 %s1782_s3, 4  ;;  %s1636_s21 = sadd.s32 4294967295, %s1544_s17   ;;  %s1544_s17 = sphi %s1627_s17, %s26_s17   ;;  %s330_s20 = int_to_ptr.hbm [resolvable:$true] %s329_s20 }
   0x6   : > { %p1111_p0 = scmp.ge.s32.totalorder %s1544_s17, 1  ;;  %p303_p1 = scmp.lt.s32.totalorder %s1544_s17, 3 }
   0x7   : > { %p1208_p2 = scmp.eq.s32.totalorder %s1636_s21, 0  ;;  %s1546_s23 = smov [#allocation4]  }
   0x8   : > { %p1641_p3 = pnand %p1111_p0, %p303_p1  ;;  %s331_s24 = sshll.u32 %s1546_s23, 4  ;;  %s332_s24 = int_to_ptr.vmem [resolvable:$true] %s331_s24 }
   0x9   : > { %s355_s27 = sshll.u32 %s1784_s5, 4  ;;  %s381_s30 = sshll.u32 %s1786_s7, 4  ;;  %s356_s27 = int_to_ptr.hbm [resolvable:$true] %s355_s27  ;;  %s382_s30 = int_to_ptr.hbm [resolvable:$true] %s381_s30 }
   0xa   : > { %p1183_p4 = pneg %p1641_p3  ;;  %s1547_s13 = smov [#allocation7]  }
   0xb   : > { %s357_s14 = sshll.u32 %s1547_s13, 4  ;;  %s1548_s15 = smov [#allocation10]   ;;  %s358_s14 = int_to_ptr.vmem [resolvable:$true] %s357_s14 }
   0xc   : > { %p1655_p5 = pnand %p1208_p2, %p1183_p4  ;;  %s383_s16 = sshll.u32 %s1548_s15, 4  ;;  %s384_s16 = int_to_ptr.vmem [resolvable:$true] %s383_s16 }
   0xd   : > { %s314_s23 = sshll.u32 %s1781_s2, 4  ;;  %s1549_s25 = smov [#allocation2]   ;;  %s315_s23 = int_to_ptr.hbm [resolvable:$true] %s314_s23 }
   0xe   : > { %1189 = dma.hbm_to_vmem [thread:$0]  (!%p1655_p5), %s330_s20, 16, %s332_s24, [#allocation5]  }
   0xf   : > { %1195 = dma.hbm_to_vmem [thread:$0]  (!%p1655_p5), %s356_s27, 16, %s358_s14, [#allocation8]  }
  0x10   : > { %1201 = dma.hbm_to_vmem [thread:$0]  (!%p1655_p5), %s382_s30, 16, %s384_s16, [#allocation11]  }
  0x11   : > { %s316_s26 = sshll.u32 %s1549_s25, 4  ;;  %s340_s20 = sshll.u32 %s1783_s4, 4  ;;  %s317_s26 = int_to_ptr.vmem [resolvable:$true] %s316_s26  ;;  %s341_s20 = int_to_ptr.hbm [resolvable:$true] %s340_s20 }
  0x12   : > { %s1550_s24 = smov 128   ;;  %s1551_s27 = smov 8  }
  0x13   : > { %1186 = dma.hbm_to_vmem [thread:$0]  (!%p1655_p5), %s315_s23, 512, %s317_s26, [#allocation3], %s1550_s24, %s1550_s24, %s1551_s27  }
  0x14   : > { %s1552_s13 = smov [#allocation6]   ;;  %s366_s30 = sshll.u32 %s1785_s6, 4  ;;  %s367_s30 = int_to_ptr.hbm [resolvable:$true] %s366_s30 }
  0x15   : > { %s342_s14 = sshll.u32 %s1552_s13, 4  ;;  %s393_s25 = sshll.u32 %s1788_s9, 4  ;;  %s343_s14 = int_to_ptr.vmem [resolvable:$true] %s342_s14  ;;  %s394_s25 = int_to_ptr.hbm [resolvable:$true] %s393_s25 }
  0x16   : > { %1192 = dma.hbm_to_vmem [thread:$0]  (!%p1655_p5), %s341_s20, 512, %s343_s14, [#allocation5], %s1550_s24, %s1550_s24, %s1551_s27  }
  0x17   : > { %s1553_s28 = smov [#allocation9]   ;;  %s1554_s23 = smov [#allocation12]  }
  0x18   : > { %s368_s29 = sshll.u32 %s1553_s28, 4  ;;  %s395_s26 = sshll.u32 %s1554_s23, 4  ;;  %s369_s29 = int_to_ptr.vmem [resolvable:$true] %s368_s29  ;;  %s396_s26 = int_to_ptr.vmem [resolvable:$true] %s395_s26 }
  0x19   : > { %1198 = dma.hbm_to_vmem [thread:$0]  (!%p1655_p5), %s367_s30, 512, %s369_s29, [#allocation8], %s1550_s24, %s1550_s24, %s1551_s27  }
  0x1a   : > { %s405_s18 = sshll.u32 %s1789_s10, 4  ;;  %s1555_s20 = smov [#allocation13]   ;;  %s406_s18 = int_to_ptr.hbm [resolvable:$true] %s405_s18 }
  0x1b   : > { %1204 = dma.hbm_to_vmem [thread:$0]  (!%p1655_p5), %s394_s25, 16, %s396_s26, [#allocation11]  }
  0x1c   : > { %s407_s14 = sshll.u32 %s1555_s20, 4  ;;  %441 = sbr.rel (%p1641_p3) target bundleno = 1632 (0x660), region = 64  ;;  %s408_s14 = int_to_ptr.vmem [resolvable:$true] %s407_s14 }
  0x1d   : > { %1207 = dma.hbm_to_vmem [thread:$0]  (!%p1655_p5), %s406_s18, 16, %s408_s14, [#allocation14]  }
  0x21   : > { %1523 = dma.done.wait (%p1208_p2), [#allocation3], 512  }
  0x22   : > { %1525 = vsyncadd (%p1208_p2), [#allocation3], 4294966784 }
  0x23   : > { %1527 = dma.done.wait (%p1208_p2), [#allocation5], 528  }
  0x24   : > { %1529 = vsyncadd (%p1208_p2), [#allocation5], 4294966768 }
  0x25   : > { %1531 = dma.done.wait (%p1208_p2), [#allocation8], 528  }
  0x26   : > { %1533 = vsyncadd (%p1208_p2), [#allocation8], 4294966768 }
  0x27   : > { %1535 = dma.done.wait (%p1208_p2), [#allocation11], 32  }
  0x28   : > { %1537 = vsyncadd (%p1208_p2), [#allocation11], 4294967264 }
  0x29   : > { %1539 = dma.done.wait (%p1208_p2), [#allocation14], 16  }
  0x2a   : > { %1541 = vsyncadd (%p1208_p2), [#allocation14], 4294967280  ;;  %p523_p6 = scmp.lt.s32.totalorder %s1636_s21, 1  ;;  %v544_v0 = vld [vmem:[#allocation2 + $0x18] sm:$0xff]  ;;  %v543_v2 = vld [vmem:[#allocation2 + $0x10] sm:$0xff]  ;;  %vm549_vm0 = vcmask 261120  }
  0x2b   : > { %v576_v1 = vld [vmem:[#allocation6 + $0x18] sm:$0xff]  ;;  %565 = vmatpush.msra.mxu0 %v544_v0  ;;  %v575_v3 = vld [vmem:[#allocation6 + $0x10] sm:$0xff]  ;;  %v542_v4 = vld [vmem:[#allocation2 + $0x8] sm:$0xff]  ;;  %vm605_vm1 = vcmask 64512   ;;  %s1557_s25 = smov 120   ;;  %s1558_s28 = smov 104  }
  0x2c   : > { %s1794_s21 = smov (!%p523_p6, %s1636_s21), 1  ;;  %596 = vmatpush.msra.mxu1 %v576_v1  ;;  %v574_v5 = vld [vmem:[#allocation6 + $0x8] sm:$0xff]  ;;  %v541_v6 = vld [vmem:[#allocation2] sm:$0xff]  ;;  %s1559_s29 = smov 112   ;;  %vm877_vm2 = vcmask 130048   ;;  %vm879_vm3 = vcmask 195584  }
  0x2d   : > { %s1714_s22 = sshll.u32 %s1794_s21, 3  ;;  %566 = vmatpush.msra.mxu0 %v543_v2  ;;  %v573_v7 = vld [vmem:[#allocation6] sm:$0xff]  ;;  %v1253_v10 = vld [vmem:[#allocation4] ss:$0 sm:$0xff]  ;;  %s1556_s21 = smov 96  }
  0x2e   : > { %s526_s27 = scalar_lea.vmem %s1779_s0, %s1714_s22  ;;  %s530_s19 = scalar_lea.vmem %s1780_s1, %s1714_s22  ;;  %597 = vmatpush.msra.mxu1 %v575_v3  ;;  %v1254_v11 = vld [vmem:[#allocation7] ss:$0 sm:$0xff] }
  0x2f   : > { %567 = vmatpush.msra.mxu0 %v542_v4  ;;  %v1724_v8 = vld [vmem:[%s526_s27] sm:$0xff]  ;;  %s534_s13 = scalar_lea.vmem %s1787_s8, %s1714_s22  ;;  %s1560_s15 = smov 72  }
  0x30   : > { %598 = vmatpush.msra.mxu1 %v574_v5  ;;  %v540_v9 = vld [vmem:[%s530_s19] sm:$0xff]  ;;  %s1561_s18 = smov 88   ;;  %s1562_s20 = smov 80  }
  0x31   : > { %568 = vmatpush.msra.mxu0 %v541_v6  ;;  %v604_v21 = vld [vmem:[%s534_s13] sm:$0xff]  ;;  %s1563_s14 = smov 8   ;;  %s1564_s12 = smov 24  }
  0x32   : > { %599 = vmatpush.msra.mxu1 %v573_v7  ;;  %1134 = vmatmul.msk.f32.vlgmr.msra.gmra.mxu0 %vm549_vm0, %v1724_v8  ;;  %s1565_s24 = smov 16   ;;  %s538_s16 = scalar_lea.vmem %s1790_s11, %s1714_s22 }
  0x33   : > { %1135 = vmatmul.msk.f32.vlgmr.msra.gmra.mxu1 %vm549_vm0, %v540_v9 }
  0xaf   : > { %v570_v12 = vpop.f32.mrf.mxu0 }
  0xb0   : > { %v601_v13 = vpop.f32.mrf.mxu1  ;;  %v571_v14 = vadd.f32 %v1253_v10, %v570_v12  ;;  %v884_v12 = vld [vmem:[#allocation9 + $0x18] sm:$0xff] }
  0xb1   : > { %v1729_v15 = vadd.f32 %v1254_v11, %v601_v13  ;;  %v883_v13 = vld [vmem:[#allocation9 + $0x10] sm:$0xff] }
  0xb2   : > { %669 = vrot.lane.b32.xlu2 %v571_v14, %s1557_s25 }
  0xb3   : > { %643 = vrot.lane.b32.xlu1 %v1729_v15, %s1556_s21  ;;  %1136 = vmatpush.xpose.msk.msra.mxu2 %vm605_vm1, %v1729_v15 }
  0xb6   : > { %1137 = vmatmul.msk.f32.vlgmr.msra.gmra.mxu2 %vm605_vm1, %v571_v14 }
  0xba   : > { %801 = vrot.lane.b32.xlu2 %v1729_v15, %s1558_s28 }
  0xbb   : > { %671 = vrot.lane.b32.xlu1 %v1729_v15, %s1557_s25 }
  0xc2   : > { %734 = vrot.lane.b32.xlu2 %v571_v14, %s1559_s29 }
  0xc3   : > { %736 = vrot.lane.b32.xlu1 %v1729_v15, %s1559_s29 }
 0x10c   : > { %v670_v16 = vpop.permute.xlu2 %669 }
 0x114   : > { %v802_v19 = vpop.permute.xlu2 %801 }
 0x11c   : > { %v735_v22 = vpop.permute.xlu2 %734 }
 0x125   : > { %v644_v17 = vpop.permute.xlu1 %643 }
 0x126   : > { %664 = vmatpush.msra.mxu3 %v644_v17 }
 0x12d   : > { %v672_v18 = vpop.permute.xlu1 %671 }
 0x12e   : > { %1139 = vmatpush.xpose.msk.msrb.mxu3 %vm605_vm1, %v672_v18 }
 0x135   : > { %v737_v20 = vpop.permute.xlu1 %736 }
 0x136   : > { %1142 = vmatpush.xpose.msk.msrb.mxu0 %vm605_vm1, %v737_v20 }
 0x139   : > { %v629_v23 = vpop.f32.mrf.mxu2  ;;  %1143 = vmatmul.msk.f32.vlgmr.msrb.gmra.mxu0 %vm605_vm1, %v735_v22  ;;  %v1255_v22 = vld [vmem:[#allocation10] ss:$0 sm:$0xff] }
 0x13a   : > { %v630_v24 = vadd.f32 %v629_v23, %v604_v21  ;;  %904 = vmatpush.msra.mxu0 %v884_v12 }
 0x13c   : > { %v632_v25 = vsel %vm605_vm1, %v630_v24, -inf  ;;  %905 = vmatpush.msra.mxu0 %v883_v13 }
 0x13d   : > { %633 = vmax.xlane.f32.xlu0 %v632_v25 }
 0x1b0   : > { %v634_v26 = vpop.xlane.xlu0 %633 }
 0x1b1   : > { %v635_v27 = vsub.f32 %v630_v24, %v634_v26 }
 0x1b3   : > { %v636_v28 = vmul.f32 1.442695, %v635_v27  ;;  %v1566_v27 = vmov 32.0  }
 0x1b5   : > { %1258 = vpow2.f32 %v636_v28 }
 0x1b6   : > { %v759_v31 = vpop.f32.mrf.mxu0 }
 0x1b7   : > { %v760_v32 = vadd.f32 %v759_v31, %v604_v21 }
 0x1b9   : > { %v762_v33 = vsel %vm605_vm1, %v760_v32, -inf }
 0x1bb   : > { %v1259_v29 = vpop.eup %1258 }
 0x1bc   : > { %v638_v30 = vsel %vm605_vm1, %v1259_v29, 0.0 }
 0x1bd   : > { %639 = vadd.xlane.f32.xlu0 %v638_v30 }
 0x1d1   : > { %799 = vrot.lane.b32.xlu0 %v571_v14, %s1558_s28  ;;  %v882_v14 = vld [vmem:[#allocation9 + $0x8] sm:$0xff] }
 0x1d2   : > { %906 = vmatpush.msra.mxu0 %v882_v14 }
 0x1fb   : > { %763 = vmax.xlane.f32.xlu0 %v762_v33 }
 0x20f   : > { %838 = vrot.lane.b32.xlu0 %v1729_v15, %s1560_s15 }
 0x230   : > { %v640_v34 = vpop.xlane.xlu0 %639 }
 0x231   : > { %1260 = vrcp.f32 %v640_v34 }
 0x237   : > { %v1261_v35 = vpop.eup %1260 }
 0x238   : > { %v642_v36 = vmul.f32 %v1261_v35, %v1259_v29 }
 0x23a   : > { %1138 = vmatmul.msk.f32.vlgmr.msra.gmra.mxu3 %vm605_vm1, %v642_v36 }
 0x23b   : > { %1145 = vmatpush.xpose.msk.msra.mxu3 %vm605_vm1, %v802_v19 }
 0x242   : > { %1140 = vmatmul.msk.f32.vlgmr.msrb.gmra.mxu3 %vm605_vm1, %v670_v16 }
 0x243   : > { %v800_v37 = vpop.permute.xlu0 %799 }
 0x24a   : > { %1146 = vmatmul.msk.f32.vlgmr.msra.gmra.mxu3 %vm605_vm1, %v800_v37 }
 0x26e   : > { %v764_v38 = vpop.xlane.xlu0 %763 }
 0x26f   : > { %v765_v40 = vsub.f32 %v760_v32, %v764_v38 }
 0x271   : > { %v766_v41 = vmul.f32 1.442695, %v765_v40 }
 0x273   : > { %1262 = vpow2.f32 %v766_v41 }
 0x279   : > { %v1263_v45 = vpop.eup %1262 }
 0x27a   : > { %v768_v49 = vsel %vm605_vm1, %v1263_v45, 0.0 }
 0x281   : > { %v839_v2 = vpop.permute.xlu0 %838 }
 0x2bd   : > { %v1753_v39 = vpop.f32.mrf.mxu3 }
 0x2c5   : > { %v694_v42 = vpop.f32.mrf.mxu3 }
 0x2c6   : > { %v695_v43 = vadd.f32 %v694_v42, %v604_v21 }
 0x2c8   : > { %v697_v44 = vsel %vm605_vm1, %v695_v43, -inf }
 0x2c9   : > { %698 = vmax.xlane.f32.xlu1 %v697_v44 }
 0x2cd   : > { %v824_v46 = vpop.f32.mrf.mxu3 }
 0x2ce   : > { %v825_v47 = vadd.f32 %v824_v46, %v604_v21 }
 0x2d0   : > { %v827_v48 = vsel %vm605_vm1, %v825_v47, -inf }
 0x2d1   : > { %828 = vmax.xlane.f32.xlu2 %v827_v48  ;;  %769 = vadd.xlane.f32.xlu1 %v768_v49  ;;  %v1257_v49 = vld [vmem:[#allocation13] ss:$0 sm:$0xff] }
 0x33c   : > { %v699_v50 = vpop.xlane.xlu1 %698 }
 0x33d   : > { %v700_v51 = vsub.f32 %v695_v43, %v699_v50 }
 0x33f   : > { %v701_v52 = vmul.f32 1.442695, %v700_v51 }
 0x341   : > { %1264 = vpow2.f32 %v701_v52 }
 0x344   : > { %v829_v53 = vpop.xlane.xlu2 %828  ;;  %v770_v60 = vpop.xlane.xlu1 %769 }
 0x345   : > { %v830_v54 = vsub.f32 %v825_v47, %v829_v53  ;;  %v1256_v47 = vld [vmem:[#allocation12] ss:$0 sm:$0xff] }
 0x347   : > { %v1265_v55 = vpop.eup %1264  ;;  %v831_v56 = vmul.f32 1.442695, %v830_v54 }
 0x348   : > { %v703_v57 = vsel %vm605_vm1, %v1265_v55, 0.0 }
 0x349   : > { %1266 = vpow2.f32 %v831_v56  ;;  %704 = vadd.xlane.f32.xlu2 %v703_v57 }
 0x34f   : > { %v1267_v58 = vpop.eup %1266 }
 0x350   : > { %v833_v59 = vsel %vm605_vm1, %v1267_v58, 0.0 }
 0x351   : > { %834 = vadd.xlane.f32.xlu1 %v833_v59 }
 0x361   : > { %708 = vrot.lane.b32.xlu2 %v1729_v15, %s1561_s18 }
 0x36a   : > { %773 = vrot.lane.b32.xlu1 %v1729_v15, %s1562_s20  ;;  %v881_v15 = vld [vmem:[#allocation9] sm:$0xff] }
 0x36b   : > { %907 = vmatpush.msra.mxu0 %v881_v15 }
 0x3bc   : > { %v705_v61 = vpop.xlane.xlu2 %704 }
 0x3bd   : > { %1268 = vrcp.f32 %v705_v61 }
 0x3c3   : > { %v1269_v62 = vpop.eup %1268 }
 0x3c4   : > { %v709_v63 = vpop.permute.xlu2 %708  ;;  %v835_v0 = vpop.xlane.xlu1 %834  ;;  %v707_v1 = vmul.f32 %v1269_v62, %v1265_v55 }
 0x3c5   : > { %1270 = vrcp.f32 %v835_v0  ;;  %729 = vmatpush.msrb.mxu2 %v709_v63 }
 0x3c6   : > { %1141 = vmatmul.msk.f32.vlgmr.msrb.gmra.mxu2 %vm605_vm1, %v707_v1  ;;  %1272 = vrcp.f32 %v770_v60 }
 0x3c7   : > { %859 = vmatpush.msra.mxu2 %v839_v2  ;;  %1274 = vrcp.f32 %v1566_v27 }
 0x3cb   : > { %v1271_v3 = vpop.eup %1270 }
 0x3cc   : > { %v837_v4 = vmul.f32 %v1271_v3, %v1267_v58  ;;  %v1273_v5 = vpop.eup %1272 }
 0x3cd   : > { %v772_v7 = vmul.f32 %v1273_v5, %v1263_v45  ;;  %v1275_v28 = vpop.eup %1274 }
 0x3ce   : > { %1147 = vmatmul.msk.f32.vlgmr.msra.gmra.mxu2 %vm605_vm1, %v837_v4  ;;  %v917_v29 = vmul.f32 32.0, %v1275_v28  ;;  %vm921_vm4 = vweird.f32 %v1275_v28 }
 0x3d0   : > { %v918_v30 = vsub.f32 1.0, %v917_v29 }
 0x3d2   : > { %v919_v31 = vmul.f32 %v1275_v28, %v918_v30 }
 0x3d4   : > { %v920_v32 = vadd.f32 %v1275_v28, %v919_v31 }
 0x3d6   : > { %v922_v33 = vsel %vm921_vm4, %v1275_v28, %v920_v32 }
 0x3dc   : > { %v774_v6 = vpop.permute.xlu1 %773 }
 0x3dd   : > { %794 = vmatpush.msrb.mxu1 %v774_v6 }
 0x3de   : > { %1144 = vmatmul.msk.f32.vlgmr.msrb.gmra.mxu1 %vm605_vm1, %v772_v7 }
 0x449   : > { %v731_v9 = vpop.f32.mrf.mxu2 }
 0x44a   : > { %865 = vrot.lane.b32.xlu2 %v731_v9, %s1563_s14 }
 0x451   : > { %v861_v10 = vpop.f32.mrf.mxu2 }
 0x452   : > { %873 = vrot.lane.b32.xlu2 %v861_v10, %s1564_s12 }
 0x45b   : > { %v796_v11 = vpop.f32.mrf.mxu1 }
 0x45c   : > { %869 = vrot.lane.b32.xlu0 %v796_v11, %s1565_s24 }
 0x4a4   : > { %v866_v16 = vpop.permute.xlu2 %865 }
 0x4a5   : > { %v876_v17 = vsel %vm605_vm1, %v1753_v39, %v866_v16 }
 0x4ac   : > { %v874_v19 = vpop.permute.xlu2 %873 }
 0x4ce   : > { %v870_v18 = vpop.permute.xlu0 %869 }
 0x4cf   : > { %v878_v20 = vsel %vm877_vm2, %v876_v17, %v870_v18 }
 0x4d0   : > { %v880_v21 = vsel %vm879_vm3, %v878_v20, %v874_v19 }
 0x4d1   : > { %1148 = vmatmul.msk.f32.vlgmr.msra.gmra.mxu0 %vm549_vm0, %v880_v21 }
 0x54e   : > { %v909_v23 = vpop.f32.mrf.mxu0 }
 0x54f   : > { %v910_v24 = vadd.f32 %v1255_v22, %v909_v23 }
 0x551   : > { %v912_v25 = vadd.f32 %v910_v24, %v1724_v8 }
 0x553   : > { %v913_v26 = vsel %vm549_vm0, %v912_v25, 0.0 }
 0x554   : > { %914 = vadd.xlane.f32.xlu0 %v913_v26 }
 0x5c7   : > { %v915_v34 = vpop.xlane.xlu0 %914 }
 0x5c8   : > { %v923_v35 = vmul.f32 %v922_v33, %v915_v34 }
 0x5ca   : > { %v924_v36 = vsub.f32 %v912_v25, %v923_v35 }
 0x5cc   : > { %v925_v37 = vmul.f32 %v924_v36, %v924_v36 }
 0x5ce   : > { %v926_v38 = vsel %vm549_vm0, %v925_v37, 0.0 }
 0x5cf   : > { %927 = vadd.xlane.f32.xlu1 %v926_v38 }
 0x642   : > { %v928_v8 = vpop.xlane.xlu1 %927 }
 0x643   : > { %v929_v39 = vmul.f32 %v928_v8, %v922_v33 }
 0x645   : > { %v930_v40 = vadd.f32 1e-05, %v929_v39 }
 0x647   : > { %1276 = vrsqrt.f32 %v930_v40  ;;  %vm937_vm6 = vweird.f32 %v930_v40 }
 0x64d   : > { %v1277_v41 = vpop.eup %1276 }
 0x64e   : > { %v932_v42 = vmul.f32 %v1277_v41, %v930_v40  ;;  %vm938_vm5 = vweird.f32 %v1277_v41 }
 0x64f   : > { %vm939_vm7 = vmor %vm937_vm6, %vm938_vm5 }
 0x650   : > { %v933_v43 = vmul.f32 %v1277_v41, %v932_v42 }
 0x652   : > { %v934_v44 = vmul.f32 0.5, %v933_v43 }
 0x654   : > { %v935_v45 = vsub.f32 1.5, %v934_v44 }
 0x656   : > { %v936_v46 = vmul.f32 %v1277_v41, %v935_v45 }
 0x658   : > { %v940_v48 = vsel %vm939_vm7, %v1277_v41, %v936_v46 }
 0x659   : > { %v941_v50 = vmul.f32 %v940_v48, %v924_v36 }
 0x65b   : > { %v946_v51 = vmul.f32 %v1256_v47, %v941_v50 }
 0x65d   : > { %v951_v52 = vadd.f32 %v1257_v49, %v946_v51 }
 0x65f   : > { %952 = vst.msk [vmem:[%s538_s16] sm:$0xff] %vm549_vm0, %v951_v52 }
 0x660 PF: > { %s26_s17 = sadd.s32 1, %s1544_s17  }
 0x661   : > { %p23_p7 = scmp.ge.s32.totalorder %s26_s17, 4  }
 0x663   :  { %25 = sbr.rel (!%p23_p7) target bundleno = 5 (0x5), region = 133 }
 0x668   :  { %972 = vsyncpa [#allocation3], 1 }
 0x669   :  { %974 = vsyncpa [#allocation3 + $0x1], 1 }
 0x66a   :  { %975 = vsyncpa [#allocation5], 1 }
 0x66b   :  { %976 = vsyncpa [#allocation8], 1 }
 0x66c   :  { %977 = vsyncpa [#allocation11], 1 }
 0x66d   :  { %978 = vsyncpa [#allocation14], 1 }

// kernel: decoder_forward.10
= control target key start
LH: loop header
LB: loop body
LE: loop exit
PB: predicated region body
PF: predicated region fallthrough
CT: control target
= control target key end

     0   :  { %s1708_s0 = inlined_call_operand.vmem [shape: f32[2,8,32], index: 0, kind: input, shape index: {}, may-alias: {0,1}]   ;;  %s1709_s1 = inlined_call_operand.vmem [shape: f32[2,8,32], index: 1, kind: input, shape index: {}, may-alias: {0,1}]   ;;  %s1710_s2 = inlined_call_operand.vmem [shape: f32[32,32], index: 2, kind: input, shape index: {}]   ;;  %s1711_s3 = inlined_call_operand.hbm [shape: f32[1,32], index: 3, kind: input, shape index: {}]   ;;  %s1712_s4 = inlined_call_operand.hbm [shape: f32[32,64], index: 4, kind: input, shape index: {}]   ;;  %s1713_s5 = inlined_call_operand.hbm [shape: f32[1,64], index: 5, kind: input, shape index: {}]   ;;  %s1714_s6 = inlined_call_operand.hbm [shape: f32[32,32], index: 6, kind: input, shape index: {}]   ;;  %s1715_s7 = inlined_call_operand.hbm [shape: f32[1,32], index: 7, kind: input, shape index: {}]   ;;  %s1716_s8 = inlined_call_operand.vmem [shape: f32[2,8,8], index: 8, kind: input, shape index: {}]   ;;  %s1717_s9 = inlined_call_operand.hbm [shape: f32[1,32], index: 9, kind: input, shape index: {}]   ;;  %s1718_s10 = inlined_call_operand.hbm [shape: f32[1,32], index: 10, kind: input, shape index: {}]   ;;  %s1719_s11 = inlined_call_operand.vmem [shape: f32[2,8,32], index: 11, kind: output, shape index: {}]  }
   0x1   :  { %1720 = sst [smem:[#allocation17_spill]] %s1712_s4 }
   0x2   :  { %16 = vsyncpa [#allocation3], 0 }
   0x3   :  { %17 = vsyncpa [#allocation5], 0 }
   0x4   :  { %18 = vsyncpa [#allocation8], 0 }
   0x5   :  { %19 = vsyncpa [#allocation11], 0  ;;  %s1553_s17 = smov 0  }
   0x6 LB: > { %s1721_s4 = sld [smem:[#allocation17_spill]]  ;;  %s1562_s21 = sadd.s32 4294967295, %s1471_s17   ;;  %s1471_s17 = sphi %s1553_s17, %s25_s17  }
   0x7   : > { %p1084_p0 = scmp.ge.s32.totalorder %s1471_s17, 1  ;;  %p302_p1 = scmp.lt.s32.totalorder %s1471_s17, 3 }
   0x8   : > { %p1172_p2 = scmp.eq.s32.totalorder %s1562_s21, 0  ;;  %s1473_s23 = smov [#allocation4]  }
   0x9   : > { %p1567_p3 = pnand %p1084_p0, %p302_p1  ;;  %s330_s24 = sshll.u32 %s1473_s23, 4  ;;  %s331_s24 = int_to_ptr.vmem [resolvable:$true] %s330_s24 }
   0xa   : > { %s354_s27 = sshll.u32 %s1714_s6, 4  ;;  %s1474_s29 = smov [#allocation7]   ;;  %s355_s27 = int_to_ptr.hbm [resolvable:$true] %s354_s27 }
   0xb   : > { %p1150_p4 = pneg %p1567_p3  ;;  %s356_s30 = sshll.u32 %s1474_s29, 4  ;;  %s357_s30 = int_to_ptr.vmem [resolvable:$true] %s356_s30 }
   0xc   : > { %s328_s20 = sshll.u32 %s1721_s4, 4  ;;  %s381_s14 = sshll.u32 %s1717_s9, 4  ;;  %s329_s20 = int_to_ptr.hbm [resolvable:$true] %s328_s20  ;;  %s382_s14 = int_to_ptr.hbm [resolvable:$true] %s381_s14 }
   0xd   : > { %p1578_p5 = pnand %p1172_p2, %p1150_p4  ;;  %s1475_s15 = smov 128  }
   0xe   : > { %s1476_s16 = smov 8   ;;  %s1477_s18 = smov [#allocation10]  }
   0xf   : > { %1156 = dma.hbm_to_vmem [thread:$0]  (!%p1578_p5), %s329_s20, 512, %s331_s24, [#allocation5], %s1475_s15, %s1475_s15, %s1476_s16  }
  0x10   : > { %1162 = dma.hbm_to_vmem [thread:$0]  (!%p1578_p5), %s355_s27, 512, %s357_s30, [#allocation8], %s1475_s15, %s1475_s15, %s1476_s16  }
  0x11   : > { %s383_s19 = sshll.u32 %s1477_s18, 4  ;;  %s317_s26 = sshll.u32 %s1711_s3, 4  ;;  %s384_s19 = int_to_ptr.vmem [resolvable:$true] %s383_s19  ;;  %s318_s26 = int_to_ptr.hbm [resolvable:$true] %s317_s26 }
  0x12   : > { %1168 = dma.hbm_to_vmem [thread:$0]  (!%p1578_p5), %s382_s14, 16, %s384_s19, [#allocation11]  }
  0x13   : > { %s343_s13 = sshll.u32 %s1713_s5, 4  ;;  %s1478_s4 = smov [#allocation2]   ;;  %s344_s13 = int_to_ptr.hbm [resolvable:$true] %s343_s13 }
  0x14   : > { %s319_s20 = sshll.u32 %s1478_s4, 4  ;;  %s1479_s24 = smov [#allocation6]   ;;  %s320_s20 = int_to_ptr.vmem [resolvable:$true] %s319_s20 }
  0x15   : > { %1153 = dma.hbm_to_vmem [thread:$0]  (!%p1578_p5), %s318_s26, 16, %s320_s20, [#allocation3]  }
  0x16   : > { %s345_s27 = sshll.u32 %s1479_s24, 4  ;;  %s369_s16 = sshll.u32 %s1715_s7, 4  ;;  %s346_s27 = int_to_ptr.vmem [resolvable:$true] %s345_s27  ;;  %s370_s16 = int_to_ptr.hbm [resolvable:$true] %s369_s16 }
  0x17   : > { %1159 = dma.hbm_to_vmem [thread:$0]  (!%p1578_p5), %s344_s13, 16, %s346_s27, [#allocation5]  }
  0x18   : > { %s393_s19 = sshll.u32 %s1718_s10, 4  ;;  %s1480_s4 = smov [#allocation9]   ;;  %s394_s19 = int_to_ptr.hbm [resolvable:$true] %s393_s19 }
  0x19   : > { %s371_s23 = sshll.u32 %s1480_s4, 4  ;;  %s1481_s25 = smov [#allocation12]   ;;  %s372_s23 = int_to_ptr.vmem [resolvable:$true] %s371_s23 }
  0x1a   : > { %1165 = dma.hbm_to_vmem [thread:$0]  (!%p1578_p5), %s370_s16, 16, %s372_s23, [#allocation8]  }
  0x1b   : > { %s395_s26 = sshll.u32 %s1481_s25, 4  ;;  %429 = sbr.rel (%p1567_p3) target bundleno = 1629 (0x65d), region = 64  ;;  %s396_s26 = int_to_ptr.vmem [resolvable:$true] %s395_s26 }
  0x1c   : > { %1171 = dma.hbm_to_vmem [thread:$0]  (!%p1578_p5), %s394_s19, 16, %s396_s26, [#allocation11]  }
  0x20   : > { %1454 = dma.done.wait (%p1172_p2), [#allocation3], 16  }
  0x21   : > { %1456 = vsyncadd (%p1172_p2), [#allocation3], 4294967280 }
  0x22   : > { %1458 = dma.done.wait (%p1172_p2), [#allocation5], 528  }
  0x23   : > { %1460 = vsyncadd (%p1172_p2), [#allocation5], 4294966768 }
  0x24   : > { %1462 = dma.done.wait (%p1172_p2), [#allocation8], 528  }
  0x25   : > { %1464 = vsyncadd (%p1172_p2), [#allocation8], 4294966768 }
  0x26   : > { %1466 = dma.done.wait (%p1172_p2), [#allocation11], 32  }
  0x27   : > { %1468 = vsyncadd (%p1172_p2), [#allocation11], 4294967264  ;;  %p506_p6 = scmp.lt.s32.totalorder %s1562_s21, 1  ;;  %v527_v0 = vld [vmem:[%s1710_s2 + $0x18] sm:$0xff]  ;;  %v526_v2 = vld [vmem:[%s1710_s2 + $0x10] sm:$0xff]  ;;  %vm532_vm0 = vcmask 261120  }
  0x28   : > { %v559_v1 = vld [vmem:[#allocation4 + $0x18] sm:$0xff]  ;;  %548 = vmatpush.msra.mxu0 %v527_v0  ;;  %v558_v3 = vld [vmem:[#allocation4 + $0x10] sm:$0xff]  ;;  %v525_v4 = vld [vmem:[%s1710_s2 + $0x8] sm:$0xff]  ;;  %vm588_vm1 = vcmask 64512   ;;  %s1482_s4 = smov 96   ;;  %s1483_s23 = smov 120  }
  0x29   : > { %s1725_s21 = smov (!%p506_p6, %s1562_s21), 1  ;;  %579 = vmatpush.msra.mxu1 %v559_v1  ;;  %v557_v5 = vld [vmem:[#allocation4 + $0x8] sm:$0xff]  ;;  %v524_v6 = vld [vmem:[%s1710_s2] sm:$0xff]  ;;  %s1484_s25 = smov 104   ;;  %vm860_vm2 = vcmask 130048   ;;  %vm862_vm3 = vcmask 195584  }
  0x2a   : > { %s1631_s22 = sshll.u32 %s1725_s21, 3  ;;  %549 = vmatpush.msra.mxu0 %v526_v2  ;;  %v556_v7 = vld [vmem:[#allocation4] sm:$0xff]  ;;  %v1214_v10 = vld [vmem:[#allocation2] ss:$0 sm:$0xff]  ;;  %s1485_s26 = smov 112  }
  0x2b   : > { %s509_s30 = scalar_lea.vmem %s1708_s0, %s1631_s22  ;;  %s513_s14 = scalar_lea.vmem %s1709_s1, %s1631_s22  ;;  %580 = vmatpush.msra.mxu1 %v558_v3  ;;  %v1215_v11 = vld [vmem:[#allocation6] ss:$0 sm:$0xff] }
  0x2c   : > { %550 = vmatpush.msra.mxu0 %v525_v4  ;;  %v1653_v8 = vld [vmem:[%s509_s30] sm:$0xff]  ;;  %s517_s12 = scalar_lea.vmem %s1716_s8, %s1631_s22  ;;  %s1486_s13 = smov 72  }
  0x2d   : > { %581 = vmatpush.msra.mxu1 %v557_v5  ;;  %v523_v9 = vld [vmem:[%s513_s14] sm:$0xff]  ;;  %s1487_s20 = smov 88   ;;  %s1488_s24 = smov 80  }
  0x2e   : > { %551 = vmatpush.msra.mxu0 %v524_v6  ;;  %v587_v21 = vld [vmem:[%s517_s12] sm:$0xff]  ;;  %s1489_s21 = smov 8   ;;  %s1490_s27 = smov 24  }
  0x2f   : > { %582 = vmatpush.msra.mxu1 %v556_v7  ;;  %1105 = vmatmul.msk.f32.vlgmr.msra.gmra.mxu0 %vm532_vm0, %v1653_v8  ;;  %s1491_s30 = smov 16   ;;  %s521_s14 = scalar_lea.vmem %s1719_s11, %s1631_s22 }
  0x30   : > { %1106 = vmatmul.msk.f32.vlgmr.msra.gmra.mxu1 %vm532_vm0, %v523_v9 }
  0xac   : > { %v553_v12 = vpop.f32.mrf.mxu0 }
  0xad   : > { %v584_v13 = vpop.f32.mrf.mxu1  ;;  %v554_v14 = vadd.f32 %v1214_v10, %v553_v12  ;;  %v867_v12 = vld [vmem:[#allocation7 + $0x18] sm:$0xff] }
  0xae   : > { %v1658_v15 = vadd.f32 %v1215_v11, %v584_v13  ;;  %v866_v13 = vld [vmem:[#allocation7 + $0x10] sm:$0xff] }
  0xaf   : > { %652 = vrot.lane.b32.xlu2 %v554_v14, %s1483_s23 }
  0xb0   : > { %626 = vrot.lane.b32.xlu1 %v1658_v15, %s1482_s4  ;;  %1107 = vmatpush.xpose.msk.msra.mxu2 %vm588_vm1, %v1658_v15 }
  0xb3   : > { %1108 = vmatmul.msk.f32.vlgmr.msra.gmra.mxu2 %vm588_vm1, %v554_v14 }
  0xb7   : > { %784 = vrot.lane.b32.xlu2 %v1658_v15, %s1484_s25 }
  0xb8   : > { %654 = vrot.lane.b32.xlu1 %v1658_v15, %s1483_s23 }
  0xbf   : > { %717 = vrot.lane.b32.xlu2 %v554_v14, %s1485_s26 }
  0xc0   : > { %719 = vrot.lane.b32.xlu1 %v1658_v15, %s1485_s26 }
 0x109   : > { %v653_v16 = vpop.permute.xlu2 %652 }
 0x111   : > { %v785_v19 = vpop.permute.xlu2 %784 }
 0x119   : > { %v718_v22 = vpop.permute.xlu2 %717 }
 0x122   : > { %v627_v17 = vpop.permute.xlu1 %626 }
 0x123   : > { %647 = vmatpush.msra.mxu3 %v627_v17 }
 0x12a   : > { %v655_v18 = vpop.permute.xlu1 %654 }
 0x12b   : > { %1110 = vmatpush.xpose.msk.msrb.mxu3 %vm588_vm1, %v655_v18 }
 0x132   : > { %v720_v20 = vpop.permute.xlu1 %719 }
 0x133   : > { %1113 = vmatpush.xpose.msk.msrb.mxu0 %vm588_vm1, %v720_v20 }
 0x136   : > { %v612_v23 = vpop.f32.mrf.mxu2  ;;  %1114 = vmatmul.msk.f32.vlgmr.msrb.gmra.mxu0 %vm588_vm1, %v718_v22  ;;  %v1216_v22 = vld [vmem:[#allocation9] ss:$0 sm:$0xff] }
 0x137   : > { %v613_v24 = vadd.f32 %v612_v23, %v587_v21  ;;  %887 = vmatpush.msra.mxu0 %v867_v12 }
 0x139   : > { %v615_v25 = vsel %vm588_vm1, %v613_v24, -inf  ;;  %888 = vmatpush.msra.mxu0 %v866_v13 }
 0x13a   : > { %616 = vmax.xlane.f32.xlu0 %v615_v25 }
 0x1ad   : > { %v617_v26 = vpop.xlane.xlu0 %616 }
 0x1ae   : > { %v618_v27 = vsub.f32 %v613_v24, %v617_v26 }
 0x1b0   : > { %v619_v28 = vmul.f32 1.442695, %v618_v27  ;;  %v1492_v27 = vmov 32.0  }
 0x1b2   : > { %1219 = vpow2.f32 %v619_v28 }
 0x1b3   : > { %v742_v31 = vpop.f32.mrf.mxu0 }
 0x1b4   : > { %v743_v32 = vadd.f32 %v742_v31, %v587_v21 }
 0x1b6   : > { %v745_v33 = vsel %vm588_vm1, %v743_v32, -inf }
 0x1b8   : > { %v1220_v29 = vpop.eup %1219 }
 0x1b9   : > { %v621_v30 = vsel %vm588_vm1, %v1220_v29, 0.0 }
 0x1ba   : > { %622 = vadd.xlane.f32.xlu0 %v621_v30 }
 0x1ce   : > { %782 = vrot.lane.b32.xlu0 %v554_v14, %s1484_s25  ;;  %v865_v14 = vld [vmem:[#allocation7 + $0x8] sm:$0xff] }
 0x1cf   : > { %889 = vmatpush.msra.mxu0 %v865_v14 }
 0x1f8   : > { %746 = vmax.xlane.f32.xlu0 %v745_v33 }
 0x20c   : > { %821 = vrot.lane.b32.xlu0 %v1658_v15, %s1486_s13 }
 0x22d   : > { %v623_v34 = vpop.xlane.xlu0 %622 }
 0x22e   : > { %1221 = vrcp.f32 %v623_v34 }
 0x234   : > { %v1222_v35 = vpop.eup %1221 }
 0x235   : > { %v625_v36 = vmul.f32 %v1222_v35, %v1220_v29 }
 0x237   : > { %1109 = vmatmul.msk.f32.vlgmr.msra.gmra.mxu3 %vm588_vm1, %v625_v36 }
 0x238   : > { %1116 = vmatpush.xpose.msk.msra.mxu3 %vm588_vm1, %v785_v19 }
 0x23f   : > { %1111 = vmatmul.msk.f32.vlgmr.msrb.gmra.mxu3 %vm588_vm1, %v653_v16 }
 0x240   : > { %v783_v37 = vpop.permute.xlu0 %782 }
 0x247   : > { %1117 = vmatmul.msk.f32.vlgmr.msra.gmra.mxu3 %vm588_vm1, %v783_v37 }
 0x26b   : > { %v747_v38 = vpop.xlane.xlu0 %746 }
 0x26c   : > { %v748_v40 = vsub.f32 %v743_v32, %v747_v38 }
 0x26e   : > { %v749_v41 = vmul.f32 1.442695, %v748_v40 }
 0x270   : > { %1223 = vpow2.f32 %v749_v41 }
 0x276   : > { %v1224_v45 = vpop.eup %1223 }
 0x277   : > { %v751_v49 = vsel %vm588_vm1, %v1224_v45, 0.0 }
 0x27e   : > { %v822_v2 = vpop.permute.xlu0 %821 }
 0x2ba   : > { %v1682_v39 = vpop.f32.mrf.mxu3 }
 0x2c2   : > { %v677_v42 = vpop.f32.mrf.mxu3 }
 0x2c3   : > { %v678_v43 = vadd.f32 %v677_v42, %v587_v21 }
 0x2c5   : > { %v680_v44 = vsel %vm588_vm1, %v678_v43, -inf }
 0x2c6   : > { %681 = vmax.xlane.f32.xlu1 %v680_v44 }
 0x2ca   : > { %v807_v46 = vpop.f32.mrf.mxu3 }
 0x2cb   : > { %v808_v47 = vadd.f32 %v807_v46, %v587_v21 }
 0x2cd   : > { %v810_v48 = vsel %vm588_vm1, %v808_v47, -inf }
 0x2ce   : > { %811 = vmax.xlane.f32.xlu2 %v810_v48  ;;  %752 = vadd.xlane.f32.xlu1 %v751_v49  ;;  %v1218_v49 = vld [vmem:[#allocation12] ss:$0 sm:$0xff] }
 0x339   : > { %v682_v50 = vpop.xlane.xlu1 %681 }
 0x33a   : > { %v683_v51 = vsub.f32 %v678_v43, %v682_v50 }
 0x33c   : > { %v684_v52 = vmul.f32 1.442695, %v683_v51 }
 0x33e   : > { %1225 = vpow2.f32 %v684_v52 }
 0x341   : > { %v812_v53 = vpop.xlane.xlu2 %811  ;;  %v753_v60 = vpop.xlane.xlu1 %752 }
 0x342   : > { %v813_v54 = vsub.f32 %v808_v47, %v812_v53  ;;  %v1217_v47 = vld [vmem:[#allocation10] ss:$0 sm:$0xff] }
 0x344   : > { %v1226_v55 = vpop.eup %1225  ;;  %v814_v56 = vmul.f32 1.442695, %v813_v54 }
 0x345   : > { %v686_v57 = vsel %vm588_vm1, %v1226_v55, 0.0 }
 0x346   : > { %1227 = vpow2.f32 %v814_v56  ;;  %687 = vadd.xlane.f32.xlu2 %v686_v57 }
 0x34c   : > { %v1228_v58 = vpop.eup %1227 }
 0x34d   : > { %v816_v59 = vsel %vm588_vm1, %v1228_v58, 0.0 }
 0x34e   : > { %817 = vadd.xlane.f32.xlu1 %v816_v59 }
 0x35e   : > { %691 = vrot.lane.b32.xlu2 %v1658_v15, %s1487_s20 }
 0x367   : > { %756 = vrot.lane.b32.xlu1 %v1658_v15, %s1488_s24  ;;  %v864_v15 = vld [vmem:[#allocation7] sm:$0xff] }
 0x368   : > { %890 = vmatpush.msra.mxu0 %v864_v15 }
 0x3b9   : > { %v688_v61 = vpop.xlane.xlu2 %687 }
 0x3ba   : > { %1229 = vrcp.f32 %v688_v61 }
 0x3c0   : > { %v1230_v62 = vpop.eup %1229 }
 0x3c1   : > { %v692_v63 = vpop.permute.xlu2 %691  ;;  %v818_v0 = vpop.xlane.xlu1 %817  ;;  %v690_v1 = vmul.f32 %v1230_v62, %v1226_v55 }
 0x3c2   : > { %1231 = vrcp.f32 %v818_v0  ;;  %712 = vmatpush.msrb.mxu2 %v692_v63 }
 0x3c3   : > { %1112 = vmatmul.msk.f32.vlgmr.msrb.gmra.mxu2 %vm588_vm1, %v690_v1  ;;  %1233 = vrcp.f32 %v753_v60 }
 0x3c4   : > { %842 = vmatpush.msra.mxu2 %v822_v2  ;;  %1235 = vrcp.f32 %v1492_v27 }
 0x3c8   : > { %v1232_v3 = vpop.eup %1231 }
 0x3c9   : > { %v820_v4 = vmul.f32 %v1232_v3, %v1228_v58  ;;  %v1234_v5 = vpop.eup %1233 }
 0x3ca   : > { %v755_v7 = vmul.f32 %v1234_v5, %v1224_v45  ;;  %v1236_v28 = vpop.eup %1235 }
 0x3cb   : > { %1118 = vmatmul.msk.f32.vlgmr.msra.gmra.mxu2 %vm588_vm1, %v820_v4  ;;  %v900_v29 = vmul.f32 32.0, %v1236_v28  ;;  %vm904_vm4 = vweird.f32 %v1236_v28 }
 0x3cd   : > { %v901_v30 = vsub.f32 1.0, %v900_v29 }
 0x3cf   : > { %v902_v31 = vmul.f32 %v1236_v28, %v901_v30 }
 0x3d1   : > { %v903_v32 = vadd.f32 %v1236_v28, %v902_v31 }
 0x3d3   : > { %v905_v33 = vsel %vm904_vm4, %v1236_v28, %v903_v32 }
 0x3d9   : > { %v757_v6 = vpop.permute.xlu1 %756 }
 0x3da   : > { %777 = vmatpush.msrb.mxu1 %v757_v6 }
 0x3db   : > { %1115 = vmatmul.msk.f32.vlgmr.msrb.gmra.mxu1 %vm588_vm1, %v755_v7 }
 0x446   : > { %v714_v9 = vpop.f32.mrf.mxu2 }
 0x447   : > { %848 = vrot.lane.b32.xlu2 %v714_v9, %s1489_s21 }
 0x44e   : > { %v844_v10 = vpop.f32.mrf.mxu2 }
 0x44f   : > { %856 = vrot.lane.b32.xlu2 %v844_v10, %s1490_s27 }
 0x458   : > { %v779_v11 = vpop.f32.mrf.mxu1 }
 0x459   : > { %852 = vrot.lane.b32.xlu0 %v779_v11, %s1491_s30 }
 0x4a1   : > { %v849_v16 = vpop.permute.xlu2 %848 }
 0x4a2   : > { %v859_v17 = vsel %vm588_vm1, %v1682_v39, %v849_v16 }
 0x4a9   : > { %v857_v19 = vpop.permute.xlu2 %856 }
 0x4cb   : > { %v853_v18 = vpop.permute.xlu0 %852 }
 0x4cc   : > { %v861_v20 = vsel %vm860_vm2, %v859_v17, %v853_v18 }
 0x4cd   : > { %v863_v21 = vsel %vm862_vm3, %v861_v20, %v857_v19 }
 0x4ce   : > { %1119 = vmatmul.msk.f32.vlgmr.msra.gmra.mxu0 %vm532_vm0, %v863_v21 }
 0x54b   : > { %v892_v23 = vpop.f32.mrf.mxu0 }
 0x54c   : > { %v893_v24 = vadd.f32 %v1216_v22, %v892_v23 }
 0x54e   : > { %v895_v25 = vadd.f32 %v893_v24, %v1653_v8 }
 0x550   : > { %v896_v26 = vsel %vm532_vm0, %v895_v25, 0.0 }
 0x551   : > { %897 = vadd.xlane.f32.xlu0 %v896_v26 }
 0x5c4   : > { %v898_v34 = vpop.xlane.xlu0 %897 }
 0x5c5   : > { %v906_v35 = vmul.f32 %v905_v33, %v898_v34 }
 0x5c7   : > { %v907_v36 = vsub.f32 %v895_v25, %v906_v35 }
 0x5c9   : > { %v908_v37 = vmul.f32 %v907_v36, %v907_v36 }
 0x5cb   : > { %v909_v38 = vsel %vm532_vm0, %v908_v37, 0.0 }
 0x5cc   : > { %910 = vadd.xlane.f32.xlu1 %v909_v38 }
 0x63f   : > { %v911_v8 = vpop.xlane.xlu1 %910 }
 0x640   : > { %v912_v39 = vmul.f32 %v911_v8, %v905_v33 }
 0x642   : > { %v913_v40 = vadd.f32 1e-05, %v912_v39 }
 0x644   : > { %1237 = vrsqrt.f32 %v913_v40  ;;  %vm920_vm6 = vweird.f32 %v913_v40 }
 0x64a   : > { %v1238_v41 = vpop.eup %1237 }
 0x64b   : > { %v915_v42 = vmul.f32 %v1238_v41, %v913_v40  ;;  %vm921_vm5 = vweird.f32 %v1238_v41 }
 0x64c   : > { %vm922_vm7 = vmor %vm920_vm6, %vm921_vm5 }
 0x64d   : > { %v916_v43 = vmul.f32 %v1238_v41, %v915_v42 }
 0x64f   : > { %v917_v44 = vmul.f32 0.5, %v916_v43 }
 0x651   : > { %v918_v45 = vsub.f32 1.5, %v917_v44 }
 0x653   : > { %v919_v46 = vmul.f32 %v1238_v41, %v918_v45 }
 0x655   : > { %v923_v48 = vsel %vm922_vm7, %v1238_v41, %v919_v46 }
 0x656   : > { %v924_v50 = vmul.f32 %v923_v48, %v907_v36 }
 0x658   : > { %v929_v51 = vmul.f32 %v1217_v47, %v924_v50 }
 0x65a   : > { %v934_v52 = vadd.f32 %v1218_v49, %v929_v51 }
 0x65c   : > { %935 = vst.msk [vmem:[%s521_s14] sm:$0xff] %vm532_vm0, %v934_v52 }
 0x65d PF: > { %s25_s17 = sadd.s32 1, %s1471_s17  }
 0x65e   : > { %p22_p7 = scmp.ge.s32.totalorder %s25_s17, 4  }
 0x660   :  { %24 = sbr.rel (!%p22_p7) target bundleno = 6 (0x6), region = 129 }
 0x665   :  { %955 = vsyncpa [#allocation3], 1 }
 0x666   :  { %957 = vsyncpa [#allocation3 + $0x1], 1 }
 0x667   :  { %958 = vsyncpa [#allocation5], 1 }
 0x668   :  { %959 = vsyncpa [#allocation8], 1 }
 0x669   :  { %960 = vsyncpa [#allocation11], 1 }

// kernel: decoder_forward.13
= control target key start
LH: loop header
LB: loop body
LE: loop exit
PB: predicated region body
PF: predicated region fallthrough
CT: control target
= control target key end

     0   :  { %vm17_vm0 = vcmask 261120   ;;  %s184_s0 = inlined_call_operand.vmem [shape: f32[16,32], index: 0, kind: input, shape index: {}]   ;;  %s185_s1 = inlined_call_operand.vmem [shape: f32[1,32], index: 1, kind: input, shape index: {}]   ;;  %s186_s2 = inlined_call_operand.vmem [shape: f32[1,32], index: 2, kind: input, shape index: {}]   ;;  %s187_s3 = inlined_call_operand.hbm [shape: f32[16,32], index: 3, kind: output, shape index: {}]  }
   0x1   :  { %v15_v0 = vld [vmem:[%s184_s0] sm:$0xff] }
   0x2   :  { %v18_v1 = vsel %vm17_vm0, %v15_v0, 0.0 }
   0x3   :  { %8 = vsyncpa [#allocation3], 0  ;;  %19 = vadd.xlane.f32.xlu0 %v18_v1  ;;  %v16_v2 = vld [vmem:[%s184_s0 + $0x8] sm:$0xff]  ;;  %v139_v4 = vmov 32.0   ;;  %v105_v35 = vld [vmem:[%s185_s1] ss:$0 sm:$0xff] }
   0x4   :  { %v21_v3 = vsel %vm17_vm0, %v16_v2, 0.0  ;;  %107 = vrcp.f32 %v139_v4  ;;  %v106_v39 = vld [vmem:[%s186_s2] ss:$0 sm:$0xff]  ;;  %s140_s1 = smov [#allocation2]   ;;  %s89_s22 = sshll.u32 %s187_s3, 4  ;;  %s90_s22 = int_to_ptr.hbm [resolvable:$true] %s89_s22 }
   0x5   :  { %s87_s19 = sshll.u32 %s140_s1, 4  ;;  %s141_s2 = smov 128   ;;  %s88_s19 = int_to_ptr.vmem [resolvable:$true] %s87_s19 }
   0x6   :  { %s142_s23 = smov 8  }
   0xa   :  { %v108_v5 = vpop.eup %107 }
   0xb   :  { %22 = vadd.xlane.f32.xlu0 %v21_v3  ;;  %v25_v6 = vmul.f32 32.0, %v108_v5  ;;  %vm29_vm1 = vweird.f32 %v108_v5 }
   0xd   :  { %v26_v7 = vsub.f32 1.0, %v25_v6 }
   0xf   :  { %v27_v8 = vmul.f32 %v108_v5, %v26_v7 }
  0x11   :  { %v28_v9 = vadd.f32 %v108_v5, %v27_v8 }
  0x13   :  { %v30_v10 = vsel %vm29_vm1, %v108_v5, %v28_v9 }
  0x76   :  { %v20_v11 = vpop.xlane.xlu0 %19 }
  0x77   :  { %v31_v12 = vmul.f32 %v30_v10, %v20_v11 }
  0x79   :  { %v33_v13 = vsub.f32 %v15_v0, %v31_v12 }
  0x7b   :  { %v35_v14 = vmul.f32 %v33_v13, %v33_v13 }
  0x7d   :  { %v37_v15 = vsel %vm17_vm0, %v35_v14, 0.0 }
  0x7e   :  { %38 = vadd.xlane.f32.xlu1 %v37_v15  ;;  %v23_v16 = vpop.xlane.xlu0 %22 }
  0x7f   :  { %v32_v17 = vmul.f32 %v30_v10, %v23_v16 }
  0x81   :  { %v34_v18 = vsub.f32 %v16_v2, %v32_v17 }
  0x83   :  { %v36_v19 = vmul.f32 %v34_v18, %v34_v18 }
  0x85   :  { %v40_v20 = vsel %vm17_vm0, %v36_v19, 0.0 }
  0x86   :  { %41 = vadd.xlane.f32.xlu1 %v40_v20 }
  0xf1   :  { %v39_v21 = vpop.xlane.xlu1 %38 }
  0xf2   :  { %v43_v22 = vmul.f32 %v39_v21, %v30_v10 }
  0xf4   :  { %v45_v23 = vadd.f32 1e-05, %v43_v22 }
  0xf6   :  { %109 = vrsqrt.f32 %v45_v23  ;;  %vm53_vm3 = vweird.f32 %v45_v23 }
  0xf9   :  { %v42_v24 = vpop.xlane.xlu1 %41 }
  0xfa   :  { %v44_v25 = vmul.f32 %v42_v24, %v30_v10 }
  0xfc   :  { %v110_v26 = vpop.eup %109  ;;  %v46_v27 = vadd.f32 1e-05, %v44_v25 }
  0xfd   :  { %v48_v28 = vmul.f32 %v110_v26, %v45_v23  ;;  %vm54_vm2 = vweird.f32 %v110_v26 }
  0xfe   :  { %111 = vrsqrt.f32 %v46_v27  ;;  %vm55_vm4 = vmor %vm53_vm3, %vm54_vm2  ;;  %vm63_vm6 = vweird.f32 %v46_v27 }
  0xff   :  { %v49_v29 = vmul.f32 %v110_v26, %v48_v28 }
 0x101   :  { %v50_v30 = vmul.f32 0.5, %v49_v29 }
 0x103   :  { %v51_v31 = vsub.f32 1.5, %v50_v30 }
 0x104   :  { %v112_v32 = vpop.eup %111 }
 0x105   :  { %v52_v33 = vmul.f32 %v110_v26, %v51_v31  ;;  %v58_v34 = vmul.f32 %v112_v32, %v46_v27  ;;  %vm64_vm5 = vweird.f32 %v112_v32 }
 0x106   :  { %vm65_vm7 = vmor %vm63_vm6, %vm64_vm5 }
 0x107   :  { %v56_v36 = vsel %vm55_vm4, %v110_v26, %v52_v33  ;;  %v59_v37 = vmul.f32 %v112_v32, %v58_v34 }
 0x108   :  { %v67_v38 = vmul.f32 %v56_v36, %v33_v13 }
 0x109   :  { %v60_v40 = vmul.f32 0.5, %v59_v37 }
 0x10a   :  { %v73_v41 = vmul.f32 %v105_v35, %v67_v38 }
 0x10b   :  { %v61_v42 = vsub.f32 1.5, %v60_v40 }
 0x10c   :  { %v79_v43 = vadd.f32 %v106_v39, %v73_v41 }
 0x10d   :  { %v62_v44 = vmul.f32 %v112_v32, %v61_v42 }
 0x10e   :  { %81 = vst.msk [vmem:[#allocation2] sm:$0xff] %vm17_vm0, %v79_v43 }
 0x10f   :  { %v66_v45 = vsel %vm65_vm7, %v112_v32, %v62_v44 }
 0x110   :  { %v68_v46 = vmul.f32 %v66_v45, %v34_v18 }
 0x112   :  { %v74_v47 = vmul.f32 %v105_v35, %v68_v46 }
 0x114   :  { %v80_v48 = vadd.f32 %v106_v39, %v74_v47 }
 0x116   :  { %82 = vst.msk [vmem:[#allocation2 + $0x8] sm:$0xff] %vm17_vm0, %v80_v48 }
 0x117   :  { %95 = dma.vmem_to_hbm [thread:$0]  %s88_s19, 256, %s90_s22, [#allocation3], %s141_s2, %s141_s2, %s142_s23  }
 0x118   :  { %137 = dma.done.wait [#allocation3], 256  }
 0x119   :  { %138 = vsyncadd [#allocation3], 4294967040 }
 0x11a   :  { %100 = vsyncpa [#allocation3], 1 }

// kernel: decoder_forward.11
= control target key start
LH: loop header
LB: loop body
LE: loop exit
PB: predicated region body
PF: predicated region fallthrough
CT: control target
= control target key end

     0   :  { %s1555_s0 = inlined_call_operand.vmem [shape: f32[2,8,32], index: 0, kind: input, shape index: {}]   ;;  %s1556_s1 = inlined_call_operand.vmem [shape: f32[2,8,32], index: 1, kind: input, shape index: {}]   ;;  %s1557_s2 = inlined_call_operand.hbm [shape: f32[32,32], index: 2, kind: input, shape index: {}]   ;;  %s1558_s3 = inlined_call_operand.vmem [shape: f32[1,32], index: 3, kind: input, shape index: {}]   ;;  %s1559_s4 = inlined_call_operand.hbm [shape: f32[32,64], index: 4, kind: input, shape index: {}]   ;;  %s1560_s5 = inlined_call_operand.vmem [shape: f32[1,64], index: 5, kind: input, shape index: {}]   ;;  %s1561_s6 = inlined_call_operand.hbm [shape: f32[32,32], index: 6, kind: input, shape index: {}]   ;;  %s1562_s7 = inlined_call_operand.vmem [shape: f32[1,32], index: 7, kind: input, shape index: {}]   ;;  %s1563_s8 = inlined_call_operand.vmem [shape: f32[2,8,8], index: 8, kind: input, shape index: {}]   ;;  %s1564_s9 = inlined_call_operand.hbm [shape: f32[1,32], index: 9, kind: input, shape index: {}]   ;;  %s1565_s10 = inlined_call_operand.hbm [shape: f32[1,32], index: 10, kind: input, shape index: {}]   ;;  %s1566_s11 = inlined_call_operand.vmem [shape: f32[2,8,32], index: 11, kind: output, shape index: {}]  }
   0x1   :  { %1567 = sst [smem:[#allocation13_spill]] %s1557_s2 }
   0x2   :  { %16 = vsyncpa [#allocation3], 0 }
   0x3   :  { %17 = vsyncpa [#allocation5], 0 }
   0x4   :  { %18 = vsyncpa [#allocation8], 0  ;;  %s1417_s17 = smov 0  }
   0x5 LB: > { %s1423_s18 = sadd.s32 4294967295, %s1337_s17   ;;  %p1038_p0 = scmp.ge.s32.totalorder %s1337_s17, 1  ;;  %s1337_s17 = sphi %s1417_s17, %s24_s17  }
   0x6   : > { %p301_p1 = scmp.lt.s32.totalorder %s1337_s17, 3  ;;  %p1108_p2 = scmp.eq.s32.totalorder %s1423_s18, 0 }
   0x7   : > { %s329_s21 = sshll.u32 %s1559_s4, 4  ;;  %s364_s25 = sshll.u32 %s1564_s9, 4  ;;  %s330_s21 = int_to_ptr.hbm [resolvable:$true] %s329_s21  ;;  %s365_s25 = int_to_ptr.hbm [resolvable:$true] %s364_s25 }
   0x8   : > { %p1431_p3 = pnand %p1038_p0, %p301_p1  ;;  %s1339_s26 = smov [#allocation4]  }
   0x9   : > { %s331_s27 = sshll.u32 %s1339_s26, 4  ;;  %s1340_s29 = smov [#allocation7]   ;;  %s332_s27 = int_to_ptr.vmem [resolvable:$true] %s331_s27 }
   0xa   : > { %p1092_p4 = pneg %p1431_p3  ;;  %s366_s30 = sshll.u32 %s1340_s29, 4  ;;  %s367_s30 = int_to_ptr.vmem [resolvable:$true] %s366_s30 }
   0xb   : > { %s1570_s2 = sld [smem:[#allocation13_spill]]  ;;  %s1341_s15 = smov 128  }
   0xc   : > { %p1442_p5 = pnand %p1108_p2, %p1092_p4  ;;  %s1342_s16 = smov 8  }
   0xd   : > { %s1343_s19 = smov [#allocation2]   ;;  %s346_s26 = sshll.u32 %s1561_s6, 4  ;;  %s347_s26 = int_to_ptr.hbm [resolvable:$true] %s346_s26 }
   0xe   : > { %1098 = dma.hbm_to_vmem [thread:$0]  (!%p1442_p5), %s330_s21, 512, %s332_s27, [#allocation5], %s1341_s15, %s1341_s15, %s1342_s16  }
   0xf   : > { %1104 = dma.hbm_to_vmem [thread:$0]  (!%p1442_p5), %s365_s25, 16, %s367_s30, [#allocation8]  }
  0x10   : > { %s314_s20 = sshll.u32 %s1343_s19, 4  ;;  %s376_s13 = sshll.u32 %s1565_s10, 4  ;;  %s315_s20 = int_to_ptr.vmem [resolvable:$true] %s314_s20  ;;  %s377_s13 = int_to_ptr.hbm [resolvable:$true] %s376_s13 }
  0x11   : > { %s312_s14 = sshll.u32 %s1570_s2, 4  ;;  %s1344_s2 = smov [#allocation6]   ;;  %s313_s14 = int_to_ptr.hbm [resolvable:$true] %s312_s14 }
  0x12   : > { %1095 = dma.hbm_to_vmem [thread:$0]  (!%p1442_p5), %s313_s14, 512, %s315_s20, [#allocation3], %s1341_s15, %s1341_s15, %s1342_s16  }
  0x13   : > { %s348_s21 = sshll.u32 %s1344_s2, 4  ;;  %s1345_s25 = smov [#allocation9]   ;;  %s349_s21 = int_to_ptr.vmem [resolvable:$true] %s348_s21 }
  0x14   : > { %1101 = dma.hbm_to_vmem [thread:$0]  (!%p1442_p5), %s347_s26, 512, %s349_s21, [#allocation5], %s1341_s15, %s1341_s15, %s1342_s16  }
  0x15   : > { %s378_s27 = sshll.u32 %s1345_s25, 4  ;;  %412 = sbr.rel (%p1431_p3) target bundleno = 1621 (0x655), region = 64  ;;  %s379_s27 = int_to_ptr.vmem [resolvable:$true] %s378_s27 }
  0x16   : > { %1107 = dma.hbm_to_vmem [thread:$0]  (!%p1442_p5), %s377_s13, 16, %s379_s27, [#allocation8]  }
  0x1a   : > { %1324 = dma.done.wait (%p1108_p2), [#allocation3], 512  }
  0x1b   : > { %1326 = vsyncadd (%p1108_p2), [#allocation3], 4294966784 }
  0x1c   : > { %1328 = dma.done.wait (%p1108_p2), [#allocation5], 1024  }
  0x1d   : > { %1330 = vsyncadd (%p1108_p2), [#allocation5], 4294966272 }
  0x1e   : > { %1332 = dma.done.wait (%p1108_p2), [#allocation8], 32  }
  0x1f   : > { %1334 = vsyncadd (%p1108_p2), [#allocation8], 4294967264  ;;  %p479_p6 = scmp.lt.s32.totalorder %s1423_s18, 1  ;;  %v500_v0 = vld [vmem:[#allocation2 + $0x18] sm:$0xff]  ;;  %v499_v2 = vld [vmem:[#allocation2 + $0x10] sm:$0xff]  ;;  %vm505_vm0 = vcmask 261120  }
  0x20   : > { %v532_v1 = vld [vmem:[#allocation4 + $0x18] sm:$0xff]  ;;  %521 = vmatpush.msra.mxu0 %v500_v0  ;;  %v531_v3 = vld [vmem:[#allocation4 + $0x10] sm:$0xff]  ;;  %v498_v4 = vld [vmem:[#allocation2 + $0x8] sm:$0xff]  ;;  %vm561_vm1 = vcmask 64512   ;;  %s1346_s24 = smov 96   ;;  %s1347_s26 = smov 120  }
  0x21   : > { %s1572_s18 = smov (!%p479_p6, %s1423_s18), 1  ;;  %552 = vmatpush.msra.mxu1 %v532_v1  ;;  %v530_v5 = vld [vmem:[#allocation4 + $0x8] sm:$0xff]  ;;  %v497_v6 = vld [vmem:[#allocation2] sm:$0xff]  ;;  %s1348_s29 = smov 104   ;;  %vm833_vm2 = vcmask 130048   ;;  %vm835_vm3 = vcmask 195584  }
  0x22   : > { %s1481_s2 = sshll.u32 %s1572_s18, 3  ;;  %522 = vmatpush.msra.mxu0 %v499_v2  ;;  %v529_v7 = vld [vmem:[#allocation4] sm:$0xff]  ;;  %s1349_s12 = smov 112  }
  0x23   : > { %s482_s30 = scalar_lea.vmem %s1555_s0, %s1481_s2  ;;  %s486_s16 = scalar_lea.vmem %s1556_s1, %s1481_s2  ;;  %553 = vmatpush.msra.mxu1 %v531_v3  ;;  %v1144_v10 = vld [vmem:[%s1558_s3] ss:$0 sm:$0xff] }
  0x24   : > { %523 = vmatpush.msra.mxu0 %v498_v4  ;;  %v1491_v8 = vld [vmem:[%s482_s30] sm:$0xff]  ;;  %s490_s25 = scalar_lea.vmem %s1563_s8, %s1481_s2  ;;  %s1350_s27 = smov 72  }
  0x25   : > { %554 = vmatpush.msra.mxu1 %v530_v5  ;;  %v496_v9 = vld [vmem:[%s486_s16] sm:$0xff]  ;;  %s1351_s22 = smov 88   ;;  %s1352_s28 = smov 80  }
  0x26   : > { %524 = vmatpush.msra.mxu0 %v497_v6  ;;  %v1145_v11 = vld [vmem:[%s1560_s5] ss:$0 sm:$0xff]  ;;  %s1353_s30 = smov 8   ;;  %s1354_s14 = smov 24  }
  0x27   : > { %555 = vmatpush.msra.mxu1 %v529_v7  ;;  %1055 = vmatmul.msk.f32.vlgmr.msra.gmra.mxu0 %vm505_vm0, %v1491_v8  ;;  %v560_v21 = vld [vmem:[%s490_s25] sm:$0xff]  ;;  %s1355_s15 = smov 16   ;;  %s494_s23 = scalar_lea.vmem %s1566_s11, %s1481_s2 }
  0x28   : > { %1056 = vmatmul.msk.f32.vlgmr.msra.gmra.mxu1 %vm505_vm0, %v496_v9 }
  0xa4   : > { %v526_v12 = vpop.f32.mrf.mxu0 }
  0xa5   : > { %v557_v13 = vpop.f32.mrf.mxu1  ;;  %v527_v14 = vadd.f32 %v1144_v10, %v526_v12  ;;  %v840_v12 = vld [vmem:[#allocation6 + $0x18] sm:$0xff] }
  0xa6   : > { %v1502_v15 = vadd.f32 %v1145_v11, %v557_v13  ;;  %v839_v13 = vld [vmem:[#allocation6 + $0x10] sm:$0xff] }
  0xa7   : > { %625 = vrot.lane.b32.xlu2 %v527_v14, %s1347_s26 }
  0xa8   : > { %599 = vrot.lane.b32.xlu1 %v1502_v15, %s1346_s24  ;;  %1057 = vmatpush.xpose.msk.msra.mxu2 %vm561_vm1, %v1502_v15 }
  0xab   : > { %1058 = vmatmul.msk.f32.vlgmr.msra.gmra.mxu2 %vm561_vm1, %v527_v14 }
  0xaf   : > { %757 = vrot.lane.b32.xlu2 %v1502_v15, %s1348_s29 }
  0xb0   : > { %627 = vrot.lane.b32.xlu1 %v1502_v15, %s1347_s26 }
  0xb7   : > { %690 = vrot.lane.b32.xlu2 %v527_v14, %s1349_s12 }
  0xb8   : > { %692 = vrot.lane.b32.xlu1 %v1502_v15, %s1349_s12 }
 0x101   : > { %v626_v16 = vpop.permute.xlu2 %625 }
 0x109   : > { %v758_v19 = vpop.permute.xlu2 %757 }
 0x111   : > { %v691_v22 = vpop.permute.xlu2 %690 }
 0x11a   : > { %v600_v17 = vpop.permute.xlu1 %599 }
 0x11b   : > { %620 = vmatpush.msra.mxu3 %v600_v17 }
 0x122   : > { %v628_v18 = vpop.permute.xlu1 %627 }
 0x123   : > { %1060 = vmatpush.xpose.msk.msrb.mxu3 %vm561_vm1, %v628_v18 }
 0x12a   : > { %v693_v20 = vpop.permute.xlu1 %692 }
 0x12b   : > { %1063 = vmatpush.xpose.msk.msrb.mxu0 %vm561_vm1, %v693_v20 }
 0x12e   : > { %v585_v23 = vpop.f32.mrf.mxu2  ;;  %1064 = vmatmul.msk.f32.vlgmr.msrb.gmra.mxu0 %vm561_vm1, %v691_v22  ;;  %v1146_v22 = vld [vmem:[%s1562_s7] ss:$0 sm:$0xff] }
 0x12f   : > { %v586_v24 = vadd.f32 %v585_v23, %v560_v21  ;;  %860 = vmatpush.msra.mxu0 %v840_v12 }
 0x131   : > { %v588_v25 = vsel %vm561_vm1, %v586_v24, -inf  ;;  %861 = vmatpush.msra.mxu0 %v839_v13 }
 0x132   : > { %589 = vmax.xlane.f32.xlu0 %v588_v25 }
 0x1a5   : > { %v590_v26 = vpop.xlane.xlu0 %589 }
 0x1a6   : > { %v591_v27 = vsub.f32 %v586_v24, %v590_v26 }
 0x1a8   : > { %v592_v28 = vmul.f32 1.442695, %v591_v27  ;;  %v1356_v27 = vmov 32.0  }
 0x1aa   : > { %1149 = vpow2.f32 %v592_v28 }
 0x1ab   : > { %v715_v31 = vpop.f32.mrf.mxu0 }
 0x1ac   : > { %v716_v32 = vadd.f32 %v715_v31, %v560_v21 }
 0x1ae   : > { %v718_v33 = vsel %vm561_vm1, %v716_v32, -inf }
 0x1b0   : > { %v1150_v29 = vpop.eup %1149 }
 0x1b1   : > { %v594_v30 = vsel %vm561_vm1, %v1150_v29, 0.0 }
 0x1b2   : > { %595 = vadd.xlane.f32.xlu0 %v594_v30 }
 0x1c6   : > { %755 = vrot.lane.b32.xlu0 %v527_v14, %s1348_s29  ;;  %v838_v14 = vld [vmem:[#allocation6 + $0x8] sm:$0xff] }
 0x1c7   : > { %862 = vmatpush.msra.mxu0 %v838_v14 }
 0x1f0   : > { %719 = vmax.xlane.f32.xlu0 %v718_v33 }
 0x204   : > { %794 = vrot.lane.b32.xlu0 %v1502_v15, %s1350_s27 }
 0x225   : > { %v596_v34 = vpop.xlane.xlu0 %595 }
 0x226   : > { %1151 = vrcp.f32 %v596_v34 }
 0x22c   : > { %v1152_v35 = vpop.eup %1151 }
 0x22d   : > { %v598_v36 = vmul.f32 %v1152_v35, %v1150_v29 }
 0x22f   : > { %1059 = vmatmul.msk.f32.vlgmr.msra.gmra.mxu3 %vm561_vm1, %v598_v36 }
 0x230   : > { %1066 = vmatpush.xpose.msk.msra.mxu3 %vm561_vm1, %v758_v19 }
 0x237   : > { %1061 = vmatmul.msk.f32.vlgmr.msrb.gmra.mxu3 %vm561_vm1, %v626_v16 }
 0x238   : > { %v756_v37 = vpop.permute.xlu0 %755 }
 0x23f   : > { %1067 = vmatmul.msk.f32.vlgmr.msra.gmra.mxu3 %vm561_vm1, %v756_v37 }
 0x263   : > { %v720_v38 = vpop.xlane.xlu0 %719 }
 0x264   : > { %v721_v40 = vsub.f32 %v716_v32, %v720_v38 }
 0x266   : > { %v722_v41 = vmul.f32 1.442695, %v721_v40 }
 0x268   : > { %1153 = vpow2.f32 %v722_v41 }
 0x26e   : > { %v1154_v45 = vpop.eup %1153 }
 0x26f   : > { %v724_v49 = vsel %vm561_vm1, %v1154_v45, 0.0 }
 0x276   : > { %v795_v2 = vpop.permute.xlu0 %794 }
 0x2b2   : > { %v1526_v39 = vpop.f32.mrf.mxu3 }
 0x2ba   : > { %v650_v42 = vpop.f32.mrf.mxu3 }
 0x2bb   : > { %v651_v43 = vadd.f32 %v650_v42, %v560_v21 }
 0x2bd   : > { %v653_v44 = vsel %vm561_vm1, %v651_v43, -inf }
 0x2be   : > { %654 = vmax.xlane.f32.xlu1 %v653_v44 }
 0x2c2   : > { %v780_v46 = vpop.f32.mrf.mxu3 }
 0x2c3   : > { %v781_v47 = vadd.f32 %v780_v46, %v560_v21 }
 0x2c5   : > { %v783_v48 = vsel %vm561_vm1, %v781_v47, -inf }
 0x2c6   : > { %784 = vmax.xlane.f32.xlu2 %v783_v48  ;;  %725 = vadd.xlane.f32.xlu1 %v724_v49  ;;  %v1148_v49 = vld [vmem:[#allocation9] ss:$0 sm:$0xff] }
 0x331   : > { %v655_v50 = vpop.xlane.xlu1 %654 }
 0x332   : > { %v656_v51 = vsub.f32 %v651_v43, %v655_v50 }
 0x334   : > { %v657_v52 = vmul.f32 1.442695, %v656_v51 }
 0x336   : > { %1155 = vpow2.f32 %v657_v52 }
 0x339   : > { %v785_v53 = vpop.xlane.xlu2 %784  ;;  %v726_v60 = vpop.xlane.xlu1 %725 }
 0x33a   : > { %v786_v54 = vsub.f32 %v781_v47, %v785_v53  ;;  %v1147_v47 = vld [vmem:[#allocation7] ss:$0 sm:$0xff] }
 0x33c   : > { %v1156_v55 = vpop.eup %1155  ;;  %v787_v56 = vmul.f32 1.442695, %v786_v54 }
 0x33d   : > { %v659_v57 = vsel %vm561_vm1, %v1156_v55, 0.0 }
 0x33e   : > { %1157 = vpow2.f32 %v787_v56  ;;  %660 = vadd.xlane.f32.xlu2 %v659_v57 }
 0x344   : > { %v1158_v58 = vpop.eup %1157 }
 0x345   : > { %v789_v59 = vsel %vm561_vm1, %v1158_v58, 0.0 }
 0x346   : > { %790 = vadd.xlane.f32.xlu1 %v789_v59 }
 0x356   : > { %664 = vrot.lane.b32.xlu2 %v1502_v15, %s1351_s22 }
 0x35f   : > { %729 = vrot.lane.b32.xlu1 %v1502_v15, %s1352_s28  ;;  %v837_v15 = vld [vmem:[#allocation6] sm:$0xff] }
 0x360   : > { %863 = vmatpush.msra.mxu0 %v837_v15 }
 0x3b1   : > { %v661_v61 = vpop.xlane.xlu2 %660 }
 0x3b2   : > { %1159 = vrcp.f32 %v661_v61 }
 0x3b8   : > { %v1160_v62 = vpop.eup %1159 }
 0x3b9   : > { %v665_v63 = vpop.permute.xlu2 %664  ;;  %v791_v0 = vpop.xlane.xlu1 %790  ;;  %v663_v1 = vmul.f32 %v1160_v62, %v1156_v55 }
 0x3ba   : > { %1161 = vrcp.f32 %v791_v0  ;;  %685 = vmatpush.msrb.mxu2 %v665_v63 }
 0x3bb   : > { %1062 = vmatmul.msk.f32.vlgmr.msrb.gmra.mxu2 %vm561_vm1, %v663_v1  ;;  %1163 = vrcp.f32 %v726_v60 }
 0x3bc   : > { %815 = vmatpush.msra.mxu2 %v795_v2  ;;  %1165 = vrcp.f32 %v1356_v27 }
 0x3c0   : > { %v1162_v3 = vpop.eup %1161 }
 0x3c1   : > { %v793_v4 = vmul.f32 %v1162_v3, %v1158_v58  ;;  %v1164_v5 = vpop.eup %1163 }
 0x3c2   : > { %v728_v7 = vmul.f32 %v1164_v5, %v1154_v45  ;;  %v1166_v28 = vpop.eup %1165 }
 0x3c3   : > { %1068 = vmatmul.msk.f32.vlgmr.msra.gmra.mxu2 %vm561_vm1, %v793_v4  ;;  %v873_v29 = vmul.f32 32.0, %v1166_v28  ;;  %vm877_vm4 = vweird.f32 %v1166_v28 }
 0x3c5   : > { %v874_v30 = vsub.f32 1.0, %v873_v29 }
 0x3c7   : > { %v875_v31 = vmul.f32 %v1166_v28, %v874_v30 }
 0x3c9   : > { %v876_v32 = vadd.f32 %v1166_v28, %v875_v31 }
 0x3cb   : > { %v878_v33 = vsel %vm877_vm4, %v1166_v28, %v876_v32 }
 0x3d1   : > { %v730_v6 = vpop.permute.xlu1 %729 }
 0x3d2   : > { %750 = vmatpush.msrb.mxu1 %v730_v6 }
 0x3d3   : > { %1065 = vmatmul.msk.f32.vlgmr.msrb.gmra.mxu1 %vm561_vm1, %v728_v7 }
 0x43e   : > { %v687_v9 = vpop.f32.mrf.mxu2 }
 0x43f   : > { %821 = vrot.lane.b32.xlu2 %v687_v9, %s1353_s30 }
 0x446   : > { %v817_v10 = vpop.f32.mrf.mxu2 }
 0x447   : > { %829 = vrot.lane.b32.xlu2 %v817_v10, %s1354_s14 }
 0x450   : > { %v752_v11 = vpop.f32.mrf.mxu1 }
 0x451   : > { %825 = vrot.lane.b32.xlu0 %v752_v11, %s1355_s15 }
 0x499   : > { %v822_v16 = vpop.permute.xlu2 %821 }
 0x49a   : > { %v832_v17 = vsel %vm561_vm1, %v1526_v39, %v822_v16 }
 0x4a1   : > { %v830_v19 = vpop.permute.xlu2 %829 }
 0x4c3   : > { %v826_v18 = vpop.permute.xlu0 %825 }
 0x4c4   : > { %v834_v20 = vsel %vm833_vm2, %v832_v17, %v826_v18 }
 0x4c5   : > { %v836_v21 = vsel %vm835_vm3, %v834_v20, %v830_v19 }
 0x4c6   : > { %1069 = vmatmul.msk.f32.vlgmr.msra.gmra.mxu0 %vm505_vm0, %v836_v21 }
 0x543   : > { %v865_v23 = vpop.f32.mrf.mxu0 }
 0x544   : > { %v866_v24 = vadd.f32 %v1146_v22, %v865_v23 }
 0x546   : > { %v868_v25 = vadd.f32 %v866_v24, %v1491_v8 }
 0x548   : > { %v869_v26 = vsel %vm505_vm0, %v868_v25, 0.0 }
 0x549   : > { %870 = vadd.xlane.f32.xlu0 %v869_v26 }
 0x5bc   : > { %v871_v34 = vpop.xlane.xlu0 %870 }
 0x5bd   : > { %v879_v35 = vmul.f32 %v878_v33, %v871_v34 }
 0x5bf   : > { %v880_v36 = vsub.f32 %v868_v25, %v879_v35 }
 0x5c1   : > { %v881_v37 = vmul.f32 %v880_v36, %v880_v36 }
 0x5c3   : > { %v882_v38 = vsel %vm505_vm0, %v881_v37, 0.0 }
 0x5c4   : > { %883 = vadd.xlane.f32.xlu1 %v882_v38 }
 0x637   : > { %v884_v8 = vpop.xlane.xlu1 %883 }
 0x638   : > { %v885_v39 = vmul.f32 %v884_v8, %v878_v33 }
 0x63a   : > { %v886_v40 = vadd.f32 1e-05, %v885_v39 }
 0x63c   : > { %1167 = vrsqrt.f32 %v886_v40  ;;  %vm893_vm6 = vweird.f32 %v886_v40 }
 0x642   : > { %v1168_v41 = vpop.eup %1167 }
 0x643   : > { %v888_v42 = vmul.f32 %v1168_v41, %v886_v40  ;;  %vm894_vm5 = vweird.f32 %v1168_v41 }
 0x644   : > { %vm895_vm7 = vmor %vm893_vm6, %vm894_vm5 }
 0x645   : > { %v889_v43 = vmul.f32 %v1168_v41, %v888_v42 }
 0x647   : > { %v890_v44 = vmul.f32 0.5, %v889_v43 }
 0x649   : > { %v891_v45 = vsub.f32 1.5, %v890_v44 }
 0x64b   : > { %v892_v46 = vmul.f32 %v1168_v41, %v891_v45 }
 0x64d   : > { %v896_v48 = vsel %vm895_vm7, %v1168_v41, %v892_v46 }
 0x64e   : > { %v897_v50 = vmul.f32 %v896_v48, %v880_v36 }
 0x650   : > { %v902_v51 = vmul.f32 %v1147_v47, %v897_v50 }
 0x652   : > { %v907_v52 = vadd.f32 %v1148_v49, %v902_v51 }
 0x654   : > { %908 = vst.msk [vmem:[%s494_s23] sm:$0xff] %vm505_vm0, %v907_v52 }
 0x655 PF: > { %s24_s17 = sadd.s32 1, %s1337_s17  }
 0x656   : > { %p21_p7 = scmp.ge.s32.totalorder %s24_s17, 4  }
 0x658   :  { %23 = sbr.rel (!%p21_p7) target bundleno = 5 (0x5), region = 121 }
 0x65d   :  { %928 = vsyncpa [#allocation3], 1 }
 0x65e   :  { %930 = vsyncpa [#allocation3 + $0x1], 1 }
 0x65f   :  { %931 = vsyncpa [#allocation5], 1 }
 0x660   :  { %932 = vsyncpa [#allocation8], 1 }

</bundles_post_ra>
